<compile_context>
chip_gen: v7x
topology: tpu7x:2x2x1
jax: 0.10.0
libtpu: 0.0.40
codegen_flags: <defaults>
</compile_context>

<pallas_src>
import functools

import jax
import jax.numpy as jnp
import numpy as np
from jax.experimental import pallas as pl
from jax.experimental.pallas import tpu as pltpu

LANE = 128
NUM_ANCHORS = 3
NUM_CLASSES = 8
VMEM_LIMIT = 32 * 1024 * 1024


def _round_up(x, m):
    return (x + m - 1) // m * m


def _pick_divisor(n, target, mult=8):
    """Largest d <= target dividing n with d % mult == 0 (or d == n)."""
    target = max(1, min(n, target))
    for d in range(target, 0, -1):
        if n % d == 0 and (d % mult == 0 or d == n):
            return d
    return n


# ----------------------------------------------------------------------------
# Pallas kernels
# ----------------------------------------------------------------------------
def _backbone_conv_kernel(x_ref, w_ref, b_ref, o_ref):
    """im2col'd 3x3 stem conv: one (tile, K) @ (K, F) MXU push + bias + ReLU."""
    acc = jnp.dot(x_ref[0], w_ref[...], preferred_element_type=jnp.float32)
    o_ref[0] = jnp.maximum(acc + b_ref[...], 0.0).astype(o_ref.dtype)


def _rpn_kernel(cur_ref, top_ref, bot_ref, wp_ref, wl_ref, bc_ref, wh_ref,
                bh_ref, o_ref, pad_ref, acc_ref, *, th, W):
    """Row-tiled 3x3 conv + ReLU (halo built in VMEM, K=256 tap-paired MXU
    pushes) fused with the 1x1 objectness / anchor-delta heads."""
    i = pl.program_id(1)
    n_i = pl.num_programs(1)
    F = cur_ref.shape[-1]

    # ---- assemble zero-padded (th+2, W+2, F) slab with row halos ------------
    zrow = jnp.zeros((1, W + 2, F), dtype=pad_ref.dtype)
    zcol = jnp.zeros((th + 2, 1, F), dtype=pad_ref.dtype)
    pad_ref[0:1, :, :] = zrow
    pad_ref[th + 1:th + 2, :, :] = zrow
    pad_ref[:, 0:1, :] = zcol
    pad_ref[:, W + 1:W + 2, :] = zcol
    pad_ref[1:th + 1, 1:W + 1, :] = cur_ref[0]

    @pl.when(i > 0)
    def _():
        pad_ref[0:1, 1:W + 1, :] = top_ref[0]

    @pl.when(i < n_i - 1)
    def _():
        pad_ref[th + 1:th + 2, 1:W + 1, :] = bot_ref[0]

    def patch(dh, dw):
        return pad_ref[dh:dh + th, dw:dw + W, :].reshape(th * W, F)

    # ---- 3x3 conv: 4 paired K=2F pushes + 1 single K=F push -----------------
    for p_idx in range(4):
        t0, t1 = 2 * p_idx, 2 * p_idx + 1
        pair = jnp.concatenate(
            [patch(t0 // 3, t0 % 3), patch(t1 // 3, t1 % 3)], axis=-1)
        contrib = jnp.dot(pair, wp_ref[p_idx],
                          preferred_element_type=jnp.float32)
        if p_idx == 0:
            acc_ref[...] = contrib          # first pair writes (no zero-init pass)
        else:
            acc_ref[...] += contrib
    acc_ref[...] += jnp.dot(patch(2, 2), wl_ref[...],
                            preferred_element_type=jnp.float32)

    hidden = jnp.maximum(acc_ref[...] + bc_ref[...], 0.0).astype(jnp.bfloat16)
    out = jnp.dot(hidden, wh_ref[...],
                  preferred_element_type=jnp.float32) + bh_ref[...]
    o_ref[0] = out.astype(o_ref.dtype)


def _pool_boxhead_kernel(f_ref, w1_ref, b1_ref, w2_ref, b2_ref, wh_ref, bh_ref,
                         o_ref, acc_ref, *, inv_hw, sublane_partial):
    """Tiled global average pool (sublane-partial sums) + box_fc1/fc2 + fused
    cls_score / bbox_pred heads."""
    j = pl.program_id(1)

    @pl.when(j == 0)
    def _():
        acc_ref[...] = jnp.zeros_like(acc_ref)

    f = f_ref[0].astype(jnp.float32)                      # (tile, F)
    if sublane_partial:
        acc_ref[...] += jnp.sum(
            f.reshape(f.shape[0] // 8, 8, f.shape[1]), axis=0)
    else:
        acc_ref[...] += jnp.sum(f, axis=0, keepdims=True)

    @pl.when(j == pl.num_programs(1) - 1)
    def _():
        pooled = (jnp.sum(acc_ref[...], axis=0, keepdims=True)
                  * inv_hw).astype(jnp.bfloat16)
        h1 = jnp.maximum(
            jnp.dot(pooled, w1_ref[...], preferred_element_type=jnp.float32)
            + b1_ref[...], 0.0)
        h2 = jnp.maximum(
            jnp.dot(h1.astype(jnp.bfloat16), w2_ref[...],
                    preferred_element_type=jnp.float32) + b2_ref[...], 0.0)
        o_ref[0] = (jnp.dot(h2.astype(jnp.bfloat16), wh_ref[...],
                            preferred_element_type=jnp.float32) + bh_ref[...])


# ----------------------------------------------------------------------------
# Pallas wrappers
# ----------------------------------------------------------------------------
def pallas_backbone_conv(x_i2c, w, b, hw_tile=512):
    B, HW, K = x_i2c.shape
    F = w.shape[-1]
    thw = _pick_divisor(HW, hw_tile)
    return pl.pallas_call(
        _backbone_conv_kernel,
        out_shape=jax.ShapeDtypeStruct((B, HW, F), jnp.bfloat16),
        grid=(B, HW // thw),
        in_specs=[
            pl.BlockSpec((1, thw, K), lambda b_, j: (b_, j, 0)),
            pl.BlockSpec((K, F), lambda b_, j: (0, 0)),
            pl.BlockSpec((1, F), lambda b_, j: (0, 0)),
        ],
        out_specs=pl.BlockSpec((1, thw, F), lambda b_, j: (b_, j, 0)),
        compiler_params=pltpu.CompilerParams(
            dimension_semantics=("parallel", "parallel"),
            vmem_limit_bytes=VMEM_LIMIT),
    )(x_i2c, w, b)


def pallas_rpn_head(feats_hw, w_pairs, w_last, b_conv, w_head, b_head,
                    row_tile=None):
    B, H, W, F = feats_hw.shape
    NO = w_head.shape[-1]
    if row_tile is None:  # ~2 MiB of padded slab per tile
        row_tile = max(1, (2 * 1024 * 1024) // max(1, (W + 2) * F * 8))
    th = _pick_divisor(H, row_tile, mult=1)
    if (th * W) % 8 != 0:          # keep the flattened output block (8,*)-tiled
        th = H
    n_i = H // th
    kern = functools.partial(_rpn_kernel, th=th, W=W)

    def cur_map(b_, i):
        return (b_, i, 0, 0)

    def top_map(b_, i):            # block size 1 along H -> block idx == row idx
        return (b_, jnp.maximum(i * th - 1, 0), 0, 0)

    def bot_map(b_, i):
        return (b_, jnp.minimum(i * th + th, H - 1), 0, 0)

    return pl.pallas_call(
        kern,
        out_shape=jax.ShapeDtypeStruct((B, H * W, NO), jnp.bfloat16),
        grid=(B, n_i),
        in_specs=[
            pl.BlockSpec((1, th, W, F), cur_map),
            pl.BlockSpec((1, 1, W, F), top_map),
            pl.BlockSpec((1, 1, W, F), bot_map),
            pl.BlockSpec((4, 2 * F, F), lambda b_, i: (0, 0, 0)),
            pl.BlockSpec((F, F), lambda b_, i: (0, 0)),
            pl.BlockSpec((1, F), lambda b_, i: (0, 0)),
            pl.BlockSpec((F, NO), lambda b_, i: (0, 0)),
            pl.BlockSpec((1, NO), lambda b_, i: (0, 0)),
        ],
        out_specs=pl.BlockSpec((1, th * W, NO), lambda b_, i: (b_, i, 0)),
        scratch_shapes=[pltpu.VMEM((th + 2, W + 2, F), jnp.bfloat16),
                        pltpu.VMEM((th * W, F), jnp.float32)],
        compiler_params=pltpu.CompilerParams(
            dimension_semantics=("parallel", "parallel"),
            vmem_limit_bytes=VMEM_LIMIT),
    )(feats_hw, feats_hw, feats_hw, w_pairs, w_last, b_conv, w_head, b_head)


def pallas_pool_boxhead(feats, w1, b1, w2, b2, wh, bh, hw_tile=512):
    B, HW, F = feats.shape
    HID = w1.shape[-1]
    NO = wh.shape[-1]
    thw = _pick_divisor(HW, hw_tile)
    sublane_partial = (thw % 8 == 0)
    acc_rows = 8 if sublane_partial else 1
    kern = functools.partial(_pool_boxhead_kernel, inv_hw=1.0 / HW,
                             sublane_partial=sublane_partial)
    return pl.pallas_call(
        kern,
        out_shape=jax.ShapeDtypeStruct((B, 1, NO), jnp.float32),
        grid=(B, HW // thw),
        in_specs=[
            pl.BlockSpec((1, thw, F), lambda b_, j: (b_, j, 0)),
            pl.BlockSpec((F, HID), lambda b_, j: (0, 0)),
            pl.BlockSpec((1, HID), lambda b_, j: (0, 0)),
            pl.BlockSpec((HID, HID), lambda b_, j: (0, 0)),
            pl.BlockSpec((1, HID), lambda b_, j: (0, 0)),
            pl.BlockSpec((HID, NO), lambda b_, j: (0, 0)),
            pl.BlockSpec((1, NO), lambda b_, j: (0, 0)),
        ],
        out_specs=pl.BlockSpec((1, 1, NO), lambda b_, j: (b_, 0, 0)),
        scratch_shapes=[pltpu.VMEM((acc_rows, F), jnp.float32)],
        compiler_params=pltpu.CompilerParams(
            dimension_semantics=("parallel", "arbitrary"),
            vmem_limit_bytes=VMEM_LIMIT),
    )(feats, w1, b1, w2, b2, wh, bh)


# ----------------------------------------------------------------------------
# Parameters (raw init + TPU-friendly preparation: folding / fusing / padding)
# ----------------------------------------------------------------------------
def init_params(key, in_ch=3, feat=128, hidden=128,
                num_anchors=NUM_ANCHORS, num_classes=NUM_CLASSES):
    def conv3x3(k, cin, cout, scale=0.05):
        kw, kb = jax.random.split(k)
        return (scale * jax.random.normal(kw, (3, 3, cin, cout), jnp.float32),
                scale * jax.random.normal(kb, (cout,), jnp.float32))

    def dense(k, cin, cout, scale=0.05):
        kw, kb = jax.random.split(k)
        return (scale * jax.random.normal(kw, (cin, cout), jnp.float32),
                scale * jax.random.normal(kb, (cout,), jnp.float32))

    ks = jax.random.split(key, 8)
    p = {}
    p["backbone_conv"] = conv3x3(ks[0], in_ch, feat)          # 3x3 stem
    p["rpn_conv"] = conv3x3(ks[1], feat, feat)                # RPN 3x3
    p["rpn_obj"] = dense(ks[2], feat, num_anchors)            # 1x1 objectness
    p["rpn_delta"] = dense(ks[3], feat, 4 * num_anchors)      # 1x1 deltas
    p["box_fc1"] = dense(ks[4], feat, hidden)
    p["box_fc2"] = dense(ks[5], hidden, hidden)
    p["cls_score"] = dense(ks[6], hidden, num_classes + 1)
    p["bbox_pred"] = dense(ks[7], hidden, 4 * num_classes)
    # Detectron2-style BGR pixel mean / std
    p["pixel_mean"] = jnp.array([103.530, 116.280, 123.675], jnp.float32)
    p["pixel_std"] = jnp.array([1.0, 1.0, 1.0], jnp.float32)
    return p


def _pad_lanes(x, n=LANE):
    pad = n - x.shape[-1]
    if pad <= 0:
        return x
    return jnp.pad(x, [(0, 0)] * (x.ndim - 1) + [(0, pad)])


def prepare_params(p):
    """Fold normalization into the stem conv, im2col-pack the stem, pair RPN
    taps along K, fuse/pad head weights to 128 lanes, cast matmul operands."""
    mean, std = p["pixel_mean"], p["pixel_std"]
    inv_std = 1.0 / std
    out = {"pixel_mean": mean}

    # backbone stem: W' = W/std reshaped to (9*Cin -> 32, F); b' = b - sum W*mean/std
    wb, bb = p["backbone_conv"]                               # (3,3,Cin,F), (F,)
    cin, feat = wb.shape[2], wb.shape[3]
    w_fold = (wb * inv_std[None, None, :, None]).reshape(9 * cin, feat)
    k_pad = _round_up(9 * cin, 32)
    out["backbone_w"] = jnp.pad(
        w_fold, ((0, k_pad - 9 * cin), (0, 0))).astype(jnp.bfloat16)
    out["backbone_b"] = (bb - jnp.einsum("hwcf,c->f", wb, mean * inv_std))[None, :]

    # RPN conv: 9 taps -> 4 pairs (K=2F) + 1 single (K=F)
    wr, br = p["rpn_conv"]                                    # (3,3,F,F), (F,)
    w9 = wr.reshape(9, feat, feat)
    out["rpn_w_pairs"] = w9[:8].reshape(4, 2 * feat, feat).astype(jnp.bfloat16)
    out["rpn_w_last"] = w9[8].astype(jnp.bfloat16)
    out["rpn_conv_b"] = br[None, :]

    # fused (objectness | anchor deltas) head padded to 128 lanes
    wo, bo = p["rpn_obj"]
    wd, bd = p["rpn_delta"]
    out["rpn_head_w"] = _pad_lanes(jnp.concatenate([wo, wd], 1)).astype(jnp.bfloat16)
    out["rpn_head_b"] = _pad_lanes(jnp.concatenate([bo, bd], 0))[None, :]

    # box head FCs + fused (cls_score | bbox_pred) head padded to 128 lanes
    w1, b1 = p["box_fc1"]
    w2, b2 = p["box_fc2"]
    out["fc1_w"] = w1.astype(jnp.bfloat16)
    out["fc1_b"] = b1[None, :]
    out["fc2_w"] = w2.astype(jnp.bfloat16)
    out["fc2_b"] = b2[None, :]
    wc, bc = p["cls_score"]
    wx, bx = p["bbox_pred"]
    out["box_head_w"] = _pad_lanes(jnp.concatenate([wc, wx], 1)).astype(jnp.bfloat16)
    out["box_head_b"] = _pad_lanes(jnp.concatenate([bc, bx], 0))[None, :]
    return out


# ----------------------------------------------------------------------------
# Forward pass (mirrors GeneralizedRCNN.forward with synthetic sub-modules)
# ----------------------------------------------------------------------------
def generalized_rcnn_forward(images_nchw, params, num_anchors=NUM_ANCHORS,
                             num_classes=NUM_CLASSES, rpn_row_tile=None):
    B, C, H, W = images_nchw.shape
    mean = params["pixel_mean"]

    # --- preprocess_image: (x - mean)/std is folded into the stem weights.
    # Pad the raw image with the per-channel mean so the folded padding equals
    # zero-padding the normalized image (reference semantics at the border).
    x = jnp.transpose(images_nchw, (0, 2, 3, 1))               # NCHW -> NHWC
    x_pad = jnp.pad(x - mean, ((0, 0), (1, 1), (1, 1), (0, 0))) + mean
    # TODO(synk): ImageList.from_tensors size-divisibility padding omitted.

    # --- im2col: fold the 9 taps (9*C channels) into the MXU contraction dim.
    cols = [x_pad[:, dh:dh + H, dw:dw + W, :]
            for dh in range(3) for dw in range(3)]
    x_i2c = jnp.concatenate(cols, axis=-1)                     # (B, H, W, 9C)
    k_pad = params["backbone_w"].shape[0]
    x_i2c = jnp.pad(x_i2c, ((0, 0), (0, 0), (0, 0), (0, k_pad - 9 * C)))
    x_i2c = x_i2c.reshape(B, H * W, k_pad).astype(jnp.bfloat16)

    # --- backbone: one (tile, 32) @ (32, 128) matmul per spatial tile --------
    feats = pallas_backbone_conv(x_i2c, params["backbone_w"],
                                 params["backbone_b"])          # (B, HW, F) bf16
    F = feats.shape[-1]

    # --- proposal_generator (RPN): row-tiled 3x3 conv with in-kernel halo
    #     (no wrapper-side feature-map pad) + fused 1x1 heads ---------------
    feats_hw = feats.reshape(B, H, W, F)                        # free reshape
    rpn_out = pallas_rpn_head(feats_hw, params["rpn_w_pairs"],
                              params["rpn_w_last"], params["rpn_conv_b"],
                              params["rpn_head_w"], params["rpn_head_b"],
                              row_tile=rpn_row_tile)            # (B, HW, 128) bf16
    rpn_map = rpn_out.reshape(B, H, W, -1)
    objectness = rpn_map[..., :num_anchors].astype(jnp.float32)
    anchor_deltas = rpn_map[..., num_anchors:5 * num_anchors].astype(jnp.float32)
    # TODO(synk): anchor generation, proposal box decoding and NMS not implemented.

    # --- roi_heads: pooled feature -> fc1 -> fc2 -> fused cls/bbox heads -----
    # TODO(synk): ROIAlign replaced by whole-image average pooling.
    box_out = pallas_pool_boxhead(feats, params["fc1_w"], params["fc1_b"],
                                  params["fc2_w"], params["fc2_b"],
                                  params["box_head_w"], params["box_head_b"])
    box_out = box_out[:, 0, :]                                  # (B, 128)
    cls_scores = box_out[:, :num_classes + 1]
    bbox_deltas = box_out[:, num_classes + 1:num_classes + 1 + 4 * num_classes]

    return {
        "rpn_objectness": objectness,
        "rpn_anchor_deltas": anchor_deltas,
        "cls_scores": cls_scores,
        "bbox_deltas": bbox_deltas,
    }


# ----------------------------------------------------------------------------
# Pure-JAX f32 reference (same simplified graph) for a numeric sanity check
# ----------------------------------------------------------------------------
def reference_forward(images_nchw, p):
    mean, std = p["pixel_mean"], p["pixel_std"]
    x = jnp.transpose(images_nchw, (0, 2, 3, 1))
    xn = (x - mean) / std
    dn = ("NHWC", "HWIO", "NHWC")
    wb, bb = p["backbone_conv"]
    feats = jax.nn.relu(jax.lax.conv_general_dilated(
        xn, wb, (1, 1), "SAME", dimension_numbers=dn) + bb)
    wr, br = p["rpn_conv"]
    hid = jax.nn.relu(jax.lax.conv_general_dilated(
        feats, wr, (1, 1), "SAME", dimension_numbers=dn) + br)
    wo, bo = p["rpn_obj"]
    wd, bd = p["rpn_delta"]
    obj = jnp.einsum("bhwc,co->bhwo", hid, wo) + bo
    dlt = jnp.einsum("bhwc,co->bhwo", hid, wd) + bd
    pooled = feats.mean(axis=(1, 2))
    w1, b1 = p["box_fc1"]
    w2, b2 = p["box_fc2"]
    h1 = jax.nn.relu(pooled @ w1 + b1)
    h2 = jax.nn.relu(h1 @ w2 + b2)
    wc, bc = p["cls_score"]
    wx, bx = p["bbox_pred"]
    return obj, dlt, h2 @ wc + bc, h2 @ wx + bx


# ----------------------------------------------------------------------------
if __name__ == "__main__":
    key = jax.random.PRNGKey(0)
    k_img, k_par = jax.random.split(key)

    B, C, H, W = 2, 3, 16, 16
    images = jax.random.uniform(k_img, (B, C, H, W), jnp.float32, 0.0, 255.0)
    raw_params = init_params(k_par, in_ch=C)
    params = prepare_params(raw_params)   # fold / fuse / pad once, outside jit

    # rpn_row_tile=8 -> two spatial tiles so the in-kernel halo path is exercised
    fwd = jax.jit(functools.partial(generalized_rcnn_forward, rpn_row_tile=8))
    outputs = fwd(images, params)
    jax.block_until_ready(outputs)

    assert outputs["rpn_objectness"].shape == (B, H, W, NUM_ANCHORS)
    assert outputs["rpn_anchor_deltas"].shape == (B, H, W, 4 * NUM_ANCHORS)
    assert outputs["cls_scores"].shape == (B, NUM_CLASSES + 1)
    assert outputs["bbox_deltas"].shape == (B, 4 * NUM_CLASSES)

    # numeric sanity check vs. pure-JAX f32 reference (bf16 MXU tolerance)
    ref_obj, ref_dlt, ref_cls, ref_box = reference_forward(images, raw_params)
    np.testing.assert_allclose(np.asarray(outputs["rpn_objectness"]),
                               np.asarray(ref_obj), rtol=0.1, atol=1.0)
    np.testing.assert_allclose(np.asarray(outputs["rpn_anchor_deltas"]),
                               np.asarray(ref_dlt), rtol=0.1, atol=1.0)
    np.testing.assert_allclose(np.asarray(outputs["cls_scores"]),
                               np.asarray(ref_cls), rtol=0.1, atol=1.0)
    np.testing.assert_allclose(np.asarray(outputs["bbox_deltas"]),
                               np.asarray(ref_box), rtol=0.1, atol=1.0)
    print("KERNEL_OK")
</pallas_src>

<mosaic_0001>
module attributes {stable_mosaic.version = 11 : i64} {
  func.func @_backbone_conv_kernel(%arg0: i32, %arg1: i32, %arg2: memref<1x256x32xbf16, #tpu.memory_space<vmem>>, %arg3: memref<32x128xbf16, #tpu.memory_space<vmem>>, %arg4: memref<1x128xf32, #tpu.memory_space<vmem>>, %arg5: memref<1x256x128xbf16, #tpu.memory_space<vmem>>) attributes {dimension_semantics = [#tpu.dimension_semantics<parallel>, #tpu.dimension_semantics<parallel>], iteration_bounds = array<i64: 2, 1>, scalar_prefetch = 0 : i64, scratch_operands = 0 : i64, tpu.core_type = #tpu.core_type<tc>, window_params = [{transform_indices = @transform_0, window_bounds = array<i64: 1, 256, 32>}, {pipeline_mode = #tpu.pipeline_mode<synchronous>, transform_indices = @transform_1, window_bounds = array<i64: 32, 128>}, {pipeline_mode = #tpu.pipeline_mode<synchronous>, transform_indices = @transform_2, window_bounds = array<i64: 1, 128>}, {transform_indices = @transform_3, window_bounds = array<i64: 1, 256, 128>}]} {
    %c0 = arith.constant 0 : index
    %c0_0 = arith.constant 0 : index
    %c0_1 = arith.constant 0 : index
    %0 = vector.load %arg2[%c0, %c0_0, %c0_1] : memref<1x256x32xbf16, #tpu.memory_space<vmem>>, vector<1x256x32xbf16>
    %1 = vector.shape_cast %0 : vector<1x256x32xbf16> to vector<256x32xbf16>
    %c0_2 = arith.constant 0 : index
    %c0_3 = arith.constant 0 : index
    %2 = vector.load %arg3[%c0_2, %c0_3] : memref<32x128xbf16, #tpu.memory_space<vmem>>, vector<32x128xbf16>
    %cst = arith.constant dense<0.000000e+00> : vector<256x128xf32>
    %3 = tpu.matmul %1, %2, %cst {dimension_numbers = #tpu.dot_dimension_numbers<[1], [0], [0], [1], [0, 0, 1, 1], [], []>} : vector<256x32xbf16>, vector<32x128xbf16>, vector<256x128xf32> -> vector<256x128xf32>
    %c0_4 = arith.constant 0 : index
    %c0_5 = arith.constant 0 : index
    %4 = vector.load %arg4[%c0_4, %c0_5] : memref<1x128xf32, #tpu.memory_space<vmem>>, vector<1x128xf32>
    %5 = vector.broadcast %4 : vector<1x128xf32> to vector<256x128xf32>
    %6 = arith.addf %3, %5 : vector<256x128xf32>
    %cst_6 = arith.constant 0.000000e+00 : f32
    %7 = vector.broadcast %cst_6 : f32 to vector<256x128xf32>
    %8 = arith.maximumf %6, %7 : vector<256x128xf32>
    %9 = arith.truncf %8 : vector<256x128xf32> to vector<256x128xbf16>
    %c0_7 = arith.constant 0 : index
    %c0_8 = arith.constant 0 : index
    %c0_9 = arith.constant 0 : index
    %10 = vector.load %arg5[%c0_7, %c0_8, %c0_9] : memref<1x256x128xbf16, #tpu.memory_space<vmem>>, vector<1x256x128xbf16>
    %11 = vector.shape_cast %10 : vector<1x256x128xbf16> to vector<256x128xbf16>
    %12 = vector.shape_cast %9 : vector<256x128xbf16> to vector<1x256x128xbf16>
    tpu.vector_store %arg5[%c0_7, %c0_8, %c0_9], %12 {strides = array<i32>} : memref<1x256x128xbf16, #tpu.memory_space<vmem>>, vector<1x256x128xbf16>,
    return
  }
  func.func @transform_0(%arg0: i32, %arg1: i32) -> (i32, i32, i32) {
    %c0_i32 = arith.constant 0 : i32
    %c0_i32_0 = arith.constant 0 : i32
    return %arg0, %arg1, %c0_i32 : i32, i32, i32
  }
  func.func @transform_1(%arg0: i32, %arg1: i32) -> (i32, i32) {
    %c0_i32 = arith.constant 0 : i32
    %c0_i32_0 = arith.constant 0 : i32
    %c0_i32_1 = arith.constant 0 : i32
    return %c0_i32, %c0_i32_0 : i32, i32
  }
  func.func @transform_2(%arg0: i32, %arg1: i32) -> (i32, i32) {
    %c0_i32 = arith.constant 0 : i32
    %c0_i32_0 = arith.constant 0 : i32
    %c0_i32_1 = arith.constant 0 : i32
    return %c0_i32, %c0_i32_0 : i32, i32
  }
  func.func @transform_3(%arg0: i32, %arg1: i32) -> (i32, i32, i32) {
    %c0_i32 = arith.constant 0 : i32
    %c0_i32_0 = arith.constant 0 : i32
    return %arg0, %arg1, %c0_i32 : i32, i32, i32
  }
}

module attributes {stable_mosaic.version = 11 : i64} {
  func.func @_pool_boxhead_kernel(%arg0: i32, %arg1: i32, %arg2: memref<1x256x128xbf16, #tpu.memory_space<vmem>>, %arg3: memref<128x128xbf16, #tpu.memory_space<vmem>>, %arg4: memref<1x128xf32, #tpu.memory_space<vmem>>, %arg5: memref<128x128xbf16, #tpu.memory_space<vmem>>, %arg6: memref<1x128xf32, #tpu.memory_space<vmem>>, %arg7: memref<128x128xbf16, #tpu.memory_space<vmem>>, %arg8: memref<1x128xf32, #tpu.memory_space<vmem>>, %arg9: memref<1x1x128xf32, #tpu.memory_space<vmem>>, %arg10: memref<8x128xf32, #tpu.memory_space<vmem>>) attributes {dimension_semantics = [#tpu.dimension_semantics<parallel>, #tpu.dimension_semantics<arbitrary>], iteration_bounds = array<i64: 2, 1>, scalar_prefetch = 0 : i64, scratch_operands = 1 : i64, tpu.core_type = #tpu.core_type<tc>, window_params = [{transform_indices = @transform_0, window_bounds = array<i64: 1, 256, 128>}, {pipeline_mode = #tpu.pipeline_mode<synchronous>, transform_indices = @transform_1, window_bounds = array<i64: 128, 128>}, {pipeline_mode = #tpu.pipeline_mode<synchronous>, transform_indices = @transform_2, window_bounds = array<i64: 1, 128>}, {pipeline_mode = #tpu.pipeline_mode<synchronous>, transform_indices = @transform_3, window_bounds = array<i64: 128, 128>}, {pipeline_mode = #tpu.pipeline_mode<synchronous>, transform_indices = @transform_4, window_bounds = array<i64: 1, 128>}, {pipeline_mode = #tpu.pipeline_mode<synchronous>, transform_indices = @transform_5, window_bounds = array<i64: 128, 128>}, {pipeline_mode = #tpu.pipeline_mode<synchronous>, transform_indices = @transform_6, window_bounds = array<i64: 1, 128>}, {transform_indices = @transform_7, window_bounds = array<i64: 1, 1, 128>}]} {
    %c0_i32 = arith.constant 0 : i32
    %0 = arith.cmpi eq, %arg1, %c0_i32 : i32
    %1 = arith.extui %0 : i1 to i32
    %c0_i32_0 = arith.constant 0 : i32
    %2 = arith.cmpi ne, %1, %c0_i32_0 : i32
    scf.if %2 {
      %cst_9 = arith.constant 0.000000e+00 : f32
      %14 = vector.broadcast %cst_9 : f32 to vector<8x128xf32>
      %c0_10 = arith.constant 0 : index
      %c0_11 = arith.constant 0 : index
      %15 = vector.load %arg10[%c0_10, %c0_11] : memref<8x128xf32, #tpu.memory_space<vmem>>, vector<8x128xf32>
      tpu.vector_store %arg10[%c0_10, %c0_11], %14 {strides = array<i32>} : memref<8x128xf32, #tpu.memory_space<vmem>>, vector<8x128xf32>,
    } else {
    }
    %c0 = arith.constant 0 : index
    %c0_1 = arith.constant 0 : index
    %c0_2 = arith.constant 0 : index
    %3 = vector.load %arg2[%c0, %c0_1, %c0_2] : memref<1x256x128xbf16, #tpu.memory_space<vmem>>, vector<1x256x128xbf16>
    %4 = vector.shape_cast %3 : vector<1x256x128xbf16> to vector<256x128xbf16>
    %5 = arith.extf %4 : vector<256x128xbf16> to vector<256x128xf32>
    %c0_3 = arith.constant 0 : index
    %c0_4 = arith.constant 0 : index
    %6 = vector.load %arg10[%c0_3, %c0_4] : memref<8x128xf32, #tpu.memory_space<vmem>>, vector<8x128xf32>
    %7 = vector.shape_cast %5 : vector<256x128xf32> to vector<32x8x128xf32>
    %cst = arith.constant dense<0.000000e+00> : vector<8x128xf32>
    %8 = vector.multi_reduction <add>, %7, %cst [0] : vector<32x8x128xf32> to vector<8x128xf32>
    %9 = arith.addf %6, %8 : vector<8x128xf32>
    %c0_5 = arith.constant 0 : index
    %c0_6 = arith.constant 0 : index
    %10 = vector.load %arg10[%c0_5, %c0_6] : memref<8x128xf32, #tpu.memory_space<vmem>>, vector<8x128xf32>
    tpu.vector_store %arg10[%c0_5, %c0_6], %9 {strides = array<i32>} : memref<8x128xf32, #tpu.memory_space<vmem>>, vector<8x128xf32>,
    %c0_i32_7 = arith.constant 0 : i32
    %11 = arith.cmpi eq, %arg1, %c0_i32_7 : i32
    %12 = arith.extui %11 : i1 to i32
    %c0_i32_8 = arith.constant 0 : i32
    %13 = arith.cmpi ne, %12, %c0_i32_8 : i32
    scf.if %13 {
      %c0_9 = arith.constant 0 : index
      %c0_10 = arith.constant 0 : index
      %14 = vector.load %arg10[%c0_9, %c0_10] : memref<8x128xf32, #tpu.memory_space<vmem>>, vector<8x128xf32>
      %cst_11 = arith.constant dense<0.000000e+00> : vector<128xf32>
      %15 = vector.multi_reduction <add>, %14, %cst_11 [0] : vector<8x128xf32> to vector<128xf32>
      %16 = vector.shape_cast %15 : vector<128xf32> to vector<1x128xf32>
      %cst_12 = arith.constant 3.906250e-03 : f32
      %17 = vector.broadcast %cst_12 : f32 to vector<1x128xf32>
      %18 = arith.mulf %16, %17 : vector<1x128xf32>
      %19 = arith.truncf %18 : vector<1x128xf32> to vector<1x128xbf16>
      %c0_13 = arith.constant 0 : index
      %c0_14 = arith.constant 0 : index
      %20 = vector.load %arg3[%c0_13, %c0_14] : memref<128x128xbf16, #tpu.memory_space<vmem>>, vector<128x128xbf16>
      %cst_15 = arith.constant dense<0.000000e+00> : vector<1x128xf32>
      %21 = tpu.matmul %19, %20, %cst_15 {dimension_numbers = #tpu.dot_dimension_numbers<[1], [0], [0], [1], [0, 0, 1, 1], [], []>} : vector<1x128xbf16>, vector<128x128xbf16>, vector<1x128xf32> -> vector<1x128xf32>
      %c0_16 = arith.constant 0 : index
      %c0_17 = arith.constant 0 : index
      %22 = vector.load %arg4[%c0_16, %c0_17] : memref<1x128xf32, #tpu.memory_space<vmem>>, vector<1x128xf32>
      %23 = arith.addf %21, %22 : vector<1x128xf32>
      %cst_18 = arith.constant 0.000000e+00 : f32
      %24 = vector.broadcast %cst_18 : f32 to vector<1x128xf32>
      %25 = arith.maximumf %23, %24 : vector<1x128xf32>
      %26 = arith.truncf %25 : vector<1x128xf32> to vector<1x128xbf16>
      %c0_19 = arith.constant 0 : index
      %c0_20 = arith.constant 0 : index
      %27 = vector.load %arg5[%c0_19, %c0_20] : memref<128x128xbf16, #tpu.memory_space<vmem>>, vector<128x128xbf16>
      %cst_21 = arith.constant dense<0.000000e+00> : vector<1x128xf32>
      %28 = tpu.matmul %26, %27, %cst_21 {dimension_numbers = #tpu.dot_dimension_numbers<[1], [0], [0], [1], [0, 0, 1, 1], [], []>} : vector<1x128xbf16>, vector<128x128xbf16>, vector<1x128xf32> -> vector<1x128xf32>
      %c0_22 = arith.constant 0 : index
      %c0_23 = arith.constant 0 : index
      %29 = vector.load %arg6[%c0_22, %c0_23] : memref<1x128xf32, #tpu.memory_space<vmem>>, vector<1x128xf32>
      %30 = arith.addf %28, %29 : vector<1x128xf32>
      %cst_24 = arith.constant 0.000000e+00 : f32
      %31 = vector.broadcast %cst_24 : f32 to vector<1x128xf32>
      %32 = arith.maximumf %30, %31 : vector<1x128xf32>
      %33 = arith.truncf %32 : vector<1x128xf32> to vector<1x128xbf16>
      %c0_25 = arith.constant 0 : index
      %c0_26 = arith.constant 0 : index
      %34 = vector.load %arg7[%c0_25, %c0_26] : memref<128x128xbf16, #tpu.memory_space<vmem>>, vector<128x128xbf16>
      %cst_27 = arith.constant dense<0.000000e+00> : vector<1x128xf32>
      %35 = tpu.matmul %33, %34, %cst_27 {dimension_numbers = #tpu.dot_dimension_numbers<[1], [0], [0], [1], [0, 0, 1, 1], [], []>} : vector<1x128xbf16>, vector<128x128xbf16>, vector<1x128xf32> -> vector<1x128xf32>
      %c0_28 = arith.constant 0 : index
      %c0_29 = arith.constant 0 : index
      %36 = vector.load %arg8[%c0_28, %c0_29] : memref<1x128xf32, #tpu.memory_space<vmem>>, vector<1x128xf32>
      %37 = arith.addf %35, %36 : vector<1x128xf32>
      %c0_30 = arith.constant 0 : index
      %c0_31 = arith.constant 0 : index
      %c0_32 = arith.constant 0 : index
      %38 = vector.load %arg9[%c0_30, %c0_31, %c0_32] : memref<1x1x128xf32, #tpu.memory_space<vmem>>, vector<1x1x128xf32>
      %39 = vector.shape_cast %38 : vector<1x1x128xf32> to vector<1x128xf32>
      %40 = vector.shape_cast %37 : vector<1x128xf32> to vector<1x1x128xf32>
      tpu.vector_store %arg9[%c0_30, %c0_31, %c0_32], %40 {strides = array<i32>} : memref<1x1x128xf32, #tpu.memory_space<vmem>>, vector<1x1x128xf32>,
    } else {
    }
    return
  }
  func.func @transform_0(%arg0: i32, %arg1: i32) -> (i32, i32, i32) {
    %c0_i32 = arith.constant 0 : i32
    %c0_i32_0 = arith.constant 0 : i32
    return %arg0, %arg1, %c0_i32 : i32, i32, i32
  }
  func.func @transform_1(%arg0: i32, %arg1: i32) -> (i32, i32) {
    %c0_i32 = arith.constant 0 : i32
    %c0_i32_0 = arith.constant 0 : i32
    %c0_i32_1 = arith.constant 0 : i32
    return %c0_i32, %c0_i32_0 : i32, i32
  }
  func.func @transform_2(%arg0: i32, %arg1: i32) -> (i32, i32) {
    %c0_i32 = arith.constant 0 : i32
    %c0_i32_0 = arith.constant 0 : i32
    %c0_i32_1 = arith.constant 0 : i32
    return %c0_i32, %c0_i32_0 : i32, i32
  }
  func.func @transform_3(%arg0: i32, %arg1: i32) -> (i32, i32) {
    %c0_i32 = arith.constant 0 : i32
    %c0_i32_0 = arith.constant 0 : i32
    %c0_i32_1 = arith.constant 0 : i32
    return %c0_i32, %c0_i32_0 : i32, i32
  }
  func.func @transform_4(%arg0: i32, %arg1: i32) -> (i32, i32) {
    %c0_i32 = arith.constant 0 : i32
    %c0_i32_0 = arith.constant 0 : i32
    %c0_i32_1 = arith.constant 0 : i32
    return %c0_i32, %c0_i32_0 : i32, i32
  }
  func.func @transform_5(%arg0: i32, %arg1: i32) -> (i32, i32) {
    %c0_i32 = arith.constant 0 : i32
    %c0_i32_0 = arith.constant 0 : i32
    %c0_i32_1 = arith.constant 0 : i32
    return %c0_i32, %c0_i32_0 : i32, i32
  }
  func.func @transform_6(%arg0: i32, %arg1: i32) -> (i32, i32) {
    %c0_i32 = arith.constant 0 : i32
    %c0_i32_0 = arith.constant 0 : i32
    %c0_i32_1 = arith.constant 0 : i32
    return %c0_i32, %c0_i32_0 : i32, i32
  }
  func.func @transform_7(%arg0: i32, %arg1: i32) -> (i32, i32, i32) {
    %c0_i32 = arith.constant 0 : i32
    %c0_i32_0 = arith.constant 0 : i32
    %c0_i32_1 = arith.constant 0 : i32
    return %arg0, %c0_i32, %c0_i32_0 : i32, i32, i32
  }
}

module attributes {stable_mosaic.version = 11 : i64} {
  func.func @_rpn_kernel(%arg0: i32, %arg1: i32, %arg2: memref<1x8x16x128xbf16, #tpu.memory_space<vmem>>, %arg3: memref<1x1x16x128xbf16, #tpu.memory_space<vmem>>, %arg4: memref<1x1x16x128xbf16, #tpu.memory_space<vmem>>, %arg5: memref<4x256x128xbf16, #tpu.memory_space<vmem>>, %arg6: memref<128x128xbf16, #tpu.memory_space<vmem>>, %arg7: memref<1x128xf32, #tpu.memory_space<vmem>>, %arg8: memref<128x128xbf16, #tpu.memory_space<vmem>>, %arg9: memref<1x128xf32, #tpu.memory_space<vmem>>, %arg10: memref<1x128x128xbf16, #tpu.memory_space<vmem>>, %arg11: memref<10x18x128xbf16, #tpu.memory_space<vmem>>, %arg12: memref<128x128xf32, #tpu.memory_space<vmem>>) attributes {dimension_semantics = [#tpu.dimension_semantics<parallel>, #tpu.dimension_semantics<parallel>], iteration_bounds = array<i64: 2, 2>, scalar_prefetch = 0 : i64, scratch_operands = 2 : i64, tpu.core_type = #tpu.core_type<tc>, window_params = [{transform_indices = @transform_0, window_bounds = array<i64: 1, 8, 16, 128>}, {transform_indices = @transform_1, window_bounds = array<i64: 1, 1, 16, 128>}, {transform_indices = @transform_2, window_bounds = array<i64: 1, 1, 16, 128>}, {pipeline_mode = #tpu.pipeline_mode<synchronous>, transform_indices = @transform_3, window_bounds = array<i64: 4, 256, 128>}, {pipeline_mode = #tpu.pipeline_mode<synchronous>, transform_indices = @transform_4, window_bounds = array<i64: 128, 128>}, {pipeline_mode = #tpu.pipeline_mode<synchronous>, transform_indices = @transform_5, window_bounds = array<i64: 1, 128>}, {pipeline_mode = #tpu.pipeline_mode<synchronous>, transform_indices = @transform_6, window_bounds = array<i64: 128, 128>}, {pipeline_mode = #tpu.pipeline_mode<synchronous>, transform_indices = @transform_7, window_bounds = array<i64: 1, 128>}, {transform_indices = @transform_8, window_bounds = array<i64: 1, 128, 128>}]} {
    %cst = arith.constant 0.000000e+00 : bf16
    %0 = vector.broadcast %cst : bf16 to vector<1x18x128xbf16>
    %cst_0 = arith.constant 0.000000e+00 : bf16
    %1 = vector.broadcast %cst_0 : bf16 to vector<10x1x128xbf16>
    %c0 = arith.constant 0 : index
    %c0_1 = arith.constant 0 : index
    %c0_2 = arith.constant 0 : index
    %2 = vector.load %arg11[%c0, %c0_1, %c0_2] : memref<10x18x128xbf16, #tpu.memory_space<vmem>>, vector<1x18x128xbf16>
    tpu.vector_store %arg11[%c0, %c0_1, %c0_2], %0 {strides = array<i32>} : memref<10x18x128xbf16, #tpu.memory_space<vmem>>, vector<1x18x128xbf16>,
    %c9 = arith.constant 9 : index
    %c0_3 = arith.constant 0 : index
    %c0_4 = arith.constant 0 : index
    %3 = vector.load %arg11[%c9, %c0_3, %c0_4] : memref<10x18x128xbf16, #tpu.memory_space<vmem>>, vector<1x18x128xbf16>
    tpu.vector_store %arg11[%c9, %c0_3, %c0_4], %0 {strides = array<i32>} : memref<10x18x128xbf16, #tpu.memory_space<vmem>>, vector<1x18x128xbf16>,
    %c0_5 = arith.constant 0 : index
    %c0_6 = arith.constant 0 : index
    %c0_7 = arith.constant 0 : index
    %4 = vector.load %arg11[%c0_5, %c0_6, %c0_7] : memref<10x18x128xbf16, #tpu.memory_space<vmem>>, vector<10x1x128xbf16>
    tpu.vector_store %arg11[%c0_5, %c0_6, %c0_7], %1 {strides = array<i32>} : memref<10x18x128xbf16, #tpu.memory_space<vmem>>, vector<10x1x128xbf16>,
    %c0_8 = arith.constant 0 : index
    %c17 = arith.constant 17 : index
    %c0_9 = arith.constant 0 : index
    %5 = vector.load %arg11[%c0_8, %c17, %c0_9] : memref<10x18x128xbf16, #tpu.memory_space<vmem>>, vector<10x1x128xbf16>
    tpu.vector_store %arg11[%c0_8, %c17, %c0_9], %1 {strides = array<i32>} : memref<10x18x128xbf16, #tpu.memory_space<vmem>>, vector<10x1x128xbf16>,
    %c0_10 = arith.constant 0 : index
    %c0_11 = arith.constant 0 : index
    %c0_12 = arith.constant 0 : index
    %c0_13 = arith.constant 0 : index
    %6 = vector.load %arg2[%c0_10, %c0_11, %c0_12, %c0_13] : memref<1x8x16x128xbf16, #tpu.memory_space<vmem>>, vector<1x8x16x128xbf16>
    %7 = vector.shape_cast %6 : vector<1x8x16x128xbf16> to vector<8x16x128xbf16>
    %c1 = arith.constant 1 : index
    %c1_14 = arith.constant 1 : index
    %c0_15 = arith.constant 0 : index
    %8 = vector.load %arg11[%c1, %c1_14, %c0_15] : memref<10x18x128xbf16, #tpu.memory_space<vmem>>, vector<8x16x128xbf16>
    tpu.vector_store %arg11[%c1, %c1_14, %c0_15], %7 {strides = array<i32>} : memref<10x18x128xbf16, #tpu.memory_space<vmem>>, vector<8x16x128xbf16>,
    %c0_i32 = arith.constant 0 : i32
    %9 = arith.cmpi sgt, %arg1, %c0_i32 : i32
    %10 = arith.extui %9 : i1 to i32
    %c0_i32_16 = arith.constant 0 : i32
    %11 = arith.cmpi ne, %10, %c0_i32_16 : i32
    scf.if %11 {
      %c0_93 = arith.constant 0 : index
      %c0_94 = arith.constant 0 : index
      %c0_95 = arith.constant 0 : index
      %c0_96 = arith.constant 0 : index
      %80 = vector.load %arg3[%c0_93, %c0_94, %c0_95, %c0_96] : memref<1x1x16x128xbf16, #tpu.memory_space<vmem>>, vector<1x1x16x128xbf16>
      %81 = vector.shape_cast %80 : vector<1x1x16x128xbf16> to vector<1x16x128xbf16>
      %c0_97 = arith.constant 0 : index
      %c1_98 = arith.constant 1 : index
      %c0_99 = arith.constant 0 : index
      %82 = vector.load %arg11[%c0_97, %c1_98, %c0_99] : memref<10x18x128xbf16, #tpu.memory_space<vmem>>, vector<1x16x128xbf16>
      tpu.vector_store %arg11[%c0_97, %c1_98, %c0_99], %81 {strides = array<i32>} : memref<10x18x128xbf16, #tpu.memory_space<vmem>>, vector<1x16x128xbf16>,
    } else {
    }
    %c1_i32 = arith.constant 1 : i32
    %12 = arith.cmpi slt, %arg1, %c1_i32 : i32
    %13 = arith.extui %12 : i1 to i32
    %c0_i32_17 = arith.constant 0 : i32
    %14 = arith.cmpi ne, %13, %c0_i32_17 : i32
    scf.if %14 {
      %c0_93 = arith.constant 0 : index
      %c0_94 = arith.constant 0 : index
      %c0_95 = arith.constant 0 : index
      %c0_96 = arith.constant 0 : index
      %80 = vector.load %arg4[%c0_93, %c0_94, %c0_95, %c0_96] : memref<1x1x16x128xbf16, #tpu.memory_space<vmem>>, vector<1x1x16x128xbf16>
      %81 = vector.shape_cast %80 : vector<1x1x16x128xbf16> to vector<1x16x128xbf16>
      %c9_97 = arith.constant 9 : index
      %c1_98 = arith.constant 1 : index
      %c0_99 = arith.constant 0 : index
      %82 = vector.load %arg11[%c9_97, %c1_98, %c0_99] : memref<10x18x128xbf16, #tpu.memory_space<vmem>>, vector<1x16x128xbf16>
      tpu.vector_store %arg11[%c9_97, %c1_98, %c0_99], %81 {strides = array<i32>} : memref<10x18x128xbf16, #tpu.memory_space<vmem>>, vector<1x16x128xbf16>,
    } else {
    }
    %c0_18 = arith.constant 0 : index
    %c0_19 = arith.constant 0 : index
    %c0_20 = arith.constant 0 : index
    %15 = vector.load %arg11[%c0_18, %c0_19, %c0_20] : memref<10x18x128xbf16, #tpu.memory_space<vmem>>, vector<8x16x128xbf16>
    %16 = vector.shape_cast %15 : vector<8x16x128xbf16> to vector<128x128xbf16>
    %c0_21 = arith.constant 0 : index
    %c1_22 = arith.constant 1 : index
    %c0_23 = arith.constant 0 : index
    %17 = vector.load %arg11[%c0_21, %c1_22, %c0_23] : memref<10x18x128xbf16, #tpu.memory_space<vmem>>, vector<8x16x128xbf16>
    %18 = vector.shape_cast %17 : vector<8x16x128xbf16> to vector<128x128xbf16>
    %19 = tpu.concatenate %16, %18 in 1 : vector<128x128xbf16>, vector<128x128xbf16> -> vector<128x256xbf16>
    %c0_24 = arith.constant 0 : index
    %c0_25 = arith.constant 0 : index
    %c0_26 = arith.constant 0 : index
    %20 = vector.load %arg5[%c0_24, %c0_25, %c0_26] : memref<4x256x128xbf16, #tpu.memory_space<vmem>>, vector<1x256x128xbf16>
    %21 = vector.shape_cast %20 : vector<1x256x128xbf16> to vector<256x128xbf16>
    %cst_27 = arith.constant dense<0.000000e+00> : vector<128x128xf32>
    %22 = tpu.matmul %19, %21, %cst_27 {dimension_numbers = #tpu.dot_dimension_numbers<[1], [0], [0], [1], [0, 0, 1, 1], [], []>} : vector<128x256xbf16>, vector<256x128xbf16>, vector<128x128xf32> -> vector<128x128xf32>
    %c0_28 = arith.constant 0 : index
    %c0_29 = arith.constant 0 : index
    %23 = vector.load %arg12[%c0_28, %c0_29] : memref<128x128xf32, #tpu.memory_space<vmem>>, vector<128x128xf32>
    tpu.vector_store %arg12[%c0_28, %c0_29], %22 {strides = array<i32>} : memref<128x128xf32, #tpu.memory_space<vmem>>, vector<128x128xf32>,
    %c0_30 = arith.constant 0 : index
    %c2 = arith.constant 2 : index
    %c0_31 = arith.constant 0 : index
    %24 = vector.load %arg11[%c0_30, %c2, %c0_31] : memref<10x18x128xbf16, #tpu.memory_space<vmem>>, vector<8x16x128xbf16>
    %25 = vector.shape_cast %24 : vector<8x16x128xbf16> to vector<128x128xbf16>
    %c1_32 = arith.constant 1 : index
    %c0_33 = arith.constant 0 : index
    %c0_34 = arith.constant 0 : index
    %26 = vector.load %arg11[%c1_32, %c0_33, %c0_34] : memref<10x18x128xbf16, #tpu.memory_space<vmem>>, vector<8x16x128xbf16>
    %27 = vector.shape_cast %26 : vector<8x16x128xbf16> to vector<128x128xbf16>
    %28 = tpu.concatenate %25, %27 in 1 : vector<128x128xbf16>, vector<128x128xbf16> -> vector<128x256xbf16>
    %c1_35 = arith.constant 1 : index
    %c0_36 = arith.constant 0 : index
    %c0_37 = arith.constant 0 : index
    %29 = vector.load %arg5[%c1_35, %c0_36, %c0_37] : memref<4x256x128xbf16, #tpu.memory_space<vmem>>, vector<1x256x128xbf16>
    %30 = vector.shape_cast %29 : vector<1x256x128xbf16> to vector<256x128xbf16>
    %cst_38 = arith.constant dense<0.000000e+00> : vector<128x128xf32>
    %31 = tpu.matmul %28, %30, %cst_38 {dimension_numbers = #tpu.dot_dimension_numbers<[1], [0], [0], [1], [0, 0, 1, 1], [], []>} : vector<128x256xbf16>, vector<256x128xbf16>, vector<128x128xf32> -> vector<128x128xf32>
    %c0_39 = arith.constant 0 : index
    %c0_40 = arith.constant 0 : index
    %32 = vector.load %arg12[%c0_39, %c0_40] : memref<128x128xf32, #tpu.memory_space<vmem>>, vector<128x128xf32>
    %33 = arith.addf %32, %31 : vector<128x128xf32>
    %c0_41 = arith.constant 0 : index
    %c0_42 = arith.constant 0 : index
    %34 = vector.load %arg12[%c0_41, %c0_42] : memref<128x128xf32, #tpu.memory_space<vmem>>, vector<128x128xf32>
    tpu.vector_store %arg12[%c0_41, %c0_42], %33 {strides = array<i32>} : memref<128x128xf32, #tpu.memory_space<vmem>>, vector<128x128xf32>,
    %c1_43 = arith.constant 1 : index
    %c1_44 = arith.constant 1 : index
    %c0_45 = arith.constant 0 : index
    %35 = vector.load %arg11[%c1_43, %c1_44, %c0_45] : memref<10x18x128xbf16, #tpu.memory_space<vmem>>, vector<8x16x128xbf16>
    %36 = vector.shape_cast %35 : vector<8x16x128xbf16> to vector<128x128xbf16>
    %c1_46 = arith.constant 1 : index
    %c2_47 = arith.constant 2 : index
    %c0_48 = arith.constant 0 : index
    %37 = vector.load %arg11[%c1_46, %c2_47, %c0_48] : memref<10x18x128xbf16, #tpu.memory_space<vmem>>, vector<8x16x128xbf16>
    %38 = vector.shape_cast %37 : vector<8x16x128xbf16> to vector<128x128xbf16>
    %39 = tpu.concatenate %36, %38 in 1 : vector<128x128xbf16>, vector<128x128xbf16> -> vector<128x256xbf16>
    %c2_49 = arith.constant 2 : index
    %c0_50 = arith.constant 0 : index
    %c0_51 = arith.constant 0 : index
    %40 = vector.load %arg5[%c2_49, %c0_50, %c0_51] : memref<4x256x128xbf16, #tpu.memory_space<vmem>>, vector<1x256x128xbf16>
    %41 = vector.shape_cast %40 : vector<1x256x128xbf16> to vector<256x128xbf16>
    %cst_52 = arith.constant dense<0.000000e+00> : vector<128x128xf32>
    %42 = tpu.matmul %39, %41, %cst_52 {dimension_numbers = #tpu.dot_dimension_numbers<[1], [0], [0], [1], [0, 0, 1, 1], [], []>} : vector<128x256xbf16>, vector<256x128xbf16>, vector<128x128xf32> -> vector<128x128xf32>
    %c0_53 = arith.constant 0 : index
    %c0_54 = arith.constant 0 : index
    %43 = vector.load %arg12[%c0_53, %c0_54] : memref<128x128xf32, #tpu.memory_space<vmem>>, vector<128x128xf32>
    %44 = arith.addf %43, %42 : vector<128x128xf32>
    %c0_55 = arith.constant 0 : index
    %c0_56 = arith.constant 0 : index
    %45 = vector.load %arg12[%c0_55, %c0_56] : memref<128x128xf32, #tpu.memory_space<vmem>>, vector<128x128xf32>
    tpu.vector_store %arg12[%c0_55, %c0_56], %44 {strides = array<i32>} : memref<128x128xf32, #tpu.memory_space<vmem>>, vector<128x128xf32>,
    %c2_57 = arith.constant 2 : index
    %c0_58 = arith.constant 0 : index
    %c0_59 = arith.constant 0 : index
    %46 = vector.load %arg11[%c2_57, %c0_58, %c0_59] : memref<10x18x128xbf16, #tpu.memory_space<vmem>>, vector<8x16x128xbf16>
    %47 = vector.shape_cast %46 : vector<8x16x128xbf16> to vector<128x128xbf16>
    %c2_60 = arith.constant 2 : index
    %c1_61 = arith.constant 1 : index
    %c0_62 = arith.constant 0 : index
    %48 = vector.load %arg11[%c2_60, %c1_61, %c0_62] : memref<10x18x128xbf16, #tpu.memory_space<vmem>>, vector<8x16x128xbf16>
    %49 = vector.shape_cast %48 : vector<8x16x128xbf16> to vector<128x128xbf16>
    %50 = tpu.concatenate %47, %49 in 1 : vector<128x128xbf16>, vector<128x128xbf16> -> vector<128x256xbf16>
    %c3 = arith.constant 3 : index
    %c0_63 = arith.constant 0 : index
    %c0_64 = arith.constant 0 : index
    %51 = vector.load %arg5[%c3, %c0_63, %c0_64] : memref<4x256x128xbf16, #tpu.memory_space<vmem>>, vector<1x256x128xbf16>
    %52 = vector.shape_cast %51 : vector<1x256x128xbf16> to vector<256x128xbf16>
    %cst_65 = arith.constant dense<0.000000e+00> : vector<128x128xf32>
    %53 = tpu.matmul %50, %52, %cst_65 {dimension_numbers = #tpu.dot_dimension_numbers<[1], [0], [0], [1], [0, 0, 1, 1], [], []>} : vector<128x256xbf16>, vector<256x128xbf16>, vector<128x128xf32> -> vector<128x128xf32>
    %c0_66 = arith.constant 0 : index
    %c0_67 = arith.constant 0 : index
    %54 = vector.load %arg12[%c0_66, %c0_67] : memref<128x128xf32, #tpu.memory_space<vmem>>, vector<128x128xf32>
    %55 = arith.addf %54, %53 : vector<128x128xf32>
    %c0_68 = arith.constant 0 : index
    %c0_69 = arith.constant 0 : index
    %56 = vector.load %arg12[%c0_68, %c0_69] : memref<128x128xf32, #tpu.memory_space<vmem>>, vector<128x128xf32>
    tpu.vector_store %arg12[%c0_68, %c0_69], %55 {strides = array<i32>} : memref<128x128xf32, #tpu.memory_space<vmem>>, vector<128x128xf32>,
    %c0_70 = arith.constant 0 : index
    %c0_71 = arith.constant 0 : index
    %57 = vector.load %arg12[%c0_70, %c0_71] : memref<128x128xf32, #tpu.memory_space<vmem>>, vector<128x128xf32>
    %c2_72 = arith.constant 2 : index
    %c2_73 = arith.constant 2 : index
    %c0_74 = arith.constant 0 : index
    %58 = vector.load %arg11[%c2_72, %c2_73, %c0_74] : memref<10x18x128xbf16, #tpu.memory_space<vmem>>, vector<8x16x128xbf16>
    %59 = vector.shape_cast %58 : vector<8x16x128xbf16> to vector<128x128xbf16>
    %c0_75 = arith.constant 0 : index
    %c0_76 = arith.constant 0 : index
    %60 = vector.load %arg6[%c0_75, %c0_76] : memref<128x128xbf16, #tpu.memory_space<vmem>>, vector<128x128xbf16>
    %cst_77 = arith.constant dense<0.000000e+00> : vector<128x128xf32>
    %61 = tpu.matmul %59, %60, %cst_77 {dimension_numbers = #tpu.dot_dimension_numbers<[1], [0], [0], [1], [0, 0, 1, 1], [], []>} : vector<128x128xbf16>, vector<128x128xbf16>, vector<128x128xf32> -> vector<128x128xf32>
    %62 = arith.addf %57, %61 : vector<128x128xf32>
    %c0_78 = arith.constant 0 : index
    %c0_79 = arith.constant 0 : index
    %63 = vector.load %arg12[%c0_78, %c0_79] : memref<128x128xf32, #tpu.memory_space<vmem>>, vector<128x128xf32>
    tpu.vector_store %arg12[%c0_78, %c0_79], %62 {strides = array<i32>} : memref<128x128xf32, #tpu.memory_space<vmem>>, vector<128x128xf32>,
    %c0_80 = arith.constant 0 : index
    %c0_81 = arith.constant 0 : index
    %64 = vector.load %arg12[%c0_80, %c0_81] : memref<128x128xf32, #tpu.memory_space<vmem>>, vector<128x128xf32>
    %c0_82 = arith.constant 0 : index
    %c0_83 = arith.constant 0 : index
    %65 = vector.load %arg7[%c0_82, %c0_83] : memref<1x128xf32, #tpu.memory_space<vmem>>, vector<1x128xf32>
    %66 = vector.broadcast %65 : vector<1x128xf32> to vector<128x128xf32>
    %67 = arith.addf %64, %66 : vector<128x128xf32>
    %cst_84 = arith.constant 0.000000e+00 : f32
    %68 = vector.broadcast %cst_84 : f32 to vector<128x128xf32>
    %69 = arith.maximumf %67, %68 : vector<128x128xf32>
    %70 = arith.truncf %69 : vector<128x128xf32> to vector<128x128xbf16>
    %c0_85 = arith.constant 0 : index
    %c0_86 = arith.constant 0 : index
    %71 = vector.load %arg8[%c0_85, %c0_86] : memref<128x128xbf16, #tpu.memory_space<vmem>>, vector<128x128xbf16>
    %cst_87 = arith.constant dense<0.000000e+00> : vector<128x128xf32>
    %72 = tpu.matmul %70, %71, %cst_87 {dimension_numbers = #tpu.dot_dimension_numbers<[1], [0], [0], [1], [0, 0, 1, 1], [], []>} : vector<128x128xbf16>, vector<128x128xbf16>, vector<128x128xf32> -> vector<128x128xf32>
    %c0_88 = arith.constant 0 : index
    %c0_89 = arith.constant 0 : index
    %73 = vector.load %arg9[%c0_88, %c0_89] : memref<1x128xf32, #tpu.memory_space<vmem>>, vector<1x128xf32>
    %74 = vector.broadcast %73 : vector<1x128xf32> to vector<128x128xf32>
    %75 = arith.addf %72, %74 : vector<128x128xf32>
    %76 = arith.truncf %75 : vector<128x128xf32> to vector<128x128xbf16>
    %c0_90 = arith.constant 0 : index
    %c0_91 = arith.constant 0 : index
    %c0_92 = arith.constant 0 : index
    %77 = vector.load %arg10[%c0_90, %c0_91, %c0_92] : memref<1x128x128xbf16, #tpu.memory_space<vmem>>, vector<1x128x128xbf16>
    %78 = vector.shape_cast %77 : vector<1x128x128xbf16> to vector<128x128xbf16>
    %79 = vector.shape_cast %76 : vector<128x128xbf16> to vector<1x128x128xbf16>
    tpu.vector_store %arg10[%c0_90, %c0_91, %c0_92], %79 {strides = array<i32>} : memref<1x128x128xbf16, #tpu.memory_space<vmem>>, vector<1x128x128xbf16>,
    return
  }
  func.func @transform_0(%arg0: i32, %arg1: i32) -> (i32, i32, i32, i32) {
    %c0_i32 = arith.constant 0 : i32
    %c0_i32_0 = arith.constant 0 : i32
    %c0_i32_1 = arith.constant 0 : i32
    return %arg0, %arg1, %c0_i32, %c0_i32_0 : i32, i32, i32, i32
  }
  func.func @transform_1(%arg0: i32, %arg1: i32) -> (i32, i32, i32, i32) {
    %c8_i32 = arith.constant 8 : i32
    %0 = arith.muli %arg1, %c8_i32 : i32
    %c1_i32 = arith.constant 1 : i32
    %1 = arith.subi %0, %c1_i32 : i32
    %c0_i32 = arith.constant 0 : i32
    %2 = arith.maxsi %1, %c0_i32 : i32
    %c0_i32_0 = arith.constant 0 : i32
    %c0_i32_1 = arith.constant 0 : i32
    %c0_i32_2 = arith.constant 0 : i32
    return %arg0, %2, %c0_i32_0, %c0_i32_1 : i32, i32, i32, i32
  }
  func.func @transform_2(%arg0: i32, %arg1: i32) -> (i32, i32, i32, i32) {
    %c8_i32 = arith.constant 8 : i32
    %0 = arith.muli %arg1, %c8_i32 : i32
    %c8_i32_0 = arith.constant 8 : i32
    %1 = arith.addi %0, %c8_i32_0 : i32
    %c15_i32 = arith.constant 15 : i32
    %2 = arith.minsi %1, %c15_i32 : i32
    %c0_i32 = arith.constant 0 : i32
    %c0_i32_1 = arith.constant 0 : i32
    %c0_i32_2 = arith.constant 0 : i32
    return %arg0, %2, %c0_i32, %c0_i32_1 : i32, i32, i32, i32
  }
  func.func @transform_3(%arg0: i32, %arg1: i32) -> (i32, i32, i32) {
    %c0_i32 = arith.constant 0 : i32
    %c0_i32_0 = arith.constant 0 : i32
    %c0_i32_1 = arith.constant 0 : i32
    %c0_i32_2 = arith.constant 0 : i32
    return %c0_i32, %c0_i32_0, %c0_i32_1 : i32, i32, i32
  }
  func.func @transform_4(%arg0: i32, %arg1: i32) -> (i32, i32) {
    %c0_i32 = arith.constant 0 : i32
    %c0_i32_0 = arith.constant 0 : i32
    %c0_i32_1 = arith.constant 0 : i32
    return %c0_i32, %c0_i32_0 : i32, i32
  }
  func.func @transform_5(%arg0: i32, %arg1: i32) -> (i32, i32) {
    %c0_i32 = arith.constant 0 : i32
    %c0_i32_0 = arith.constant 0 : i32
    %c0_i32_1 = arith.constant 0 : i32
    return %c0_i32, %c0_i32_0 : i32, i32
  }
  func.func @transform_6(%arg0: i32, %arg1: i32) -> (i32, i32) {
    %c0_i32 = arith.constant 0 : i32
    %c0_i32_0 = arith.constant 0 : i32
    %c0_i32_1 = arith.constant 0 : i32
    return %c0_i32, %c0_i32_0 : i32, i32
  }
  func.func @transform_7(%arg0: i32, %arg1: i32) -> (i32, i32) {
    %c0_i32 = arith.constant 0 : i32
    %c0_i32_0 = arith.constant 0 : i32
    %c0_i32_1 = arith.constant 0 : i32
    return %c0_i32, %c0_i32_0 : i32, i32
  }
  func.func @transform_8(%arg0: i32, %arg1: i32) -> (i32, i32, i32) {
    %c0_i32 = arith.constant 0 : i32
    %c0_i32_0 = arith.constant 0 : i32
    return %arg0, %arg1, %c0_i32 : i32, i32, i32
  }
}

</mosaic_0001>

<bundles_post_ra>
// kernel: generalized_rcnn_forward.5
= control target key start
LH: loop header
LB: loop body
LE: loop exit
PB: predicated region body
PF: predicated region fallthrough
CT: control target
= control target key end

     0   :  { %s1116_s24 = smov 0   ;;  %s1118_s25 = smov 0   ;;  %s1282_s0 = inlined_call_operand.vmem [shape: bf16[2,256,128], index: 0, kind: input, shape index: {}]   ;;  %s1283_s1 = inlined_call_operand.vmem [shape: bf16[128,128], index: 1, kind: input, shape index: {}]   ;;  %s1284_s2 = inlined_call_operand.vmem [shape: f32[1,128], index: 2, kind: input, shape index: {}]   ;;  %s1285_s3 = inlined_call_operand.vmem [shape: bf16[128,128], index: 3, kind: input, shape index: {}]   ;;  %s1286_s4 = inlined_call_operand.vmem [shape: f32[1,128], index: 4, kind: input, shape index: {}]   ;;  %s1287_s5 = inlined_call_operand.vmem [shape: bf16[128,128], index: 5, kind: input, shape index: {}]   ;;  %s1288_s6 = inlined_call_operand.vmem [shape: f32[1,128], index: 6, kind: input, shape index: {}]   ;;  %s1289_s7 = inlined_call_operand.vmem [shape: f32[2,1,128], index: 7, kind: output, shape index: {}]  }
   0x1   :  { %s1120_s26 = smov 0  }
   0x2 LB: > { %s29_s27 = sadd.s32 1, %s1068_s25  ;;  %p804_p0 = scmp.ge.s32.totalorder %s1072_s26, 1  ;;  %s1072_s26 = sphi %s1120_s26, %s17_s26   ;;  %s1068_s25 = sphi %s1118_s25, %s1291_s25   ;;  %s1064_s24 = sphi %s1116_s24, %s1290_s24  }
   0x3   : > { %p31_p1 = scmp.ge.s32.totalorder %s29_s27, 2  ;;  %p256_p2 = scmp.lt.s32.totalorder %s1072_s26, 3 }
   0x5   : > { %s1293_s27 = smov (%p31_p1, %s29_s27), 0  ;;  %p257_p3 = pnand %p804_p0, %p256_p2 }
   0x6   : > { %v1026_v0 = vld [vmem:[%s1283_s1] sm:$0xff] (!%p257_p3)   ;;  %v1074_v1 = vmov (!%p257_p3), 0.0   ;;  %v1027_v2 = vld [vmem:[%s1283_s1 + $0x8] sm:$0xff] (!%p257_p3)   ;;  %vm1075_vm0 = vmmov (!%p257_p3), 0   ;;  %p291_p4 = scmp.lt.s32.totalorder (!%p257_p3), %s1064_s24, 1  ;;  %v1028_v3 = vld [vmem:[%s1283_s1 + $0x10] sm:$0xff] (!%p257_p3)  }
   0x7   : > { %260 = sbr.rel (%p257_p3) target bundleno = 749 (0x2ed), region = 48  ;;  %940 = vmatprep.subr.bf16.mxu0 (!%p257_p3), %v1074_v1  ;;  %960 = vmatprep.subr.bf16.mxu1 (!%p257_p3), %v1074_v1  ;;  %v1029_v4 = vld [vmem:[%s1283_s1 + $0x18] sm:$0xff] (!%p257_p3)   ;;  %v1030_v7 = vld [vmem:[%s1283_s1 + $0x20] sm:$0xff] (!%p257_p3)   ;;  %v1035_v13 = vld [vmem:[%s1285_s3 + $0x8] sm:$0xff] (!%p257_p3)  }
   0x8   : > { %941 = vmatpush3.bf16.msra.mxu0 (!%p257_p3), %v1026_v0  ;;  %956 = vmatprep.mubr.msk.bf16.mxu0 (!%p257_p3), %vm1075_vm0, %v1074_v1  ;;  %v1034_v10 = vld [vmem:[%s1285_s3] sm:$0xff] (!%p257_p3)   ;;  %v1031_v16 = vld [vmem:[%s1283_s1 + $0x28] sm:$0xff] (!%p257_p3)   ;;  %v1036_v20 = vld [vmem:[%s1285_s3 + $0x10] sm:$0xff] (!%p257_p3)  }
   0x9   : > { %942 = vmatprep.subr.bf16.mxu0 (!%p257_p3), %v1074_v1  ;;  %976 = vmatprep.mubr.msk.bf16.mxu1 (!%p257_p3), %vm1075_vm0, %v1074_v1  ;;  %v1032_v21 = vld [vmem:[%s1283_s1 + $0x30] sm:$0xff] (!%p257_p3)   ;;  %v1037_v25 = vld [vmem:[%s1285_s3 + $0x18] sm:$0xff] (!%p257_p3)   ;;  %v1038_v34 = vld [vmem:[%s1285_s3 + $0x20] sm:$0xff] (!%p257_p3)  }
   0xa   : > { %961 = vmatpush3.bf16.msra.mxu1 (!%p257_p3), %v1034_v10  ;;  %v1033_v30 = vld [vmem:[%s1283_s1 + $0x38] sm:$0xff] (!%p257_p3)   ;;  %v1039_v40 = vld [vmem:[%s1285_s3 + $0x28] sm:$0xff] (!%p257_p3)  }
   0xb   : > { %962 = vmatprep.subr.bf16.mxu1 (!%p257_p3), %v1074_v1 }
   0xc   : > { %943 = vmatpush3.bf16.msra.mxu0 (!%p257_p3), %v1027_v2 }
   0xd   : > { %944 = vmatprep.subr.bf16.mxu0 (!%p257_p3), %v1074_v1 }
   0xe   : > { %s1295_s24 = smov (!%p291_p4, %s1064_s24), 1  ;;  %963 = vmatpush3.bf16.msra.mxu1 %v1035_v13 }
   0xf   : > { %s833_s11 = sshll.u32 %s1295_s24, 7  ;;  %964 = vmatprep.subr.bf16.mxu1 %v1074_v1  ;;  %s302_s8 = scalar_lea.vmem %s1289_s7, %s1295_s24 }
  0x10   : > { %s1157_s14 = scalar_lea.vmem %s1282_s0, %s833_s11  ;;  %945 = vmatpush3.bf16.msra.mxu0 %v1028_v3 }
  0x11   : > { %v835_v5 = vld [vmem:[%s1157_s14] sm:$0xff]   ;;  %946 = vmatprep.subr.bf16.mxu0 %v1074_v1  ;;  %v898_v6 = vld [vmem:[%s1157_s14 + $0x8] sm:$0xff]   ;;  %v899_v12 = vld [vmem:[%s1157_s14 + $0x10] sm:$0xff]  }
  0x12   : > { %v836_v8 = vunpack.c.l.bf16 %v835_v5  ;;  %v837_v9 = vunpack.c.h.bf16 %v835_v5  ;;  %v840_v11 = vunpack.c.l.bf16 %v898_v6  ;;  %v841_v14 = vunpack.c.h.bf16 %v898_v6  ;;  %v900_v18 = vld [vmem:[%s1157_s14 + $0x18] sm:$0xff]   ;;  %v901_v24 = vld [vmem:[%s1157_s14 + $0x20] sm:$0xff]   ;;  %965 = vmatpush3.bf16.msra.mxu1 %v1036_v20  ;;  %v902_v33 = vld [vmem:[%s1157_s14 + $0x28] sm:$0xff]  }
  0x13   : > { %v844_v17 = vunpack.c.l.bf16 %v899_v12  ;;  %v845_v22 = vunpack.c.h.bf16 %v899_v12  ;;  %v848_v26 = vunpack.c.l.bf16 %v900_v18  ;;  %v849_v28 = vunpack.c.h.bf16 %v900_v18  ;;  %966 = vmatprep.subr.bf16.mxu1 %v1074_v1  ;;  %v903_v39 = vld [vmem:[%s1157_s14 + $0x30] sm:$0xff]   ;;  %v904_v45 = vld [vmem:[%s1157_s14 + $0x38] sm:$0xff]   ;;  %v905_v50 = vld [vmem:[%s1157_s14 + $0x40] sm:$0xff]  }
  0x14   : > { %947 = vmatpush3.bf16.msra.mxu0 %v1029_v4  ;;  %v374_v15 = vadd.f32 %v837_v9, %v836_v8  ;;  %v852_v31 = vunpack.c.l.bf16 %v901_v24  ;;  %v853_v35 = vunpack.c.h.bf16 %v901_v24  ;;  %v856_v37 = vunpack.c.l.bf16 %v902_v33  ;;  %v906_v55 = vld [vmem:[%s1157_s14 + $0x48] sm:$0xff]   ;;  %v907_v60 = vld [vmem:[%s1157_s14 + $0x50] sm:$0xff]   ;;  %v908_v2 = vld [vmem:[%s1157_s14 + $0x58] sm:$0xff]  }
  0x15   : > { %948 = vmatprep.subr.bf16.mxu0 %v1074_v1  ;;  %v857_v41 = vunpack.c.h.bf16 %v902_v33  ;;  %v860_v43 = vunpack.c.l.bf16 %v903_v39  ;;  %v861_v46 = vunpack.c.h.bf16 %v903_v39  ;;  %v864_v48 = vunpack.c.l.bf16 %v904_v45  ;;  %v910_v12 = vld [vmem:[%s1157_s14 + $0x68] sm:$0xff]   ;;  %v1040_v39 = vld [vmem:[%s1285_s3 + $0x30] sm:$0xff]  }
  0x16   : > { %v375_v19 = vadd.f32 %v840_v11, %v374_v15  ;;  %967 = vmatpush3.bf16.msra.mxu1 %v1037_v25  ;;  %v865_v51 = vunpack.c.h.bf16 %v904_v45  ;;  %v868_v53 = vunpack.c.l.bf16 %v905_v50  ;;  %v869_v56 = vunpack.c.h.bf16 %v905_v50  ;;  %v1046_v45 = vld [vmem:[%s1287_s5 + $0x20] sm:$0xff]  }
  0x17   : > { %968 = vmatprep.subr.bf16.mxu1 %v1074_v1  ;;  %v872_v58 = vunpack.c.l.bf16 %v906_v55  ;;  %v873_v61 = vunpack.c.h.bf16 %v906_v55  ;;  %v876_v63 = vunpack.c.l.bf16 %v907_v60  ;;  %v877_v3 = vunpack.c.h.bf16 %v907_v60  ;;  %v1048_v55 = vld [vmem:[%s1287_s5 + $0x30] sm:$0xff]  }
  0x18   : > { %949 = vmatpush3.bf16.msra.mxu0 %v1030_v7  ;;  %v376_v23 = vadd.f32 %v841_v14, %v375_v19  ;;  %v880_v5 = vunpack.c.l.bf16 %v908_v2  ;;  %v909_v7 = vld [vmem:[%s1157_s14 + $0x60] sm:$0xff]   ;;  %v881_v8 = vunpack.c.h.bf16 %v908_v2  ;;  %v888_v15 = vunpack.c.l.bf16 %v910_v12 }
  0x19   : > { %950 = vmatprep.subr.bf16.mxu0 %v1074_v1  ;;  %v884_v10 = vunpack.c.l.bf16 %v909_v7  ;;  %v885_v13 = vunpack.c.h.bf16 %v909_v7  ;;  %v889_v18 = vunpack.c.h.bf16 %v910_v12 }
  0x1a   : > { %v377_v27 = vadd.f32 %v844_v17, %v376_v23  ;;  %969 = vmatpush3.bf16.msra.mxu1 %v1038_v34  ;;  %v911_v17 = vld [vmem:[%s1157_s14 + $0x70] sm:$0xff]  }
  0x1b   : > { %970 = vmatprep.subr.bf16.mxu1 %v1074_v1  ;;  %v892_v20 = vunpack.c.l.bf16 %v911_v17  ;;  %v893_v23 = vunpack.c.h.bf16 %v911_v17 }
  0x1c   : > { %951 = vmatpush3.bf16.msra.mxu0 %v1031_v16  ;;  %v378_v29 = vadd.f32 %v845_v22, %v377_v27  ;;  %v912_v22 = vld [vmem:[%s1157_s14 + $0x78] sm:$0xff]  }
  0x1d   : > { %952 = vmatprep.subr.bf16.mxu0 %v1074_v1  ;;  %v896_v25 = vunpack.c.l.bf16 %v912_v22  ;;  %v897_v27 = vunpack.c.h.bf16 %v912_v22 }
  0x1e   : > { %v379_v32 = vadd.f32 %v848_v26, %v378_v29  ;;  %971 = vmatpush3.bf16.msra.mxu1 %v1039_v40  ;;  %v1041_v40 = vld [vmem:[%s1285_s3 + $0x38] sm:$0xff]  }
  0x1f   : > { %972 = vmatprep.subr.bf16.mxu1 %v1074_v1 }
  0x20   : > { %953 = vmatpush3.bf16.msra.mxu0 %v1032_v21  ;;  %v380_v36 = vadd.f32 %v849_v28, %v379_v32 }
  0x21   : > { %954 = vmatprep.subr.bf16.mxu0 %v1074_v1 }
  0x22   : > { %v381_v38 = vadd.f32 %v852_v31, %v380_v36  ;;  %973 = vmatpush3.bf16.msra.mxu1 %v1040_v39 }
  0x23   : > { %974 = vmatprep.subr.bf16.mxu1 %v1074_v1 }
  0x24   : > { %955 = vmatpush3.bf16.msra.mxu0 %v1033_v30  ;;  %v382_v42 = vadd.f32 %v853_v35, %v381_v38 }
  0x25   : > { %980 = vmatprep.subr.bf16.mxu0 %v1074_v1 }
  0x26   : > { %v383_v44 = vadd.f32 %v856_v37, %v382_v42  ;;  %975 = vmatpush3.bf16.msra.mxu1 %v1041_v40  ;;  %v1043_v42 = vld [vmem:[%s1287_s5 + $0x8] sm:$0xff]  }
  0x28   : > { %v384_v47 = vadd.f32 %v857_v41, %v383_v44  ;;  %v1042_v41 = vld [vmem:[%s1287_s5] sm:$0xff]   ;;  %v1045_v44 = vld [vmem:[%s1287_s5 + $0x18] sm:$0xff]  }
  0x2a   : > { %v385_v49 = vadd.f32 %v860_v43, %v384_v47  ;;  %v1044_v43 = vld [vmem:[%s1287_s5 + $0x10] sm:$0xff]   ;;  %v435_v47 = vld [vmem:[%s1284_s2] sm:$0x1] }
  0x2c   : > { %v386_v52 = vadd.f32 %v861_v46, %v385_v49  ;;  %v1047_v46 = vld [vmem:[%s1287_s5 + $0x28] sm:$0xff]  }
  0x2e   : > { %v387_v54 = vadd.f32 %v864_v48, %v386_v52 }
  0x30   : > { %v388_v57 = vadd.f32 %v865_v51, %v387_v54 }
  0x32   : > { %v389_v59 = vadd.f32 %v868_v53, %v388_v57  ;;  %v542_v57 = vld [vmem:[%s1286_s4] sm:$0x1] }
  0x34   : > { %v390_v62 = vadd.f32 %v869_v56, %v389_v59  ;;  %v1049_v56 = vld [vmem:[%s1287_s5 + $0x38] sm:$0xff]  }
  0x36   : > { %v391_v0 = vadd.f32 %v872_v58, %v390_v62 }
  0x38   : > { %v392_v4 = vadd.f32 %v873_v61, %v391_v0 }
  0x3a   : > { %v393_v6 = vadd.f32 %v876_v63, %v392_v4 }
  0x3c   : > { %v394_v9 = vadd.f32 %v877_v3, %v393_v6 }
  0x3e   : > { %v395_v11 = vadd.f32 %v880_v5, %v394_v9 }
  0x40   : > { %v396_v14 = vadd.f32 %v881_v8, %v395_v11 }
  0x42   : > { %v397_v16 = vadd.f32 %v884_v10, %v396_v14 }
  0x44   : > { %v398_v19 = vadd.f32 %v885_v13, %v397_v16 }
  0x46   : > { %v399_v21 = vadd.f32 %v888_v15, %v398_v19 }
  0x48   : > { %v400_v24 = vadd.f32 %v889_v18, %v399_v21 }
  0x4a   : > { %v401_v26 = vadd.f32 %v892_v20, %v400_v24 }
  0x4c   : > { %v402_v28 = vadd.f32 %v893_v23, %v401_v26 }
  0x4e   : > { %v403_v29 = vadd.f32 %v896_v25, %v402_v28 }
  0x50   : > { %v404_v30 = vadd.f32 %v897_v27, %v403_v29 }
  0x52   : > { %v411_v31 = vrot.slane %v404_v30, 4 }
  0x54   : > { %v412_v32 = vadd.f32 %v411_v31, %v404_v30 }
  0x56   : > { %v413_v33 = vrot.slane %v412_v32, 2 }
  0x58   : > { %v414_v34 = vadd.f32 %v413_v33, %v412_v32 }
  0x5a   : > { %v415_v35 = vrot.slane %v414_v34, 1 }
  0x5c   : > { %v416_v36 = vadd.f32 %v415_v35, %v414_v34 }
  0x5e   : > { %v417_v37 = vmul.f32 0.00390625, %v416_v36 }
  0x60   : > { %v418_v38 = vpack.c.bf16 %v417_v37, %v417_v37 }
  0x62   : > { %957 = vmatmul.mubr.bf16.vlgmr.msra.gmra.mrb[0].mxu0 %v418_v38 }
  0x63   : > { %996 = vmatprep.mubr.msk.bf16.mxu0 %vm1075_vm0, %v1074_v1  ;;  %981 = vmatpush3.bf16.msra.mxu0 %v1042_v41 }
  0x64   : > { %982 = vmatprep.subr.bf16.mxu0 %v1074_v1 }
  0x67   : > { %983 = vmatpush3.bf16.msra.mxu0 %v1043_v42 }
  0x68   : > { %984 = vmatprep.subr.bf16.mxu0 %v1074_v1 }
  0x6b   : > { %985 = vmatpush3.bf16.msra.mxu0 %v1044_v43 }
  0x6c   : > { %986 = vmatprep.subr.bf16.mxu0 %v1074_v1 }
  0x6f   : > { %987 = vmatpush3.bf16.msra.mxu0 %v1045_v44 }
  0x70   : > { %988 = vmatprep.subr.bf16.mxu0 %v1074_v1 }
  0x73   : > { %989 = vmatpush3.bf16.msra.mxu0 %v1046_v45 }
  0x74   : > { %990 = vmatprep.subr.bf16.mxu0 %v1074_v1 }
  0x77   : > { %991 = vmatpush3.bf16.msra.mxu0 %v1047_v46 }
  0x78   : > { %992 = vmatprep.subr.bf16.mxu0 %v1074_v1 }
  0x7b   : > { %993 = vmatpush3.bf16.msra.mxu0 %v1048_v55 }
  0x7c   : > { %994 = vmatprep.subr.bf16.mxu0 %v1074_v1  ;;  %v649_v1 = vld [vmem:[%s1288_s6] sm:$0x1] }
  0x7f   : > { %995 = vmatpush3.bf16.msra.mxu0 %v1049_v56 }
 0x135   : > { %v518_v48 = vpop.f32.mrb[0].mxu0 }
 0x136   : > { %v519_v49 = vadd.f32 %v518_v48, %v435_v47  ;;  %v958_v50 = vpop.f32.mrb[1].mxu0 }
 0x137   : > { %v521_v51 = vpop.f32.mrb[2].mxu0 }
 0x138   : > { %v524_v52 = vmax.f32 %v519_v49, 0.0  ;;  %v959_v53 = vpop.f32.mrb[3].mxu0 }
 0x13a   : > { %v525_v54 = vpack.c.bf16 %v524_v52, %v524_v52 }
 0x13c   : > { %977 = vmatmul.mubr.bf16.vlgmr.msra.gmra.mrb[0].mxu1 %v525_v54 }
 0x20f   : > { %v625_v58 = vpop.f32.mrb[0].mxu1 }
 0x210   : > { %v626_v59 = vadd.f32 %v625_v58, %v542_v57  ;;  %v978_v60 = vpop.f32.mrb[1].mxu1 }
 0x211   : > { %v628_v61 = vpop.f32.mrb[2].mxu1 }
 0x212   : > { %v631_v62 = vmax.f32 %v626_v59, 0.0  ;;  %v979_v63 = vpop.f32.mrb[3].mxu1 }
 0x214   : > { %v632_v0 = vpack.c.bf16 %v631_v62, %v631_v62 }
 0x216   : > { %997 = vmatmul.mubr.bf16.vlgmr.msra.gmra.mrb[4].mxu0 %v632_v0 }
 0x2e9   : > { %v732_v2 = vpop.f32.mrb[4].mxu0 }
 0x2ea   : > { %v733_v3 = vadd.f32 %v732_v2, %v649_v1  ;;  %v998_v4 = vpop.f32.mrb[5].mxu0 }
 0x2eb   : > { %v735_v5 = vpop.f32.mrb[6].mxu0 }
 0x2ec   : > { %738 = vst [vmem:[%s302_s8] sm:$0x1] %v733_v3  ;;  %v999_v6 = vpop.f32.mrb[7].mxu0 }
 0x2ed PF: > { %s17_s26 = sadd.s32 1, %s1072_s26   ;;  %s1290_s24 = smov %s1068_s25 }
 0x2ee   : > { %p14_p5 = scmp.ge.s32.totalorder %s17_s26, 4   ;;  %s1291_s25 = smov %s1293_s27 }
 0x2f0   :  { %16 = sbr.rel (!%p14_p5) target bundleno = 2 (0x2), region = 86 }

// kernel: generalized_rcnn_forward.3
= control target key start
LH: loop header
LB: loop body
LE: loop exit
PB: predicated region body
PF: predicated region fallthrough
CT: control target
= control target key end

     0   :  { %s1186_s12 = smov 0   ;;  %s1188_s13 = smov 0   ;;  %s1321_s0 = inlined_call_operand.vmem [shape: bf16[2,256,32], index: 0, kind: input, shape index: {}]   ;;  %s1322_s1 = inlined_call_operand.vmem [shape: bf16[32,128], index: 1, kind: input, shape index: {}]   ;;  %s1323_s2 = inlined_call_operand.vmem [shape: f32[1,128], index: 2, kind: input, shape index: {}]   ;;  %s1324_s3 = inlined_call_operand.vmem [shape: bf16[2,256,128], index: 3, kind: output, shape index: {}]  }
   0x1   :  { %s1190_s14 = smov 0  }
   0x2 LB: > { %s25_s15 = sadd.s32 1, %s1160_s13  ;;  %p839_p0 = scmp.ge.s32.totalorder %s1164_s14, 1  ;;  %s1164_s14 = sphi %s1190_s14, %s13_s14   ;;  %s1160_s13 = sphi %s1188_s13, %s1326_s13   ;;  %s1156_s12 = sphi %s1186_s12, %s1325_s12  }
   0x3   : > { %p27_p1 = scmp.ge.s32.totalorder %s25_s15, 2  ;;  %p158_p2 = scmp.lt.s32.totalorder %s1164_s14, 3 }
   0x5   : > { %s1328_s15 = smov (%p27_p1, %s25_s15), 0  ;;  %p159_p3 = pnand %p839_p0, %p158_p2 }
   0x6   : > { %v1124_v0 = vld [vmem:[%s1322_s1] sm:$0xff] (!%p159_p3)   ;;  %p191_p4 = scmp.lt.s32.totalorder (!%p159_p3), %s1156_s12, 1  ;;  %v1125_v1 = vld [vmem:[%s1322_s1 + $0x8] sm:$0xff] (!%p159_p3)   ;;  %vm346_vm0 = vcmask (!%p159_p3), 261120  }
   0x7   : > { %162 = sbr.rel (%p159_p3) target bundleno = 266 (0x10a), region = 32  ;;  %1060 = vmatprep.subr.bf16.mxu0 (!%p159_p3), %v1124_v0  ;;  %1096 = vmatprep.subr.bf16.mxu1 (!%p159_p3), %v1124_v0  ;;  %v1255_v18 = vld [vmem:[%s1323_s2] ss:$0 sm:$0xff] (!%p159_p3) }
   0x8   : > { %1061 = vmatpush3.bf16.msra.mxu0 (!%p159_p3), %v1124_v0  ;;  %1098 = vmatpush3.bf16.msra.mxu1 (!%p159_p3), %v1124_v0 }
   0x9   : > { %1062 = vmatprep.subr.bf16.mxu0 (!%p159_p3), %v1125_v1  ;;  %1097 = vmatprep.subr.bf16.mxu1 (!%p159_p3), %v1125_v1 }
   0xc   : > { %1063 = vmatpush3.bf16.msra.mxu0 (!%p159_p3), %v1125_v1  ;;  %1099 = vmatpush3.bf16.msra.mxu1 (!%p159_p3), %v1125_v1 }
   0xe   : > { %s1330_s12 = smov (!%p191_p4, %s1156_s12), 1 }
   0xf   : > { %s913_s20 = sshll.u32 %s1330_s12, 7 }
  0x10   : > { %s1218_s23 = scalar_lea.vmem %s1321_s0, %s913_s20  ;;  %s1270_s28 = scalar_lea.vmem %s1324_s3, %s913_s20 }
  0x11   : > { %v1126_v2 = vld [vmem:[%s1218_s23] sm:$0xff]   ;;  %v1128_v4 = vld [vmem:[%s1218_s23 + $0x8] sm:$0xff]   ;;  %v1130_v6 = vld [vmem:[%s1218_s23 + $0x10] sm:$0xff]  }
  0x12   : > { %v1127_v3 = vld [vmem:[%s1218_s23 + $0x40] sm:$0xff]   ;;  %1064 = vmatprep.mubr.msk.bf16.mxu0 %vm346_vm0, %v1126_v2  ;;  %v1129_v5 = vld [vmem:[%s1218_s23 + $0x48] sm:$0xff]   ;;  %v1131_v7 = vld [vmem:[%s1218_s23 + $0x50] sm:$0xff]  }
  0x13   : > { %1080 = vmatprep.mubr.msk.bf16.mxu1 %vm346_vm0, %v1127_v3  ;;  %1065 = vmatmul.mubr.msk.bf16.vlgmr.msra.gmra.mrb[0].mxu0 %vm346_vm0, %v1128_v4  ;;  %v1132_v8 = vld [vmem:[%s1218_s23 + $0x18] sm:$0xff]   ;;  %v1134_v10 = vld [vmem:[%s1218_s23 + $0x20] sm:$0xff]   ;;  %v1136_v12 = vld [vmem:[%s1218_s23 + $0x28] sm:$0xff]  }
  0x14   : > { %1081 = vmatmul.mubr.msk.bf16.vlgmr.msra.gmra.mrb[0].mxu1 %vm346_vm0, %v1129_v5  ;;  %1068 = vmatprep.mubr.msk.bf16.mxu0 %vm346_vm0, %v1130_v6  ;;  %v1133_v9 = vld [vmem:[%s1218_s23 + $0x58] sm:$0xff]   ;;  %v1135_v11 = vld [vmem:[%s1218_s23 + $0x60] sm:$0xff]   ;;  %v1137_v13 = vld [vmem:[%s1218_s23 + $0x68] sm:$0xff]  }
  0x15   : > { %1084 = vmatprep.mubr.msk.bf16.mxu1 %vm346_vm0, %v1131_v7  ;;  %v1138_v14 = vld [vmem:[%s1218_s23 + $0x30] sm:$0xff]   ;;  %v1140_v16 = vld [vmem:[%s1218_s23 + $0x38] sm:$0xff]  }
  0x16   : > { %v1139_v15 = vld [vmem:[%s1218_s23 + $0x70] sm:$0xff]   ;;  %v1141_v17 = vld [vmem:[%s1218_s23 + $0x78] sm:$0xff]  }
  0x1b   : > { %1069 = vmatmul.mubr.msk.bf16.gmra.mrb[4].mxu0 %vm346_vm0, %v1132_v8 }
  0x1c   : > { %1085 = vmatmul.mubr.msk.bf16.gmra.mrb[4].mxu1 %vm346_vm0, %v1133_v9  ;;  %1072 = vmatprep.mubr.msk.bf16.mxu0 %vm346_vm0, %v1134_v10 }
  0x1d   : > { %1088 = vmatprep.mubr.msk.bf16.mxu1 %vm346_vm0, %v1135_v11 }
  0x23   : > { %1073 = vmatmul.mubr.msk.bf16.gmra.mrb[8].mxu0 %vm346_vm0, %v1136_v12 }
  0x24   : > { %1089 = vmatmul.mubr.msk.bf16.gmra.mrb[8].mxu1 %vm346_vm0, %v1137_v13  ;;  %1076 = vmatprep.mubr.msk.bf16.mxu0 %vm346_vm0, %v1138_v14 }
  0x25   : > { %1092 = vmatprep.mubr.msk.bf16.mxu1 %vm346_vm0, %v1139_v15 }
  0x2b   : > { %1077 = vmatmul.mubr.msk.bf16.gmra.mrb[12].mxu0 %vm346_vm0, %v1140_v16 }
  0x2c   : > { %1093 = vmatmul.mubr.msk.bf16.gmra.mrb[12].mxu1 %vm346_vm0, %v1141_v17 }
  0xe6   : > { %v1066_v19 = vpop.f32.mrb[0].mxu0 }
  0xe7   : > { %v438_v20 = vadd.f32 %v1066_v19, %v1255_v18  ;;  %v1082_v21 = vpop.f32.mrb[0].mxu1  ;;  %v429_v22 = vpop.f32.mrb[1].mxu0 }
  0xe8   : > { %v502_v23 = vadd.f32 %v1082_v21, %v1255_v18  ;;  %v430_v24 = vadd.f32 %v1255_v18, %v429_v22  ;;  %v493_v25 = vpop.f32.mrb[1].mxu1  ;;  %v1067_v26 = vpop.f32.mrb[2].mxu0 }
  0xe9   : > { %v494_v27 = vadd.f32 %v1255_v18, %v493_v25  ;;  %v441_v28 = vadd.f32 %v1067_v26, %v1255_v18  ;;  %v1083_v29 = vpop.f32.mrb[2].mxu1  ;;  %v432_v30 = vpop.f32.mrb[3].mxu0  ;;  %v558_v34 = vmax.f32 %v438_v20, 0.0 }
  0xea   : > { %v505_v31 = vadd.f32 %v1083_v29, %v1255_v18  ;;  %v433_v32 = vadd.f32 %v1255_v18, %v432_v30  ;;  %v496_v33 = vpop.f32.mrb[3].mxu1  ;;  %v574_v37 = vmax.f32 %v502_v23, 0.0  ;;  %v556_v38 = vmax.f32 %v430_v24, 0.0 }
  0xeb   : > { %v559_v35 = vmax.f32 %v441_v28, 0.0  ;;  %v497_v36 = vadd.f32 %v1255_v18, %v496_v33  ;;  %v572_v41 = vmax.f32 %v494_v27, 0.0 }
  0xec   : > { %v575_v39 = vmax.f32 %v505_v31, 0.0  ;;  %v557_v40 = vmax.f32 %v433_v32, 0.0 }
  0xed   : > { %v955_v42 = vpack.c.bf16 %v559_v35, %v558_v34  ;;  %v573_v43 = vmax.f32 %v497_v36, 0.0 }
  0xee   : > { %v995_v44 = vpack.c.bf16 %v575_v39, %v574_v37  ;;  %v950_v45 = vpack.c.bf16 %v557_v40, %v556_v38  ;;  %v1070_v46 = vpop.f32.mrb[4].mxu0 }
  0xef   : > { %1027 = vst [vmem:[%s1270_s28 + $0x8] sm:$0xff] %v955_v42   ;;  %v990_v47 = vpack.c.bf16 %v573_v43, %v572_v41  ;;  %v454_v48 = vadd.f32 %v1070_v46, %v1255_v18  ;;  %v1086_v49 = vpop.f32.mrb[4].mxu1  ;;  %v445_v50 = vpop.f32.mrb[5].mxu0 }
  0xf0   : > { %1035 = vst [vmem:[%s1270_s28 + $0x48] sm:$0xff] %v995_v44   ;;  %951 = vst [vmem:[%s1270_s28] sm:$0xff] %v950_v45   ;;  %v518_v51 = vadd.f32 %v1086_v49, %v1255_v18  ;;  %v446_v52 = vadd.f32 %v1255_v18, %v445_v50  ;;  %v509_v53 = vpop.f32.mrb[5].mxu1  ;;  %v1071_v54 = vpop.f32.mrb[6].mxu0 }
  0xf1   : > { %1034 = vst [vmem:[%s1270_s28 + $0x40] sm:$0xff] %v990_v47   ;;  %v510_v55 = vadd.f32 %v1255_v18, %v509_v53  ;;  %v457_v56 = vadd.f32 %v1071_v54, %v1255_v18  ;;  %v1087_v57 = vpop.f32.mrb[6].mxu1  ;;  %v448_v58 = vpop.f32.mrb[7].mxu0  ;;  %v562_v62 = vmax.f32 %v454_v48, 0.0 }
  0xf2   : > { %v521_v59 = vadd.f32 %v1087_v57, %v1255_v18  ;;  %v449_v60 = vadd.f32 %v1255_v18, %v448_v58  ;;  %v512_v61 = vpop.f32.mrb[7].mxu1  ;;  %v578_v1 = vmax.f32 %v518_v51, 0.0  ;;  %v560_v2 = vmax.f32 %v446_v52, 0.0 }
  0xf3   : > { %v563_v63 = vmax.f32 %v457_v56, 0.0  ;;  %v513_v0 = vadd.f32 %v1255_v18, %v512_v61  ;;  %v576_v5 = vmax.f32 %v510_v55, 0.0 }
  0xf4   : > { %v579_v3 = vmax.f32 %v521_v59, 0.0  ;;  %v561_v4 = vmax.f32 %v449_v60, 0.0 }
  0xf5   : > { %v965_v6 = vpack.c.bf16 %v563_v63, %v562_v62  ;;  %v577_v7 = vmax.f32 %v513_v0, 0.0 }
  0xf6   : > { %v1005_v8 = vpack.c.bf16 %v579_v3, %v578_v1  ;;  %v960_v9 = vpack.c.bf16 %v561_v4, %v560_v2  ;;  %v1074_v10 = vpop.f32.mrb[8].mxu0 }
  0xf7   : > { %1029 = vst [vmem:[%s1270_s28 + $0x18] sm:$0xff] %v965_v6   ;;  %v1000_v11 = vpack.c.bf16 %v577_v7, %v576_v5  ;;  %v470_v12 = vadd.f32 %v1074_v10, %v1255_v18  ;;  %v1090_v13 = vpop.f32.mrb[8].mxu1  ;;  %v461_v14 = vpop.f32.mrb[9].mxu0 }
  0xf8   : > { %1037 = vst [vmem:[%s1270_s28 + $0x58] sm:$0xff] %v1005_v8   ;;  %1028 = vst [vmem:[%s1270_s28 + $0x10] sm:$0xff] %v960_v9   ;;  %v534_v15 = vadd.f32 %v1090_v13, %v1255_v18  ;;  %v462_v16 = vadd.f32 %v1255_v18, %v461_v14  ;;  %v525_v17 = vpop.f32.mrb[9].mxu1  ;;  %v1075_v19 = vpop.f32.mrb[10].mxu0 }
  0xf9   : > { %1036 = vst [vmem:[%s1270_s28 + $0x50] sm:$0xff] %v1000_v11   ;;  %v526_v20 = vadd.f32 %v1255_v18, %v525_v17  ;;  %v473_v21 = vadd.f32 %v1075_v19, %v1255_v18  ;;  %v1091_v22 = vpop.f32.mrb[10].mxu1  ;;  %v464_v23 = vpop.f32.mrb[11].mxu0  ;;  %v566_v27 = vmax.f32 %v470_v12, 0.0 }
  0xfa   : > { %v537_v24 = vadd.f32 %v1091_v22, %v1255_v18  ;;  %v465_v25 = vadd.f32 %v1255_v18, %v464_v23  ;;  %v528_v26 = vpop.f32.mrb[11].mxu1  ;;  %v582_v30 = vmax.f32 %v534_v15, 0.0  ;;  %v564_v31 = vmax.f32 %v462_v16, 0.0 }
  0xfb   : > { %v567_v28 = vmax.f32 %v473_v21, 0.0  ;;  %v529_v29 = vadd.f32 %v1255_v18, %v528_v26  ;;  %v580_v34 = vmax.f32 %v526_v20, 0.0 }
  0xfc   : > { %v583_v32 = vmax.f32 %v537_v24, 0.0  ;;  %v565_v33 = vmax.f32 %v465_v25, 0.0 }
  0xfd   : > { %v975_v35 = vpack.c.bf16 %v567_v28, %v566_v27  ;;  %v581_v36 = vmax.f32 %v529_v29, 0.0 }
  0xfe   : > { %v1015_v37 = vpack.c.bf16 %v583_v32, %v582_v30  ;;  %v970_v38 = vpack.c.bf16 %v565_v33, %v564_v31  ;;  %v1078_v39 = vpop.f32.mrb[12].mxu0 }
  0xff   : > { %1031 = vst [vmem:[%s1270_s28 + $0x28] sm:$0xff] %v975_v35   ;;  %v1010_v40 = vpack.c.bf16 %v581_v36, %v580_v34  ;;  %v486_v41 = vadd.f32 %v1078_v39, %v1255_v18  ;;  %v1094_v42 = vpop.f32.mrb[12].mxu1  ;;  %v477_v43 = vpop.f32.mrb[13].mxu0 }
 0x100   : > { %1039 = vst [vmem:[%s1270_s28 + $0x68] sm:$0xff] %v1015_v37   ;;  %1030 = vst [vmem:[%s1270_s28 + $0x20] sm:$0xff] %v970_v38   ;;  %v550_v44 = vadd.f32 %v1094_v42, %v1255_v18  ;;  %v478_v45 = vadd.f32 %v1255_v18, %v477_v43  ;;  %v541_v46 = vpop.f32.mrb[13].mxu1  ;;  %v1079_v47 = vpop.f32.mrb[14].mxu0 }
 0x101   : > { %1038 = vst [vmem:[%s1270_s28 + $0x60] sm:$0xff] %v1010_v40   ;;  %v542_v48 = vadd.f32 %v1255_v18, %v541_v46  ;;  %v489_v49 = vadd.f32 %v1079_v47, %v1255_v18  ;;  %v1095_v50 = vpop.f32.mrb[14].mxu1  ;;  %v480_v51 = vpop.f32.mrb[15].mxu0  ;;  %v570_v55 = vmax.f32 %v486_v41, 0.0 }
 0x102   : > { %v553_v52 = vadd.f32 %v1095_v50, %v1255_v18  ;;  %v481_v53 = vadd.f32 %v1255_v18, %v480_v51  ;;  %v544_v54 = vpop.f32.mrb[15].mxu1  ;;  %v586_v58 = vmax.f32 %v550_v44, 0.0  ;;  %v568_v59 = vmax.f32 %v478_v45, 0.0 }
 0x103   : > { %v571_v56 = vmax.f32 %v489_v49, 0.0  ;;  %v545_v57 = vadd.f32 %v1255_v18, %v544_v54  ;;  %v584_v62 = vmax.f32 %v542_v48, 0.0 }
 0x104   : > { %v587_v60 = vmax.f32 %v553_v52, 0.0  ;;  %v569_v61 = vmax.f32 %v481_v53, 0.0 }
 0x105   : > { %v985_v63 = vpack.c.bf16 %v571_v56, %v570_v55  ;;  %v585_v0 = vmax.f32 %v545_v57, 0.0 }
 0x106   : > { %v1025_v1 = vpack.c.bf16 %v587_v60, %v586_v58  ;;  %v980_v2 = vpack.c.bf16 %v569_v61, %v568_v59 }
 0x107   : > { %1033 = vst [vmem:[%s1270_s28 + $0x38] sm:$0xff] %v985_v63   ;;  %v1020_v3 = vpack.c.bf16 %v585_v0, %v584_v62 }
 0x108   : > { %1041 = vst [vmem:[%s1270_s28 + $0x78] sm:$0xff] %v1025_v1   ;;  %1032 = vst [vmem:[%s1270_s28 + $0x30] sm:$0xff] %v980_v2  }
 0x109   : > { %1040 = vst [vmem:[%s1270_s28 + $0x70] sm:$0xff] %v1020_v3  }
 0x10a PF: > { %s13_s14 = sadd.s32 1, %s1164_s14   ;;  %s1325_s12 = smov %s1160_s13 }
 0x10b   : > { %p10_p5 = scmp.ge.s32.totalorder %s13_s14, 4   ;;  %s1326_s13 = smov %s1328_s15 }
 0x10d   :  { %12 = sbr.rel (!%p10_p5) target bundleno = 2 (0x2), region = 62 }

// kernel: generalized_rcnn_forward.4
= control target key start
LH: loop header
LB: loop body
LE: loop exit
PB: predicated region body
PF: predicated region fallthrough
CT: control target
= control target key end

     0   :  { %s4846_s27 = smov 0   ;;  %s4848_s28 = smov 0   ;;  %s5814_s0 = inlined_call_operand.vmem [shape: bf16[2,16,16,128], index: 0, kind: input, shape index: {}, may-alias: {0,1,2}]   ;;  %s5815_s1 = inlined_call_operand.vmem [shape: bf16[2,16,16,128], index: 1, kind: input, shape index: {}, may-alias: {0,1,2}]   ;;  %s5816_s2 = inlined_call_operand.vmem [shape: bf16[2,16,16,128], index: 2, kind: input, shape index: {}, may-alias: {0,1,2}]   ;;  %s5817_s3 = inlined_call_operand.vmem [shape: bf16[4,256,128], index: 3, kind: input, shape index: {}]   ;;  %s5818_s4 = inlined_call_operand.vmem [shape: bf16[128,128], index: 4, kind: input, shape index: {}]   ;;  %s5819_s5 = inlined_call_operand.vmem [shape: f32[1,128], index: 5, kind: input, shape index: {}]   ;;  %s5820_s6 = inlined_call_operand.vmem [shape: bf16[128,128], index: 6, kind: input, shape index: {}]   ;;  %s5821_s7 = inlined_call_operand.vmem [shape: f32[1,128], index: 7, kind: input, shape index: {}]   ;;  %s5822_s8 = inlined_call_operand.vmem [shape: bf16[2,256,128], index: 8, kind: output, shape index: {}]  }
   0x1   :  { %s4850_s29 = smov 0   ;;  %s4852_s30 = smov 0  }
   0x2   :  { %s4854_s9 = smov 0  }
   0x3 LB: > { %s27_s10 = sadd.s32 1, %s4790_s29  ;;  %s30_s11 = sadd.s32 1, %s4794_s30  ;;  %s4798_s9 = sphi %s4854_s9, %s18_s9   ;;  %s4794_s30 = sphi %s4852_s30, %s5840_s30   ;;  %s4790_s29 = sphi %s4850_s29, %s5839_s29   ;;  %s4786_s28 = sphi %s4848_s28, %s5838_s28   ;;  %s4782_s27 = sphi %s4846_s27, %s5837_s27  }
   0x4   : > { %p28_p0 = scmp.ge.s32.totalorder %s27_s10, 2  ;;  %p3879_p1 = scmp.ge.s32.totalorder %s4798_s9, 1 }
   0x5   : > { %p348_p2 = scmp.lt.s32.totalorder %s4798_s9, 5 }
   0x6   : > { %s5842_s10 = smov (%p28_p0, %s27_s10), 0  ;;  %s5844_s11 = smov (!%p28_p0, %s30_s11), %s4794_s30 }
   0x7   : > { %p349_p3 = pnand %p3879_p1, %p348_p2  ;;  %p32_p4 = scmp.ge.s32.totalorder %s5844_s11, 2 }
   0x8   : > { %vm480_vm0 = vcmask (!%p349_p3), 1040384   ;;  %vm481_vm1 = vsmask.f32 (!%p349_p3), 256  ;;  %v486_v0 = vld [vmem:[#allocation2 + $0xc] sm:$0x1] (!%p349_p3)  ;;  %v4800_v1 = vmov (!%p349_p3), 0  }
   0x9   : > { %s5846_s11 = smov (%p32_p4, %s5844_s11), 0  ;;  %352 = sbr.rel (%p349_p3) target bundleno = 722 (0x2d2), region = 52 }
   0xa   : > { %473 = vst [vmem:[#allocation2] sm:$0xf] (!%p349_p3), %v4800_v1  ;;  %474 = vst [vmem:[#allocation2 + $0x4] sm:$0xf] (!%p349_p3), %v4800_v1  ;;  %v489_v3 = vld [vmem:[#allocation2 + $0x18] sm:$0x1] (!%p349_p3) }
   0xb   : > { %475 = vst [vmem:[#allocation2 + $0x8] sm:$0x1] (!%p349_p3), %v4800_v1  ;;  %477 = vst [vmem:[#allocation2 + $0x6c] sm:$0xf] (!%p349_p3), %v4800_v1  ;;  %v492_v4 = vld [vmem:[#allocation2 + $0x24] sm:$0x1] (!%p349_p3) }
   0xc   : > { %478 = vst [vmem:[#allocation2 + $0x70] sm:$0xf] (!%p349_p3), %v4800_v1  ;;  %479 = vst [vmem:[#allocation2 + $0x74] sm:$0x1] (!%p349_p3), %v4800_v1  ;;  %vm513_vm3 = vsmask.f32 (!%p349_p3), 7938 }
   0xd   : > { %vm4882_vm2 = vmand (!%p349_p3), %vm480_vm0, %vm481_vm1  ;;  %v495_v8 = vld [vmem:[#allocation2 + $0x30] sm:$0x1] (!%p349_p3)  ;;  %s4893_s12 = sshll.u32 (!%p349_p3), %s4782_s27, 3  ;;  %v498_v10 = vld [vmem:[#allocation2 + $0x3c] sm:$0x1] (!%p349_p3)  ;;  %p418_p5 = scmp.lt.s32.totalorder (!%p349_p3), %s4786_s28, 1 }
   0xe   : > { %v487_v5 = vsel (!%p349_p3), %vm4882_vm2, 0, %v486_v0  ;;  %v490_v6 = vsel (!%p349_p3), %vm4882_vm2, 0, %v489_v3  ;;  %v493_v7 = vsel (!%p349_p3), %vm4882_vm2, 0, %v492_v4  ;;  %v496_v9 = vsel (!%p349_p3), %vm4882_vm2, 0, %v495_v8  ;;  %v501_v11 = vld [vmem:[#allocation2 + $0x48] sm:$0x1] (!%p349_p3)  ;;  %vm4899_vm4 = vmand (!%p349_p3), %vm480_vm0, %vm513_vm3 }
   0xf   : > { %488 = vst [vmem:[#allocation2 + $0xc] sm:$0x1] (!%p349_p3), %v487_v5  ;;  %491 = vst [vmem:[#allocation2 + $0x18] sm:$0x1] (!%p349_p3), %v490_v6  ;;  %v499_v13 = vsel (!%p349_p3), %vm4882_vm2, 0, %v498_v10  ;;  %v502_v14 = vsel (!%p349_p3), %vm4882_vm2, 0, %v501_v11 }
  0x10   : > { %494 = vst [vmem:[#allocation2 + $0x24] sm:$0x1] %v493_v7  ;;  %497 = vst [vmem:[#allocation2 + $0x30] sm:$0x1] %v496_v9  ;;  %v504_v15 = vld [vmem:[#allocation2 + $0x54] sm:$0x1] }
  0x11   : > { %v507_v16 = vld [vmem:[#allocation2 + $0x60] sm:$0x1]  ;;  %500 = vst [vmem:[#allocation2 + $0x3c] sm:$0x1] %v499_v13  ;;  %503 = vst [vmem:[#allocation2 + $0x48] sm:$0x1] %v502_v14 }
  0x12   : > { %v505_v17 = vsel %vm4882_vm2, 0, %v504_v15  ;;  %v508_v18 = vsel %vm4882_vm2, 0, %v507_v16  ;;  %v518_v19 = vld [vmem:[#allocation2 + $0x14] sm:$0x1]  ;;  %v521_v20 = vld [vmem:[#allocation2 + $0x20] sm:$0x1] }
  0x13   : > { %506 = vst [vmem:[#allocation2 + $0x54] sm:$0x1] %v505_v17  ;;  %509 = vst [vmem:[#allocation2 + $0x60] sm:$0x1] %v508_v18  ;;  %v519_v21 = vsel %vm4899_vm4, 0, %v518_v19  ;;  %v522_v22 = vsel %vm4899_vm4, 0, %v521_v20 }
  0x14   : > { %v524_v23 = vld [vmem:[#allocation2 + $0x2c] sm:$0x1]  ;;  %v527_v24 = vld [vmem:[#allocation2 + $0x38] sm:$0x1]  ;;  %520 = vst [vmem:[#allocation2 + $0x14] sm:$0x1] %v519_v21 }
  0x15   : > { %523 = vst [vmem:[#allocation2 + $0x20] sm:$0x1] %v522_v22  ;;  %v525_v25 = vsel %vm4899_vm4, 0, %v524_v23  ;;  %v528_v26 = vsel %vm4899_vm4, 0, %v527_v24  ;;  %v530_v27 = vld [vmem:[#allocation2 + $0x44] sm:$0x1] }
  0x16   : > { %v533_v28 = vld [vmem:[#allocation2 + $0x50] sm:$0x1]  ;;  %526 = vst [vmem:[#allocation2 + $0x2c] sm:$0x1] %v525_v25  ;;  %529 = vst [vmem:[#allocation2 + $0x38] sm:$0x1] %v528_v26 }
  0x17   : > { %v531_v29 = vsel %vm4899_vm4, 0, %v530_v27  ;;  %v534_v30 = vsel %vm4899_vm4, 0, %v533_v28  ;;  %v536_v31 = vld [vmem:[#allocation2 + $0x5c] sm:$0x1]  ;;  %v539_v32 = vld [vmem:[#allocation2 + $0x68] sm:$0x1] }
  0x18   : > { %532 = vst [vmem:[#allocation2 + $0x44] sm:$0x1] %v531_v29  ;;  %535 = vst [vmem:[#allocation2 + $0x50] sm:$0x1] %v534_v30  ;;  %v537_v33 = vsel %vm4899_vm4, 0, %v536_v31  ;;  %v540_v34 = vsel %vm4899_vm4, 0, %v539_v32 }
  0x19   : > { %v483_v35 = vld [vmem:[#allocation2] sm:$0x1]  ;;  %v510_v36 = vld [vmem:[#allocation2 + $0x6c] sm:$0x1]  ;;  %538 = vst [vmem:[#allocation2 + $0x5c] sm:$0x1] %v537_v33 }
  0x1a   : > { %541 = vst [vmem:[#allocation2 + $0x68] sm:$0x1] %v540_v34  ;;  %v484_v37 = vsel %vm4882_vm2, 0, %v483_v35  ;;  %v511_v38 = vsel %vm4882_vm2, 0, %v510_v36  ;;  %v515_v39 = vld [vmem:[#allocation2 + $0x8] sm:$0x1] }
  0x1b   : > { %v542_v40 = vld [vmem:[#allocation2 + $0x74] sm:$0x1]  ;;  %485 = vst [vmem:[#allocation2] sm:$0x1] %v484_v37  ;;  %512 = vst [vmem:[#allocation2 + $0x6c] sm:$0x1] %v511_v38 }
  0x1c   : > { %v516_v41 = vsel %vm4899_vm4, 0, %v515_v39  ;;  %v543_v42 = vsel %vm4899_vm4, 0, %v542_v40  ;;  %s5848_s28 = smov (!%p418_p5, %s4786_s28), 1  ;;  %p420_p6 = scmp.lt.s32.totalorder %s4893_s12, 15  ;;  %vm561_vm5 = vsmask.f32 4368 }
  0x1d   : > { %517 = vst [vmem:[#allocation2 + $0x8] sm:$0x1] %v516_v41  ;;  %544 = vst [vmem:[#allocation2 + $0x74] sm:$0x1] %v543_v42  ;;  %s3885_s13 = sadd.s32 4294967295, %s4893_s12  ;;  %s4941_s14 = sshll.u32 %s5848_s28, 5 }
  0x1e   : > { %p430_p7 = scmp.gt.s32.totalorder %s3885_s13, 0  ;;  %p3886_p8 = scmp.lt.s32.totalorder %s3885_s13, 15  ;;  %vm724_vm6 = vcmask 1043456   ;;  %v726_v49 = vld [vmem:[#allocation2 + $0xc] sm:$0xf]  ;;  %vm4980_vm8 = vmor %vm481_vm1, %vm561_vm5 }
  0x1f   : > { %s421_s15 = scalar_select %p420_p6, %s4893_s12, 15  ;;  %v730_v50 = vld [vmem:[#allocation2 + $0x14] sm:$0x1]  ;;  %vm4973_vm7 = vmand %vm724_vm6, %vm513_vm3  ;;  %v733_v5 = vld [vmem:[#allocation2 + $0x18] sm:$0xf] }
  0x20   : > { %s431_s16 = scalar_select %p430_p7, %s3885_s13, 0  ;;  %v737_v15 = vld [vmem:[#allocation2 + $0x20] sm:$0x1]  ;;  %v740_v16 = vld [vmem:[#allocation2 + $0x24] sm:$0xf] }
  0x21   : > { %s3881_s17 = sshll.u32 %s421_s15, 1  ;;  %s446_s19 = sadd.s32 8, %s4893_s12  ;;  %v744_v31 = vld [vmem:[#allocation2 + $0x2c] sm:$0x1]  ;;  %v747_v33 = vld [vmem:[#allocation2 + $0x30] sm:$0xf] }
  0x22   : > { %s424_s18 = sadd.s32 %s4941_s14, %s3881_s17  ;;  %p4946_p9 = scmp.lt.s32.totalorder %s446_s19, 15 }
  0x23   : > { %s3883_s20 = sshll.u32 %s424_s18, 2  ;;  %s3901_s25 = sshll.u32 %s4782_s27, 4 }
  0x24   : > { %s4953_s24 = scalar_lea.vmem %s5814_s0, %s3883_s20  ;;  %s5850_s16 = smov (!%p3886_p8, %s431_s16), 15 }
  0x25   : > { %v545_v43 = vld [vmem:[%s4953_s24] sm:$0xf]  ;;  %v546_v44 = vld [vmem:[%s4953_s24 + $0x4] sm:$0xf]  ;;  %s5852_s19 = smov (!%p4946_p9, %s446_s19), 15  ;;  %s3891_s26 = sshll.u32 %s5850_s16, 1 }
  0x26   : > { %v564_v45 = vshrl.u32 %v545_v43, 16  ;;  %v567_v46 = vshll.u32 %v545_v43, 16  ;;  %v572_v47 = vshrl.u32 %v546_v44, 16  ;;  %v575_v48 = vshll.u32 %v546_v44, 16  ;;  %p4964_p10 = scmp.lt.s32.totalorder %s3901_s25, 31  ;;  %s438_s12 = sadd.s32 %s3891_s26, %s4941_s14 }
  0x27   : > { %v547_v51 = vld [vmem:[%s4953_s24 + $0x8] sm:$0xf]  ;;  %v548_v52 = vld [vmem:[%s4953_s24 + $0xc] sm:$0xf]  ;;  %v549_v58 = vld [vmem:[%s4953_s24 + $0x10] sm:$0xf] }
  0x28   : > { %v566_v53 = vrot.slane %v564_v45, 7  ;;  %v574_v55 = vrot.slane %v572_v47, 7  ;;  %v581_v56 = vshrl.u32 %v547_v51, 16  ;;  %v584_v57 = vshll.u32 %v547_v51, 16  ;;  %s3893_s13 = sshll.u32 %s438_s12, 2  ;;  %s5854_s19 = smov (!%p4946_p9, %s5852_s19), 15 }
  0x29   : > { %v589_v60 = vshrl.u32 %v548_v52, 16  ;;  %v592_v61 = vshll.u32 %v548_v52, 16  ;;  %v598_v62 = vshrl.u32 %v549_v58, 16  ;;  %v601_v63 = vshll.u32 %v549_v58, 16  ;;  %s4987_s17 = scalar_lea.vmem %s5815_s1, %s3893_s13  ;;  %v550_v6 = vld [vmem:[%s4953_s24 + $0x14] sm:$0xf] }
  0x2a   : > { %v569_v0 = vor.u32 %v567_v46, %v566_v53  ;;  %v570_v1 = vrot.slane %v566_v53, 4  ;;  %v577_v3 = vor.u32 %v575_v48, %v574_v55  ;;  %v579_v4 = vrot.slane %v574_v55, 4  ;;  %v551_v7 = vld [vmem:[%s4953_s24 + $0x18] sm:$0xf]  ;;  %s5856_s25 = smov (!%p4964_p10, %s3901_s25), 31  ;;  %s3898_s18 = sshll.u32 %s5854_s19, 1 }
  0x2b   : > { %v583_v8 = vrot.slane %v581_v56, 7  ;;  %v591_v9 = vrot.slane %v589_v60, 7  ;;  %v600_v10 = vrot.slane %v598_v62, 7  ;;  %v606_v11 = vshrl.u32 %v550_v6, 16  ;;  %v552_v22 = vld [vmem:[%s4953_s24 + $0x1c] sm:$0xf]  ;;  %s455_s20 = sadd.s32 %s3898_s18, %s4941_s14  ;;  %s468_s21 = sadd.s32 %s4941_s14, %s5856_s25 }
  0x2c   : > { %v727_v12 = vsel %vm4973_vm7, %v569_v0, %v726_v49  ;;  %v578_v13 = vsel %vm4980_vm8, %v570_v1, %v577_v3  ;;  %v731_v14 = vsel %vm4882_vm2, %v579_v4, %v730_v50  ;;  %v609_v17 = vshll.u32 %v550_v6, 16  ;;  %v553_v27 = vld [vmem:[%s4953_s24 + $0x20] sm:$0xf]  ;;  %s3900_s22 = sshll.u32 %s455_s20, 2  ;;  %s3903_s23 = sshll.u32 %s468_s21, 2 }
  0x2d   : > { %728 = vst [vmem:[#allocation2 + $0xc] sm:$0xf] %v727_v12  ;;  %729 = vst [vmem:[#allocation2 + $0x10] sm:$0xf] %v578_v13  ;;  %v586_v18 = vor.u32 %v584_v57, %v583_v8  ;;  %v587_v19 = vrot.slane %v583_v8, 4  ;;  %v594_v20 = vor.u32 %v592_v61, %v591_v9  ;;  %v596_v21 = vrot.slane %v591_v9, 4  ;;  %s5017_s25 = scalar_lea.vmem %s5816_s2, %s3900_s22  ;;  %s5022_s12 = scalar_lea.vmem %s5822_s8, %s3903_s23 }
  0x2e   : > { %732 = vst [vmem:[#allocation2 + $0x14] sm:$0x1] %v731_v14  ;;  %v603_v23 = vor.u32 %v601_v63, %v600_v10  ;;  %v604_v24 = vrot.slane %v600_v10, 4  ;;  %v608_v25 = vrot.slane %v606_v11, 7  ;;  %v615_v26 = vshrl.u32 %v551_v7, 16  ;;  %p3904_p11 = scmp.le.s32.totalorder %s4782_s27, 0 }
  0x2f   : > { %v734_v28 = vsel %vm4973_vm7, %v586_v18, %v733_v5  ;;  %v595_v29 = vsel %vm4980_vm8, %v587_v19, %v594_v20  ;;  %v738_v30 = vsel %vm4882_vm2, %v596_v21, %v737_v15  ;;  %v618_v32 = vshll.u32 %v551_v7, 16  ;;  %v554_v38 = vld [vmem:[%s4953_s24 + $0x24] sm:$0xf]  ;;  %v555_v39 = vld [vmem:[%s4953_s24 + $0x28] sm:$0xf] }
  0x30   : > { %735 = vst [vmem:[#allocation2 + $0x18] sm:$0xf] %v734_v28  ;;  %736 = vst [vmem:[#allocation2 + $0x1c] sm:$0xf] %v595_v29  ;;  %v741_v34 = vsel %vm4973_vm7, %v603_v23, %v740_v16  ;;  %v611_v35 = vor.u32 %v609_v17, %v608_v25  ;;  %v613_v36 = vrot.slane %v608_v25, 4  ;;  %v617_v37 = vrot.slane %v615_v26, 7 }
  0x31   : > { %739 = vst [vmem:[#allocation2 + $0x20] sm:$0x1] %v738_v30  ;;  %742 = vst [vmem:[#allocation2 + $0x24] sm:$0xf] %v741_v34  ;;  %v623_v40 = vshrl.u32 %v552_v22, 16  ;;  %v626_v41 = vshll.u32 %v552_v22, 16 }
  0x32   : > { %v632_v42 = vshrl.u32 %v553_v27, 16  ;;  %v635_v43 = vshll.u32 %v553_v27, 16  ;;  %v556_v44 = vld [vmem:[%s4953_s24 + $0x2c] sm:$0xf]  ;;  %v612_v45 = vsel %vm4980_vm8, %v604_v24, %v611_v35  ;;  %v745_v46 = vsel %vm4882_vm2, %v613_v36, %v744_v31  ;;  %v751_v49 = vld [vmem:[#allocation2 + $0x38] sm:$0x1] }
  0x33   : > { %v620_v47 = vor.u32 %v618_v32, %v617_v37  ;;  %v621_v48 = vrot.slane %v617_v37, 4  ;;  %743 = vst [vmem:[#allocation2 + $0x28] sm:$0xf] %v612_v45  ;;  %746 = vst [vmem:[#allocation2 + $0x2c] sm:$0x1] %v745_v46  ;;  %v625_v50 = vrot.slane %v623_v40, 7 }
  0x34   : > { %v634_v51 = vrot.slane %v632_v42, 7  ;;  %v754_v52 = vld [vmem:[#allocation2 + $0x3c] sm:$0xf]  ;;  %v640_v53 = vshrl.u32 %v554_v38, 16  ;;  %v643_v55 = vshll.u32 %v554_v38, 16  ;;  %v649_v57 = vshrl.u32 %v555_v39, 16 }
  0x35   : > { %v748_v56 = vsel %vm4973_vm7, %v620_v47, %v747_v33  ;;  %v652_v58 = vshll.u32 %v555_v39, 16  ;;  %v657_v60 = vshrl.u32 %v556_v44, 16  ;;  %v557_v61 = vld [vmem:[%s4953_s24 + $0x30] sm:$0xf]  ;;  %v628_v62 = vor.u32 %v626_v41, %v625_v50  ;;  %v758_v4 = vld [vmem:[#allocation2 + $0x44] sm:$0x1] }
  0x36   : > { %749 = vst [vmem:[#allocation2 + $0x30] sm:$0xf] %v748_v56  ;;  %v630_v63 = vrot.slane %v625_v50, 4  ;;  %v637_v0 = vor.u32 %v635_v43, %v634_v51  ;;  %v638_v1 = vrot.slane %v634_v51, 4  ;;  %v642_v3 = vrot.slane %v640_v53, 7 }
  0x37   : > { %v651_v5 = vrot.slane %v649_v57, 7  ;;  %v659_v6 = vrot.slane %v657_v60, 7  ;;  %v660_v7 = vshll.u32 %v556_v44, 16  ;;  %v629_v8 = vsel %vm4980_vm8, %v621_v48, %v628_v62  ;;  %v761_v11 = vld [vmem:[#allocation2 + $0x48] sm:$0xf] }
  0x38   : > { %v752_v9 = vsel %vm4882_vm2, %v630_v63, %v751_v49  ;;  %v755_v10 = vsel %vm4973_vm7, %v637_v0, %v754_v52  ;;  %v666_v12 = vshrl.u32 %v557_v61, 16  ;;  %v558_v13 = vld [vmem:[%s4953_s24 + $0x34] sm:$0xf]  ;;  %750 = vst [vmem:[#allocation2 + $0x34] sm:$0xf] %v629_v8  ;;  %v645_v14 = vor.u32 %v643_v55, %v642_v3 }
  0x39   : > { %753 = vst [vmem:[#allocation2 + $0x38] sm:$0x1] %v752_v9  ;;  %756 = vst [vmem:[#allocation2 + $0x3c] sm:$0xf] %v755_v10  ;;  %v647_v15 = vrot.slane %v642_v3, 4  ;;  %v654_v16 = vor.u32 %v652_v58, %v651_v5  ;;  %v655_v17 = vrot.slane %v651_v5, 4  ;;  %v662_v19 = vor.u32 %v660_v7, %v659_v6 }
  0x3a   : > { %v765_v18 = vld [vmem:[#allocation2 + $0x50] sm:$0x1]  ;;  %v664_v20 = vrot.slane %v659_v6, 4  ;;  %v668_v21 = vrot.slane %v666_v12, 7  ;;  %v669_v22 = vshll.u32 %v557_v61, 16  ;;  %v646_v24 = vsel %vm4980_vm8, %v638_v1, %v645_v14 }
  0x3b   : > { %v559_v23 = vld [vmem:[%s4953_s24 + $0x38] sm:$0xf]  ;;  %v759_v25 = vsel %vm4882_vm2, %v647_v15, %v758_v4  ;;  %v762_v26 = vsel %vm4973_vm7, %v654_v16, %v761_v11  ;;  %v768_v27 = vld [vmem:[#allocation2 + $0x54] sm:$0xf]  ;;  %v674_v28 = vshrl.u32 %v558_v13, 16  ;;  %v663_v30 = vsel %vm4980_vm8, %v655_v17, %v662_v19 }
  0x3c   : > { %v560_v29 = vld [vmem:[%s4953_s24 + $0x3c] sm:$0xf]  ;;  %757 = vst [vmem:[#allocation2 + $0x40] sm:$0xf] %v646_v24  ;;  %760 = vst [vmem:[#allocation2 + $0x44] sm:$0x1] %v759_v25  ;;  %v766_v31 = vsel %vm4882_vm2, %v664_v20, %v765_v18  ;;  %v671_v32 = vor.u32 %v669_v22, %v668_v21 }
  0x3d   : > { %763 = vst [vmem:[#allocation2 + $0x48] sm:$0xf] %v762_v26  ;;  %v672_v33 = vrot.slane %v668_v21, 4  ;;  %764 = vst [vmem:[#allocation2 + $0x4c] sm:$0xf] %v663_v30  ;;  %v676_v34 = vrot.slane %v674_v28, 7 }
  0x3e   : > { %767 = vst [vmem:[#allocation2 + $0x50] sm:$0x1] %v766_v31  ;;  %v677_v35 = vshll.u32 %v558_v13, 16  ;;  %v683_v36 = vshrl.u32 %v559_v23, 16  ;;  %v686_v37 = vshll.u32 %v559_v23, 16  ;;  %v769_v38 = vsel %vm4973_vm7, %v671_v32, %v768_v27 }
  0x3f   : > { %v772_v39 = vld [vmem:[#allocation2 + $0x5c] sm:$0x1]  ;;  %v691_v40 = vshrl.u32 %v560_v29, 16  ;;  %v694_v41 = vshll.u32 %v560_v29, 16  ;;  %770 = vst [vmem:[#allocation2 + $0x54] sm:$0xf] %v769_v38 }
  0x40   : > { %v679_v42 = vor.u32 %v677_v35, %v676_v34  ;;  %v681_v43 = vrot.slane %v676_v34, 4  ;;  %v685_v44 = vrot.slane %v683_v36, 7  ;;  %v775_v45 = vld [vmem:[#allocation2 + $0x60] sm:$0xf]  ;;  %v779_v51 = vld [vmem:[#allocation2 + $0x68] sm:$0x1] }
  0x41   : > { %v693_v46 = vrot.slane %v691_v40, 7  ;;  %785 = sbr.rel (%p3904_p11) target bundleno = 76 (0x4c), region = 56  ;;  %v786_v58 = vld [vmem:[%s4987_s17] sm:$0xf] (!%p3904_p11)  ;;  %v787_v60 = vld [vmem:[%s4987_s17 + $0x4] sm:$0xf] (!%p3904_p11) }
  0x42   : > { %v680_v47 = vsel %vm4980_vm8, %v672_v33, %v679_v42  ;;  %v773_v48 = vsel %vm4882_vm2, %v681_v43, %v772_v39  ;;  %v688_v49 = vor.u32 %v686_v37, %v685_v44  ;;  %v689_v50 = vrot.slane %v685_v44, 4  ;;  %v808_v4 = vld [vmem:[#allocation2] sm:$0xf] (!%p3904_p11)  ;;  %v812_v5 = vld [vmem:[#allocation2 + $0x8] sm:$0x1] (!%p3904_p11) }
  0x43   : > { %771 = vst [vmem:[#allocation2 + $0x58] sm:$0xf] %v680_v47  ;;  %774 = vst [vmem:[#allocation2 + $0x5c] sm:$0x1] %v773_v48  ;;  %v696_v52 = vor.u32 %v694_v41, %v693_v46  ;;  %v698_v53 = vrot.slane %v693_v46, 4  ;;  %v789_v61 = vshrl.u32 (!%p3904_p11), %v786_v58, 16 }
  0x44   : > { %v776_v55 = vsel %vm4973_vm7, %v688_v49, %v775_v45  ;;  %v792_v62 = vshll.u32 (!%p3904_p11), %v786_v58, 16  ;;  %v797_v63 = vshrl.u32 (!%p3904_p11), %v787_v60, 16  ;;  %v800_v0 = vshll.u32 (!%p3904_p11), %v787_v60, 16 }
  0x45   : > { %777 = vst [vmem:[#allocation2 + $0x60] sm:$0xf] %v776_v55  ;;  %v697_v56 = vsel %vm4980_vm8, %v689_v50, %v696_v52  ;;  %v780_v57 = vsel %vm4882_vm2, %v698_v53, %v779_v51  ;;  %v791_v1 = vrot.slane (!%p3904_p11), %v789_v61, 7 }
  0x46   : > { %778 = vst [vmem:[#allocation2 + $0x64] sm:$0xf] %v697_v56  ;;  %781 = vst [vmem:[#allocation2 + $0x68] sm:$0x1] %v780_v57  ;;  %v799_v3 = vrot.slane (!%p3904_p11), %v797_v63, 7 }
  0x47   : > { %v794_v6 = vor.u32 (!%p3904_p11), %v792_v62, %v791_v1  ;;  %v795_v7 = vrot.slane (!%p3904_p11), %v791_v1, 4 }
  0x48   : > { %v802_v8 = vor.u32 %v800_v0, %v799_v3  ;;  %v804_v9 = vrot.slane %v799_v3, 4 }
  0x49   : > { %v809_v10 = vsel %vm4973_vm7, %v794_v6, %v808_v4 }
  0x4a   : > { %v803_v11 = vsel %vm4980_vm8, %v795_v7, %v802_v8  ;;  %v813_v12 = vsel %vm4882_vm2, %v804_v9, %v812_v5  ;;  %810 = vst [vmem:[#allocation2] sm:$0xf] %v809_v10 }
  0x4b   : > { %811 = vst [vmem:[#allocation2 + $0x4] sm:$0xf] %v803_v11  ;;  %814 = vst [vmem:[#allocation2 + $0x8] sm:$0x1] %v813_v12 }
  0x4c PF: > { %p3905_p12 = scmp.ge.s32.totalorder %s4782_s27, 1 }
  0x4d   : > { %v819_v13 = vld [vmem:[%s5017_s25] sm:$0xf] (!%p3905_p12)  ;;  %v820_v14 = vld [vmem:[%s5017_s25 + $0x4] sm:$0xf] (!%p3905_p12)  ;;  %v841_v21 = vld [vmem:[#allocation2 + $0x6c] sm:$0xf] (!%p3905_p12) }
  0x4e   : > { %818 = sbr.rel (%p3905_p12) target bundleno = 87 (0x57), region = 60  ;;  %v822_v15 = vshrl.u32 (!%p3905_p12), %v819_v13, 16  ;;  %v825_v16 = vshll.u32 (!%p3905_p12), %v819_v13, 16  ;;  %v830_v17 = vshrl.u32 (!%p3905_p12), %v820_v14, 16  ;;  %v833_v18 = vshll.u32 (!%p3905_p12), %v820_v14, 16 }
  0x4f   : > { %v845_v22 = vld [vmem:[#allocation2 + $0x74] sm:$0x1] (!%p3905_p12) }
  0x50   : > { %v824_v19 = vrot.slane (!%p3905_p12), %v822_v15, 7  ;;  %v832_v20 = vrot.slane (!%p3905_p12), %v830_v17, 7 }
  0x52   : > { %v827_v23 = vor.u32 (!%p3905_p12), %v825_v16, %v824_v19  ;;  %v828_v24 = vrot.slane (!%p3905_p12), %v824_v19, 4  ;;  %v835_v25 = vor.u32 (!%p3905_p12), %v833_v18, %v832_v20  ;;  %v837_v26 = vrot.slane (!%p3905_p12), %v832_v20, 4 }
  0x54   : > { %v842_v27 = vsel (!%p3905_p12), %vm4973_vm7, %v827_v23, %v841_v21  ;;  %v836_v28 = vsel (!%p3905_p12), %vm4980_vm8, %v828_v24, %v835_v25  ;;  %v846_v29 = vsel (!%p3905_p12), %vm4882_vm2, %v837_v26, %v845_v22 }
  0x55   : > { %843 = vst [vmem:[#allocation2 + $0x6c] sm:$0xf] %v842_v27  ;;  %844 = vst [vmem:[#allocation2 + $0x70] sm:$0xf] %v836_v28 }
  0x56   : > { %847 = vst [vmem:[#allocation2 + $0x74] sm:$0x1] %v846_v29 }
  0x57 PF: > { %v4656_v30 = vld [vmem:[%s5817_s3 + $0x40] sm:$0xff]   ;;  %v4660_v59 = vld [vmem:[%s5817_s3 + $0x48] sm:$0xff]   ;;  %v4664_v35 = vld [vmem:[%s5817_s3 + $0x50] sm:$0xff]   ;;  %vm1436_vm9 = vcmask 1042432   ;;  %vm1437_vm10 = vcmask 1046532  }
  0x58   : > { %v4657_v31 = vld [vmem:[%s5817_s3 + $0xc0] sm:$0xff]   ;;  %4263 = vmatprep.subr.bf16.mxu0 %v4656_v30  ;;  %v4661_v32 = vld [vmem:[%s5817_s3 + $0xc8] sm:$0xff]   ;;  %v4665_v36 = vld [vmem:[%s5817_s3 + $0xd0] sm:$0xff]   ;;  %vm872_vm11 = vsmask.f32 3328 }
  0x59   : > { %v4658_v54 = vld [vmem:[%s5817_s3] sm:$0xff]   ;;  %4327 = vmatprep.subr.bf16.mxu1 %v4657_v31  ;;  %v4662_v33 = vld [vmem:[%s5817_s3 + $0x8] sm:$0xff]   ;;  %v4666_v37 = vld [vmem:[%s5817_s3 + $0x10] sm:$0xff]   ;;  %vm873_vm12 = vsmask.f32 7440 }
  0x5a   : > { %v4659_v2 = vld [vmem:[%s5817_s3 + $0x80] sm:$0xff]   ;;  %4264 = vmatpush3.bf16.msra.mxu0 %v4658_v54  ;;  %v4663_v34 = vld [vmem:[%s5817_s3 + $0x88] sm:$0xff]   ;;  %v4667_v38 = vld [vmem:[%s5817_s3 + $0x90] sm:$0xff]  }
  0x5b   : > { %4328 = vmatpush3.bf16.msra.mxu1 %v4659_v2  ;;  %4265 = vmatprep.subr.bf16.mxu0 %v4660_v59  ;;  %v4668_v39 = vld [vmem:[%s5817_s3 + $0x58] sm:$0xff]   ;;  %v4672_v43 = vld [vmem:[%s5817_s3 + $0x60] sm:$0xff]   ;;  %v4676_v47 = vld [vmem:[%s5817_s3 + $0x68] sm:$0xff]  }
  0x5c   : > { %4329 = vmatprep.subr.bf16.mxu1 %v4661_v32  ;;  %v4669_v40 = vld [vmem:[%s5817_s3 + $0xd8] sm:$0xff]   ;;  %v4673_v44 = vld [vmem:[%s5817_s3 + $0xe0] sm:$0xff]   ;;  %v4677_v48 = vld [vmem:[%s5817_s3 + $0xe8] sm:$0xff]  }
  0x5d   : > { %v4670_v41 = vld [vmem:[%s5817_s3 + $0x18] sm:$0xff]   ;;  %v4674_v45 = vld [vmem:[%s5817_s3 + $0x20] sm:$0xff]   ;;  %v4678_v49 = vld [vmem:[%s5817_s3 + $0x28] sm:$0xff]  }
  0x5e   : > { %4266 = vmatpush3.bf16.msra.mxu0 %v4662_v33  ;;  %v4671_v42 = vld [vmem:[%s5817_s3 + $0x98] sm:$0xff]   ;;  %v4675_v46 = vld [vmem:[%s5817_s3 + $0xa0] sm:$0xff]   ;;  %v4679_v50 = vld [vmem:[%s5817_s3 + $0xa8] sm:$0xff]  }
  0x5f   : > { %4330 = vmatpush3.bf16.msra.mxu1 %v4663_v34  ;;  %4267 = vmatprep.subr.bf16.mxu0 %v4664_v35  ;;  %v4680_v51 = vld [vmem:[%s5817_s3 + $0x70] sm:$0xff]   ;;  %v4684_v56 = vld [vmem:[%s5817_s3 + $0x78] sm:$0xff]   ;;  %v5181_v61 = vld [vmem:[#allocation2] sm:$0xf] }
  0x60   : > { %4331 = vmatprep.subr.bf16.mxu1 %v4665_v36  ;;  %v4681_v52 = vld [vmem:[%s5817_s3 + $0xf0] sm:$0xff]   ;;  %v4685_v57 = vld [vmem:[%s5817_s3 + $0xf8] sm:$0xff]   ;;  %v5183_v62 = vld [vmem:[#allocation2 + $0x4] sm:$0xf]  ;;  %v876_v0 = vshrl.u32 %v5181_v61, 16  ;;  %v879_v1 = vshll.u32 %v5181_v61, 16 }
  0x61   : > { %v4682_v53 = vld [vmem:[%s5817_s3 + $0x30] sm:$0xff]   ;;  %v4686_v58 = vld [vmem:[%s5817_s3 + $0x38] sm:$0xff]   ;;  %v864_v63 = vld [vmem:[#allocation2 + $0x8] sm:$0x1]  ;;  %v885_v3 = vshll.u32 %v5183_v62, 16  ;;  %v889_v4 = vshrl.u32 %v5183_v62, 16  ;;  %v3906_v28 = vcombine.low %v5181_v61, %v5183_v62 }
  0x62   : > { %4268 = vmatpush3.bf16.msra.mxu0 %v4666_v37  ;;  %v4683_v55 = vld [vmem:[%s5817_s3 + $0xb0] sm:$0xff]   ;;  %v4687_v60 = vld [vmem:[%s5817_s3 + $0xb8] sm:$0xff]   ;;  %v895_v5 = vshll.u32 %v864_v63, 16  ;;  %v878_v7 = vrot.slane %v876_v0, 4  ;;  %v881_v8 = vrot.slane %v879_v1, 5  ;;  %vm5191_vm13 = vmor %vm1436_vm9, %vm1437_vm10 }
  0x63   : > { %4332 = vmatpush3.bf16.msra.mxu1 %v4667_v38  ;;  %4269 = vmatprep.subr.bf16.mxu0 %v4668_v39  ;;  %v4688_v6 = vld [vmem:[#allocation2 + $0xc] sm:$0xff]   ;;  %v1388_v9 = vld [vmem:[#allocation2] sm:$0xe]  ;;  %v887_v10 = vrot.slane %v885_v3, 5  ;;  %v891_v11 = vrot.slane %v889_v4, 4  ;;  %vm5200_vm14 = vmor %vm872_vm11, %vm873_vm12 }
  0x64   : > { %4333 = vmatprep.subr.bf16.mxu1 %v4669_v40  ;;  %1752 = vmatprep.mubr.bf16.mxu1 %v4688_v6  ;;  %v1389_v12 = vld [vmem:[#allocation2 + $0x4] sm:$0xf]  ;;  %v3938_v14 = vrot.slane %v1388_v9, 9  ;;  %v882_v15 = vor.u32 %v881_v8, %v878_v7  ;;  %v1390_v16 = vld [vmem:[#allocation2 + $0x8] sm:$0x1]  ;;  %v897_v21 = vrot.slane %v895_v5, 5 }
  0x65   : > { %v1441_v17 = vrot.slane %v1389_v12, 5  ;;  %v4690_v18 = vld [vmem:[%s5817_s3 + $0x140] sm:$0xff]   ;;  %v892_v20 = vor.u32 %v891_v11, %v887_v10  ;;  %v1444_v22 = vrot.slane %v1390_v16, 5  ;;  %v5206_v26 = vld [vmem:[#allocation2 + $0xc] sm:$0xf]  ;;  %v4692_v37 = vld [vmem:[#allocation2 + $0x18] sm:$0xff]  }
  0x66   : > { %4270 = vmatpush3.bf16.msra.mxu0 %v4670_v41  ;;  %v883_v23 = vrot.slane %v882_v15, 4  ;;  %v5210_v29 = vld [vmem:[#allocation2 + $0x10] sm:$0xf]  ;;  %v865_v30 = vld [vmem:[#allocation2 + $0x14] sm:$0x1]  ;;  %v900_v31 = vshrl.u32 %v5206_v26, 16 }
  0x67   : > { %4334 = vmatpush3.bf16.msra.mxu1 %v4671_v42  ;;  %4271 = vmatprep.subr.bf16.mxu0 %v4672_v43  ;;  %v1442_v24 = vsel %vm5191_vm13, %v3938_v14, %v1441_v17  ;;  %v1443_v25 = vrot.slane %v1441_v17, 4  ;;  %v893_v27 = vrot.slane %v892_v20, 4  ;;  %v903_v59 = vshll.u32 %v5206_v26, 16  ;;  %v1391_v38 = vld [vmem:[#allocation2 + $0xc] sm:$0xe]  ;;  %v4691_v40 = vld [vmem:[%s5817_s3 + $0x100] sm:$0xff]  }
  0x68   : > { %4335 = vmatprep.subr.bf16.mxu1 %v4673_v44  ;;  %v888_v54 = vsel %vm5200_vm14, %v883_v23, %v887_v10  ;;  %v909_v32 = vshll.u32 %v5210_v29, 16  ;;  %v902_v35 = vrot.slane %v900_v31, 4  ;;  %v913_v36 = vshrl.u32 %v5210_v29, 16  ;;  %v1392_v44 = vld [vmem:[#allocation2 + $0x10] sm:$0xf]  ;;  %v4696_v63 = vld [vmem:[#allocation2 + $0x24] sm:$0xff]  }
  0x69   : > { %v1445_v2 = vsel %vm5191_vm13, %v1443_v25, %v1444_v22  ;;  %v898_v33 = vsel %vm5200_vm14, %v893_v27, %v897_v21  ;;  %v905_v41 = vrot.slane %v903_v59, 5  ;;  %v919_v43 = vshll.u32 %v865_v30, 16  ;;  %v5235_v61 = vld [vmem:[#allocation2 + $0x18] sm:$0xf]  ;;  %v5237_v62 = vld [vmem:[#allocation2 + $0x1c] sm:$0xf] }
  0x6a   : > { %4272 = vmatpush3.bf16.msra.mxu0 %v4674_v45  ;;  %v3946_v34 = vcombine.low %v1442_v24, %v1445_v2  ;;  %v3914_v39 = vcombine.low %v888_v54, %v898_v33  ;;  %v911_v42 = vrot.slane %v909_v32, 5  ;;  %v915_v45 = vrot.slane %v913_v36, 4  ;;  %v866_v3 = vld [vmem:[#allocation2 + $0x20] sm:$0x1]  ;;  %v4698_v6 = vld [vmem:[%s5817_s3 + $0x150] sm:$0xff]   ;;  %v4703_v31 = vld [vmem:[%s5817_s3 + $0x118] sm:$0xff]  }
  0x6b   : > { %4336 = vmatpush3.bf16.msra.mxu1 %v4675_v46  ;;  %4273 = vmatprep.subr.bf16.mxu0 %v4676_v47  ;;  %v1393_v46 = vld [vmem:[#allocation2 + $0x14] sm:$0x1]  ;;  %v3939_v47 = vrot.slane %v1391_v38, 9  ;;  %v924_v4 = vshrl.u32 %v5235_v61, 16  ;;  %v927_v5 = vshll.u32 %v5235_v61, 16  ;;  %v933_v9 = vshll.u32 %v5237_v62, 16 }
  0x6c   : > { %4337 = vmatprep.subr.bf16.mxu1 %v4677_v48  ;;  %v1448_v48 = vrot.slane %v1392_v44, 5  ;;  %1307 = vmatprep.mubr.bf16.mxu0 %v3914_v39  ;;  %v937_v10 = vshrl.u32 %v5237_v62, 16  ;;  %v943_v15 = vshll.u32 %v866_v3, 16  ;;  %v1394_v16 = vld [vmem:[#allocation2 + $0x18] sm:$0xe]  ;;  %v4699_v17 = vld [vmem:[%s5817_s3 + $0x110] sm:$0xff]  }
  0x6d   : > { %v926_v12 = vrot.slane %v924_v4, 4  ;;  %v929_v14 = vrot.slane %v927_v5, 5  ;;  %v935_v20 = vrot.slane %v933_v9, 5  ;;  %v1395_v22 = vld [vmem:[#allocation2 + $0x1c] sm:$0xf]  ;;  %v4704_v54 = vld [vmem:[%s5817_s3 + $0x1c0] sm:$0xff]  }
  0x6e   : > { %4274 = vmatpush3.bf16.msra.mxu0 %v4678_v49  ;;  %v4694_v49 = vld [vmem:[%s5817_s3 + $0x148] sm:$0xff]   ;;  %v939_v21 = vrot.slane %v937_v10, 4  ;;  %v1396_v23 = vld [vmem:[#allocation2 + $0x20] sm:$0x1]  ;;  %v945_v25 = vrot.slane %v943_v15, 5  ;;  %v1455_v27 = vrot.slane %v1395_v22, 5 }
  0x6f   : > { %4338 = vmatpush3.bf16.msra.mxu1 %v4679_v50  ;;  %4275 = vmatprep.subr.bf16.mxu0 %v4680_v51  ;;  %v906_v50 = vor.u32 %v905_v41, %v902_v35  ;;  %v1451_v51 = vrot.slane %v1393_v46, 5  ;;  %v930_v24 = vor.u32 %v929_v14, %v926_v12  ;;  %v1458_v30 = vrot.slane %v1396_v23, 5  ;;  %v5266_v33 = vld [vmem:[#allocation2 + $0x24] sm:$0xf]  ;;  %v5270_v36 = vld [vmem:[#allocation2 + $0x28] sm:$0xf] }
  0x70   : > { %4339 = vmatprep.subr.bf16.mxu1 %v4681_v52  ;;  %v4695_v52 = vld [vmem:[%s5817_s3 + $0x108] sm:$0xff]   ;;  %v1457_v32 = vrot.slane %v1455_v27, 4  ;;  %v3908_v35 = vcombine.low %v5235_v61, %v5237_v62  ;;  %v948_v38 = vshrl.u32 %v5266_v33, 16  ;;  %v4700_v39 = vld [vmem:[#allocation2 + $0x30] sm:$0xff]   ;;  %v4708_v4 = vld [vmem:[%s5817_s3 + $0x160] sm:$0xff]  }
  0x71   : > { %v931_v2 = vrot.slane %v930_v24, 4  ;;  %v5295_v9 = vld [vmem:[#allocation2 + $0x30] sm:$0xf]  ;;  %v4706_v10 = vld [vmem:[#allocation2 + $0x3c] sm:$0xff]   ;;  %v5302_v15 = vld [vmem:[#allocation2 + $0x34] sm:$0xf] }
  0x72   : > { %4276 = vmatpush3.bf16.msra.mxu0 %v4682_v53  ;;  %v916_v53 = vor.u32 %v915_v45, %v911_v42  ;;  %v1459_v41 = vsel %vm5191_vm13, %v1457_v32, %v1458_v30  ;;  %v950_v46 = vrot.slane %v948_v38, 4  ;;  %v985_v22 = vshrl.u32 %v5302_v15, 16  ;;  %v4711_v24 = vld [vmem:[%s5817_s3 + $0x188] sm:$0xff]   ;;  %v3103_v19 = vld [vmem:[#allocation2 + $0x3c] sm:$0xe] }
  0x73   : > { %4340 = vmatpush3.bf16.msra.mxu1 %v4683_v55  ;;  %4277 = vmatprep.subr.bf16.mxu0 %v4684_v56  ;;  %v921_v55 = vrot.slane %v919_v43, 5  ;;  %v1449_v56 = vsel %vm5191_vm13, %v3939_v47, %v1448_v48  ;;  %v957_v43 = vshll.u32 %v5270_v36, 16  ;;  %v961_v47 = vshrl.u32 %v5270_v36, 16  ;;  %v4755_v13 = vld [vmem:[%s5820_s6 + $0x18] sm:$0xff]  }
  0x74   : > { %4341 = vmatprep.subr.bf16.mxu1 %v4685_v57  ;;  %v1450_v57 = vrot.slane %v1448_v48, 4  ;;  %v917_v0 = vrot.slane %v916_v53, 4  ;;  %v1397_v48 = vld [vmem:[#allocation2 + $0x24] sm:$0xe] }
  0x76   : > { %4278 = vmatpush3.bf16.msra.mxu0 %v4686_v58  ;;  %v907_v58 = vrot.slane %v906_v50, 4  ;;  %v1452_v1 = vsel %vm5191_vm13, %v1450_v57, %v1451_v51  ;;  %v922_v11 = vsel %vm5200_vm14, %v917_v0, %v921_v55  ;;  %v1399_v55 = vld [vmem:[#allocation2 + $0x2c] sm:$0x1]  ;;  %v963_v57 = vrot.slane %v961_v47, 4  ;;  %v5329_v47 = vld [vmem:[#allocation2 + $0x3c] sm:$0xf] }
  0x77   : > { %4342 = vmatpush3.bf16.msra.mxu1 %v4687_v60  ;;  %4391 = vmatprep.subr.bf16.mxu0 %v4690_v18  ;;  %v3907_v60 = vcombine.low %v5206_v26, %v5210_v29  ;;  %v3947_v8 = vcombine.low %v1449_v56, %v1452_v1  ;;  %v3940_v26 = vrot.slane %v1394_v16, 9  ;;  %v940_v29 = vor.u32 %v939_v21, %v935_v20  ;;  %v4705_v56 = vld [vmem:[%s5817_s3 + $0x180] sm:$0xff]   ;;  %v868_v16 = vld [vmem:[#allocation2 + $0x38] sm:$0x1] }
  0x78   : > { %v912_v7 = vsel %vm5200_vm14, %v907_v58, %v911_v42  ;;  %4455 = vmatprep.subr.bf16.mxu1 %v4704_v54  ;;  %v951_v42 = vshll.u32 %v5266_v33, 16  ;;  %v3941_v58 = vrot.slane %v1397_v48, 9  ;;  %v981_v21 = vshll.u32 %v5302_v15, 16  ;;  %v1401_v54 = vld [vmem:[#allocation2 + $0x34] sm:$0xf] }
  0x79   : > { %1308 = vmatmul.mubr.bf16.vlgmr.msra.gmra.mrb[0].mxu0 %v3906_v28  ;;  %v3915_v18 = vcombine.low %v912_v7, %v922_v11  ;;  %v4702_v28 = vld [vmem:[%s5817_s3 + $0x158] sm:$0xff]   ;;  %v1456_v59 = vsel %vm5191_vm13, %v3940_v26, %v1455_v27  ;;  %v4710_v11 = vld [vmem:[%s5817_s3 + $0x1c8] sm:$0xff]   ;;  %v991_v23 = vshll.u32 %v868_v16, 16  ;;  %v3909_v26 = vcombine.low %v5266_v33, %v5270_v36  ;;  %v859_v48 = vld [vmem:[#allocation2 + $0x40] sm:$0xf] }
  0x7a   : > { %1753 = vmatmul.mubr.bf16.vlgmr.msra.gmra.mrb[0].mxu1 %v3946_v34  ;;  %4392 = vmatpush3.bf16.msra.mxu0 %v4691_v40  ;;  %v941_v34 = vrot.slane %v940_v29, 4  ;;  %v936_v40 = vsel %vm5200_vm14, %v931_v2, %v935_v20  ;;  %v3948_v45 = vcombine.low %v1456_v59, %v1459_v41  ;;  %v953_v51 = vrot.slane %v951_v42, 5  ;;  %v1400_v29 = vld [vmem:[#allocation2 + $0x30] sm:$0xe]  ;;  %v4714_v33 = vld [vmem:[%s5817_s3 + $0x168] sm:$0xff]  }
  0x7b   : > { %1760 = vmatprep.mubr.bf16.mxu1 %v4692_v37  ;;  %4393 = vmatprep.subr.bf16.mxu0 %v4694_v49  ;;  %v867_v37 = vld [vmem:[#allocation2 + $0x2c] sm:$0x1]  ;;  %v1398_v49 = vld [vmem:[#allocation2 + $0x28] sm:$0xf]  ;;  %v983_v30 = vrot.slane %v981_v21, 5  ;;  %v3942_v2 = vrot.slane %v1400_v29, 9 }
  0x7c   : > { %1315 = vmatprep.mubr.bf16.mxu0 %v3915_v18  ;;  %v946_v44 = vsel %vm5200_vm14, %v941_v34, %v945_v25  ;;  %v967_v53 = vshll.u32 %v867_v37, 16  ;;  %v954_v61 = vor.u32 %v953_v51, %v950_v46  ;;  %4456 = vmatpush3.bf16.msra.mxu1 %v4705_v56  ;;  %v975_v18 = vshll.u32 %v5295_v9, 16  ;;  %v1402_v34 = vld [vmem:[#allocation2 + $0x38] sm:$0x1]  ;;  %v4712_v42 = vld [vmem:[#allocation2 + $0x48] sm:$0xff]   ;;  %v4717_v16 = vld [vmem:[%s5817_s3 + $0x190] sm:$0xff]  }
  0x7d   : > { %v3916_v50 = vcombine.low %v936_v40, %v946_v44  ;;  %4457 = vmatprep.subr.bf16.mxu1 %v4710_v11  ;;  %v993_v32 = vrot.slane %v991_v23, 5  ;;  %v1472_v38 = vrot.slane %v1402_v34, 5  ;;  %v869_v51 = vld [vmem:[#allocation2 + $0x44] sm:$0x1]  ;;  %v1005_v56 = vshll.u32 %v859_v48, 16  ;;  %v4718_v21 = vld [vmem:[%s5817_s3 + $0x1d8] sm:$0xff]  }
  0x7e   : > { %4394 = vmatpush3.bf16.msra.mxu0 %v4695_v52  ;;  %v959_v52 = vrot.slane %v957_v43, 5  ;;  %v969_v62 = vrot.slane %v967_v53, 5  ;;  %v955_v5 = vrot.slane %v954_v61, 4  ;;  %v4715_v43 = vld [vmem:[%s5817_s3 + $0x128] sm:$0xff]   ;;  %v999_v53 = vshll.u32 %v5329_v47, 16 }
  0x7f   : > { %4395 = vmatprep.subr.bf16.mxu0 %v4698_v6  ;;  %v4709_v6 = vld [vmem:[%s5817_s3 + $0x120] sm:$0xff]  }
  0x80   : > { %v964_v0 = vor.u32 %v963_v57, %v959_v52  ;;  %v960_v12 = vsel %vm5200_vm14, %v955_v5, %v959_v52  ;;  %4458 = vmatpush3.bf16.msra.mxu1 %v4711_v24  ;;  %v996_v52 = vshrl.u32 %v5329_v47, 16  ;;  %v1009_v57 = vshrl.u32 %v859_v48, 16  ;;  %v1405_v5 = vld [vmem:[#allocation2 + $0x44] sm:$0x1] }
  0x81   : > { %1316 = vmatmul.mubr.bf16.gmra.mrb[4].mxu0 %v3907_v60  ;;  %v1462_v60 = vrot.slane %v1398_v49, 5 }
  0x82   : > { %1761 = vmatmul.mubr.bf16.gmra.mrb[4].mxu1 %v3947_v8  ;;  %4396 = vmatpush3.bf16.msra.mxu0 %v4699_v17  ;;  %v965_v7 = vrot.slane %v964_v0, 4  ;;  %v972_v17 = vshrl.u32 %v5295_v9, 16  ;;  %v998_v61 = vrot.slane %v996_v52, 4  ;;  %v1404_v0 = vld [vmem:[#allocation2 + $0x40] sm:$0xf] }
  0x83   : > { %1768 = vmatprep.mubr.bf16.mxu1 %v4696_v63  ;;  %4397 = vmatprep.subr.bf16.mxu0 %v4702_v28  ;;  %v1465_v63 = vrot.slane %v1399_v55, 5  ;;  %v1463_v1 = vsel %vm5191_vm13, %v3941_v58, %v1462_v60  ;;  %v1464_v3 = vrot.slane %v1462_v60, 4  ;;  %v977_v28 = vrot.slane %v975_v18, 5  ;;  %v4716_v60 = vld [vmem:[%s5817_s3 + $0x1d0] sm:$0xff]   ;;  %v4724_v52 = vld [vmem:[%s5817_s3 + $0x1e0] sm:$0xff]  }
  0x84   : > { %1323 = vmatprep.mubr.bf16.mxu0 %v3916_v50  ;;  %v970_v20 = vsel %vm5200_vm14, %v965_v7, %v969_v62  ;;  %v974_v27 = vrot.slane %v972_v17, 4  ;;  %v1015_v58 = vshll.u32 %v869_v51, 16  ;;  %v1001_v62 = vrot.slane %v999_v53, 5  ;;  %4459 = vmatprep.subr.bf16.mxu1 %v4716_v60 }
  0x85   : > { %v1466_v8 = vsel %vm5191_vm13, %v1464_v3, %v1465_v63  ;;  %v3917_v25 = vcombine.low %v960_v12, %v970_v20  ;;  %v1403_v63 = vld [vmem:[#allocation2 + $0x3c] sm:$0xe]  ;;  %v1011_v3 = vrot.slane %v1009_v57, 4  ;;  %v3911_v18 = vcombine.low %v5329_v47, %v859_v48  ;;  %4460 = vmatpush3.bf16.msra.mxu1 %v4717_v16  ;;  %v4723_v47 = vld [vmem:[%s5817_s3 + $0x130] sm:$0xff]   ;;  %v4725_v57 = vld [vmem:[%s5817_s3 + $0x1a0] sm:$0xff]  }
  0x86   : > { %4398 = vmatpush3.bf16.msra.mxu0 %v4703_v31  ;;  %v3949_v14 = vcombine.low %v1463_v1, %v1466_v8  ;;  %v987_v31 = vrot.slane %v985_v22, 4  ;;  %v978_v59 = vor.u32 %v977_v28, %v974_v27  ;;  %v1007_v1 = vrot.slane %v1005_v56, 5  ;;  %v5351_v22 = vld [vmem:[#allocation2 + $0x48] sm:$0xf]  ;;  %4461 = vmatprep.subr.bf16.mxu1 %v4718_v21  ;;  %v1409_v16 = vld [vmem:[#allocation2 + $0x54] sm:$0xe] }
  0x87   : > { %4399 = vmatprep.subr.bf16.mxu0 %v4708_v4  ;;  %v1017_v4 = vrot.slane %v1015_v58, 5  ;;  %v1002_v7 = vor.u32 %v1001_v62, %v998_v61  ;;  %v1476_v8 = vrot.slane %v1404_v0, 5  ;;  %v1020_v27 = vshrl.u32 %v5351_v22, 16  ;;  %v4726_v61 = vld [vmem:[%s5817_s3 + $0x1e8] sm:$0xff]   ;;  %v862_v62 = vld [vmem:[#allocation2 + $0x54] sm:$0xf] }
  0x88   : > { %v988_v37 = vor.u32 %v987_v31, %v983_v30  ;;  %v979_v36 = vrot.slane %v978_v59, 4  ;;  %v1023_v28 = vshll.u32 %v5351_v22, 16  ;;  %v871_v0 = vld [vmem:[#allocation2 + $0x5c] sm:$0x1]  ;;  %v3945_v21 = vrot.slane %v1409_v16, 9 }
  0x89   : > { %1324 = vmatmul.mubr.bf16.gmra.mrb[8].mxu0 %v3908_v35  ;;  %v1469_v35 = vrot.slane %v1401_v54, 5  ;;  %v1003_v11 = vrot.slane %v1002_v7, 4  ;;  %v1022_v59 = vrot.slane %v1020_v27, 4  ;;  %v4727_v7 = vld [vmem:[#allocation2 + $0x60] sm:$0xff]   ;;  %v2082_v16 = vld [vmem:[#allocation2 + $0x18] sm:$0xe] }
  0x8a   : > { %1769 = vmatmul.mubr.bf16.gmra.mrb[8].mxu1 %v3948_v45  ;;  %4400 = vmatpush3.bf16.msra.mxu0 %v4709_v6  ;;  %v989_v41 = vrot.slane %v988_v37, 4  ;;  %v984_v44 = vsel %vm5200_vm14, %v979_v36, %v983_v30  ;;  %v3910_v45 = vcombine.low %v5295_v9, %v5302_v15  ;;  %v3943_v6 = vrot.slane %v1403_v63, 9  ;;  %v1406_v36 = vld [vmem:[#allocation2 + $0x48] sm:$0xe]  ;;  %v863_v63 = vld [vmem:[#allocation2 + $0x58] sm:$0xf] }
  0x8b   : > { %1776 = vmatprep.mubr.bf16.mxu1 %v4700_v39  ;;  %1331 = vmatprep.mubr.bf16.mxu0 %v3917_v25  ;;  %v1470_v39 = vsel %vm5191_vm13, %v3942_v2, %v1469_v35  ;;  %v1471_v40 = vrot.slane %v1469_v35, 4  ;;  %v1479_v9 = vrot.slane %v1405_v5, 5  ;;  %v1008_v17 = vsel %vm5200_vm14, %v1003_v11, %v1007_v1  ;;  %v861_v25 = vld [vmem:[#allocation2 + $0x4c] sm:$0xf]  ;;  %v4719_v2 = vld [vmem:[#allocation2 + $0x54] sm:$0xff]  }
  0x8c   : > { %4401 = vmatprep.subr.bf16.mxu0 %v4714_v33  ;;  %v994_v49 = vsel %vm5200_vm14, %v989_v41, %v993_v32  ;;  %v1477_v12 = vsel %vm5191_vm13, %v3943_v6, %v1476_v8  ;;  %v1029_v30 = vshll.u32 %v861_v25, 16  ;;  %v1033_v31 = vshrl.u32 %v861_v25, 16 }
  0x8d   : > { %v1473_v46 = vsel %vm5191_vm13, %v1471_v40, %v1472_v38  ;;  %v3918_v55 = vcombine.low %v984_v44, %v994_v49  ;;  %v1025_v32 = vrot.slane %v1023_v28, 5  ;;  %v4720_v38 = vld [vmem:[%s5817_s3 + $0x198] sm:$0xff]   ;;  %v1408_v40 = vld [vmem:[#allocation2 + $0x50] sm:$0x1]  ;;  %v1057_v5 = vshrl.u32 %v863_v63, 16 }
  0x8e   : > { %v3950_v50 = vcombine.low %v1470_v39, %v1473_v46  ;;  %4402 = vmatpush3.bf16.msra.mxu0 %v4715_v43  ;;  %v1031_v34 = vrot.slane %v1029_v30, 5  ;;  %v1035_v35 = vrot.slane %v1033_v31, 4  ;;  %v1407_v39 = vld [vmem:[#allocation2 + $0x4c] sm:$0xf]  ;;  %4462 = vmatpush3.bf16.msra.mxu1 %v4720_v38  ;;  %v1486_v44 = vrot.slane %v1408_v40, 5  ;;  %v4732_v31 = vld [vmem:[%s5817_s3 + $0x1f0] sm:$0xff]  }
  0x8f   : > { %v1026_v33 = vor.u32 %v1025_v32, %v1022_v59  ;;  %v1483_v43 = vrot.slane %v1407_v39, 5  ;;  %4463 = vmatprep.subr.bf16.mxu1 %v4724_v52  ;;  %v1063_v6 = vshll.u32 %v871_v0, 16  ;;  %v1059_v11 = vrot.slane %v1057_v5, 4  ;;  %v4733_v32 = vld [vmem:[%s5817_s3 + $0x1b0] sm:$0xff]   ;;  %v2081_v40 = vld [vmem:[#allocation2 + $0xc] sm:$0xe] }
  0x90   : > { %v1036_v41 = vor.u32 %v1035_v35, %v1031_v34  ;;  %v1866_v38 = vld [vmem:[#allocation2 + $0x10] sm:$0xf]  ;;  %v1865_v52 = vld [vmem:[#allocation2 + $0xc] sm:$0xf] }
  0x91   : > { %1332 = vmatmul.mubr.bf16.gmra.mrb[12].mxu0 %v3909_v26  ;;  %v870_v26 = vld [vmem:[#allocation2 + $0x50] sm:$0x1]  ;;  %v1027_v46 = vrot.slane %v1026_v33, 4  ;;  %v1867_v33 = vld [vmem:[#allocation2 + $0x14] sm:$0x1]  ;;  %v1903_v39 = vshrl.u32 %v1866_v38, 16 }
  0x92   : > { %1777 = vmatmul.mubr.bf16.gmra.mrb[12].mxu1 %v3949_v14  ;;  %1339 = vmatprep.mubr.bf16.mxu0 %v3918_v55  ;;  %v1478_v14 = vrot.slane %v1476_v8, 4  ;;  %v1039_v54 = vshll.u32 %v870_v26, 16  ;;  %v1037_v48 = vrot.slane %v1036_v41, 4  ;;  %v3912_v55 = vcombine.low %v5351_v22, %v861_v25  ;;  %v4731_v26 = vld [vmem:[%s5817_s3 + $0x138] sm:$0xff]  }
  0x93   : > { %1784 = vmatprep.mubr.bf16.mxu1 %v4706_v10  ;;  %v1012_v10 = vor.u32 %v1011_v3, %v1007_v1  ;;  %v1032_v51 = vsel %vm5200_vm14, %v1027_v46, %v1031_v34  ;;  %4464 = vmatpush3.bf16.msra.mxu1 %v4725_v57  ;;  %v1044_v1 = vshrl.u32 %v862_v62, 16  ;;  %v1047_v3 = vshll.u32 %v862_v62, 16  ;;  %v5421_v57 = vld [vmem:[#allocation2 + $0x18] sm:$0xf] }
  0x94   : > { %v1480_v20 = vsel %vm5191_vm13, %v1478_v14, %v1479_v9  ;;  %v1041_v37 = vrot.slane %v1039_v54, 5  ;;  %4465 = vmatprep.subr.bf16.mxu1 %v4726_v61  ;;  %v4728_v14 = vld [vmem:[%s5817_s3 + $0x1a8] sm:$0xff]   ;;  %v1909_v41 = vshll.u32 %v1867_v33, 16  ;;  %v1905_v46 = vrot.slane %v1903_v39, 4  ;;  %v2524_v61 = vld [vmem:[#allocation2 + $0x20] sm:$0x1] }
  0x95   : > { %v1013_v15 = vrot.slane %v1012_v10, 4  ;;  %v3951_v24 = vcombine.low %v1477_v12, %v1480_v20  ;;  %v1046_v8 = vrot.slane %v1044_v1, 4  ;;  %v1049_v9 = vrot.slane %v1047_v3, 5 }
  0x96   : > { %v1042_v53 = vsel %vm5200_vm14, %v1037_v48, %v1041_v37  ;;  %v1065_v12 = vrot.slane %v1063_v6, 5  ;;  %v4734_v37 = vld [vmem:[%s5817_s3 + $0x1f8] sm:$0xff]   ;;  %v5416_v48 = vld [vmem:[%s5818_s4] sm:$0xff]  }
  0x97   : > { %v1018_v23 = vsel %vm5200_vm14, %v1013_v15, %v1017_v4  ;;  %v3920_v58 = vcombine.low %v1032_v51, %v1042_v53  ;;  %v1053_v4 = vshll.u32 %v863_v63, 16  ;;  %v1050_v15 = vor.u32 %v1049_v9, %v1046_v8  ;;  %4466 = vmatpush3.bf16.msra.mxu1 %v4728_v14  ;;  %v1869_v9 = vld [vmem:[#allocation2 + $0x1c] sm:$0xf] }
  0x98   : > { %v3919_v29 = vcombine.low %v1008_v17, %v1018_v23  ;;  %v1410_v17 = vld [vmem:[#allocation2 + $0x58] sm:$0xf]  ;;  %4467 = vmatprep.subr.bf16.mxu1 %v4732_v31  ;;  %v2552_v14 = vshll.u32 %v2524_v61, 16  ;;  %v1873_v61 = vld [vmem:[#allocation2 + $0x2c] sm:$0x1] }
  0x99   : > { %1340 = vmatmul.mubr.bf16.gmra.mrb[16].mxu0 %v3910_v45  ;;  %v4722_v45 = vld [vmem:[%s5817_s3 + $0x170] sm:$0xff]   ;;  %v1055_v10 = vrot.slane %v1053_v4, 5  ;;  %v1490_v22 = vrot.slane %v1410_v17, 5  ;;  %v1051_v25 = vrot.slane %v1050_v15, 4  ;;  %v1868_v17 = vld [vmem:[#allocation2 + $0x18] sm:$0xf] }
  0x9a   : > { %1785 = vmatmul.mubr.bf16.gmra.mrb[16].mxu1 %v3950_v50  ;;  %1347 = vmatprep.mubr.bf16.mxu0 %v3919_v29  ;;  %v1485_v50 = vrot.slane %v1483_v43, 4 }
  0x9b   : > { %1792 = vmatprep.mubr.bf16.mxu1 %v4712_v42  ;;  %v3944_v42 = vrot.slane %v1406_v36, 9  ;;  %4403 = vmatprep.subr.bf16.mxu0 %v4722_v45  ;;  %v1060_v20 = vor.u32 %v1059_v11, %v1055_v10  ;;  %v1491_v28 = vsel %vm5191_vm13, %v3945_v21, %v1490_v22  ;;  %v1492_v29 = vrot.slane %v1490_v22, 4 }
  0x9c   : > { %4404 = vmatpush3.bf16.msra.mxu0 %v4723_v47  ;;  %v1487_v56 = vsel %vm5191_vm13, %v1485_v50, %v1486_v44  ;;  %v1056_v30 = vsel %vm5200_vm14, %v1051_v25, %v1055_v10  ;;  %4468 = vmatpush3.bf16.msra.mxu1 %v4733_v32  ;;  %v1899_v36 = vshll.u32 %v1866_v38, 16  ;;  %v2118_v44 = vrot.slane %v1867_v33, 5  ;;  %v4735_v47 = vld [vmem:[%s5817_s3 + $0x1b8] sm:$0xff]   ;;  %v1870_v10 = vld [vmem:[#allocation2 + $0x20] sm:$0x1]  ;;  %v4738_v33 = vld [vmem:[%s5818_s4 + $0x8] sm:$0xff]  }
  0x9d   : > { %v1484_v49 = vsel %vm5191_vm13, %v3944_v42, %v1483_v43  ;;  %v1061_v27 = vrot.slane %v1060_v20, 4  ;;  %v4010_v42 = vrot.slane %v2081_v40, 9  ;;  %v2115_v43 = vrot.slane %v1866_v38, 5  ;;  %4469 = vmatprep.subr.bf16.mxu1 %v4734_v37  ;;  %v5439_v32 = vld [vmem:[#allocation2 + $0x24] sm:$0xf] }
  0x9e   : > { %v3952_v60 = vcombine.low %v1484_v49, %v1487_v56  ;;  %v1901_v45 = vrot.slane %v1899_v36, 5  ;;  %v1911_v49 = vrot.slane %v1909_v41, 5  ;;  %v1893_v56 = vshll.u32 %v1865_v52, 16 }
  0x9f   : > { %v1066_v54 = vsel %vm5200_vm14, %v1061_v27, %v1065_v12  ;;  %v2116_v50 = vsel %vm5191_vm13, %v4010_v42, %v2115_v43  ;;  %v2117_v51 = vrot.slane %v2115_v43, 4  ;;  %v4011_v22 = vrot.slane %v2082_v16, 9  ;;  %v5448_v42 = vld [vmem:[#allocation2 + $0x28] sm:$0xf] }
  0xa0   : > { %v3921_v34 = vcombine.low %v1056_v30, %v1066_v54  ;;  %v1906_v53 = vor.u32 %v1905_v46, %v1901_v45  ;;  %4470 = vmatpush3.bf16.msra.mxu1 %v4735_v47  ;;  %v1895_v4 = vrot.slane %v1893_v56, 5  ;;  %v2122_v25 = vrot.slane %v1869_v9, 5  ;;  %v2525_v46 = vld [vmem:[#allocation2 + $0x2c] sm:$0x1] }
  0xa1   : > { %1348 = vmatmul.mubr.bf16.gmra.mrb[20].mxu0 %v3911_v18  ;;  %v1411_v18 = vld [vmem:[#allocation2 + $0x5c] sm:$0x1]  ;;  %v1917_v30 = vshll.u32 %v1868_v17, 16  ;;  %v1927_v41 = vshrl.u32 %v1869_v9, 16  ;;  %v2557_v47 = vshrl.u32 %v5439_v32, 16  ;;  %v2132_v16 = vrot.slane %v1873_v61, 5 }
  0xa2   : > { %1793 = vmatmul.mubr.bf16.gmra.mrb[20].mxu1 %v3951_v24  ;;  %1355 = vmatprep.mubr.bf16.mxu0 %v3920_v58  ;;  %v1493_v23 = vrot.slane %v1411_v18, 5  ;;  %v4730_v24 = vld [vmem:[%s5817_s3 + $0x178] sm:$0xff]   ;;  %v2119_v58 = vsel %vm5191_vm13, %v2117_v51, %v2118_v44  ;;  %v1907_v0 = vrot.slane %v1906_v53, 4  ;;  %v2123_v54 = vsel %vm5191_vm13, %v4011_v22, %v2122_v25 }
  0xa3   : > { %1800 = vmatprep.mubr.bf16.mxu1 %v4719_v2  ;;  %4405 = vmatprep.subr.bf16.mxu0 %v4730_v24  ;;  %v3913_v2 = vcombine.low %v862_v62, %v863_v63  ;;  %v2533_v62 = vshrl.u32 %v5421_v57, 16  ;;  %v2536_v63 = vshll.u32 %v5421_v57, 16  ;;  %v4026_v1 = vcombine.low %v2116_v50, %v2119_v58 }
  0xa4   : > { %4406 = vmatpush3.bf16.msra.mxu0 %v4731_v26  ;;  %v1494_v59 = vsel %vm5191_vm13, %v1492_v29, %v1493_v23  ;;  %v1912_v12 = vsel %vm5200_vm14, %v1907_v0, %v1911_v49  ;;  %v2554_v24 = vrot.slane %v2552_v14, 5  ;;  %v2125_v26 = vrot.slane %v1870_v10, 5  ;;  %v4740_v49 = vld [vmem:[%s5818_s4 + $0x10] sm:$0xff]  }
  0xa5   : > { %v3953_v35 = vcombine.low %v1491_v28, %v1494_v59  ;;  %4551 = vmatprep.subr.bf16.mxu0 %v5416_v48  ;;  %v2535_v5 = vrot.slane %v2533_v62, 4  ;;  %v2538_v6 = vrot.slane %v2536_v63, 5  ;;  %v1914_v29 = vshrl.u32 %v1868_v17, 16 }
  0xa6   : > { %v1923_v59 = vshll.u32 %v1869_v9, 16  ;;  %v1919_v39 = vrot.slane %v1917_v30, 5  ;;  %v2560_v53 = vshll.u32 %v5439_v32, 16  ;;  %v2566_v58 = vshll.u32 %v5448_v42, 16 }
  0xa7   : > { %v2539_v18 = vor.u32 %v2538_v6, %v2535_v5  ;;  %v1916_v38 = vrot.slane %v1914_v29, 4  ;;  %v4083_v5 = vcombine.low %v5439_v32, %v5448_v42  ;;  %v1872_v6 = vld [vmem:[#allocation2 + $0x28] sm:$0xf] }
  0xa8   : > { %v1925_v40 = vrot.slane %v1923_v59, 5  ;;  %v2562_v0 = vrot.slane %v2560_v53, 5  ;;  %v2129_v14 = vrot.slane %v1872_v6, 5  ;;  %v1947_v22 = vshll.u32 %v1872_v6, 16 }
  0xa9   : > { %1356 = vmatmul.mubr.bf16.gmra.mrb[24].mxu0 %v3912_v55  ;;  %v1890_v55 = vshrl.u32 %v1865_v52, 16  ;;  %v2540_v27 = vrot.slane %v2539_v18, 4  ;;  %v1920_v51 = vor.u32 %v1919_v39, %v1916_v38  ;;  %v1929_v52 = vrot.slane %v1927_v41, 4  ;;  %v5482_v39 = vld [vmem:[#allocation2 + $0x38] sm:$0x1] }
  0xaa   : > { %1801 = vmatmul.mubr.bf16.gmra.mrb[24].mxu1 %v3952_v60  ;;  %1363 = vmatprep.mubr.bf16.mxu0 %v3921_v34  ;;  %v5425_v60 = vld [vmem:[#allocation2 + $0x1c] sm:$0xf]  ;;  %v1951_v32 = vshrl.u32 %v1872_v6, 16 }
  0xab   : > { %1808 = vmatprep.mubr.bf16.mxu1 %v4727_v7  ;;  %v1892_v3 = vrot.slane %v1890_v55, 4  ;;  %v2542_v7 = vshll.u32 %v5425_v60, 16  ;;  %v2546_v8 = vshrl.u32 %v5425_v60, 16  ;;  %v4082_v15 = vcombine.low %v5421_v57, %v5425_v60  ;;  %v2083_v55 = vld [vmem:[#allocation2 + $0x24] sm:$0xe] }
  0xac   : > { %v2559_v57 = vrot.slane %v2557_v47, 4  ;;  %v2570_v60 = vshrl.u32 %v5448_v42, 16  ;;  %v1921_v62 = vrot.slane %v1920_v51, 4  ;;  %v1930_v63 = vor.u32 %v1929_v52, %v1925_v40 }
  0xad   : > { %v1896_v11 = vor.u32 %v1895_v4, %v1892_v3  ;;  %v2544_v20 = vrot.slane %v2542_v7, 5  ;;  %v2548_v21 = vrot.slane %v2546_v8, 4  ;;  %v2568_v3 = vrot.slane %v2566_v58, 5 }
  0xae   : > { %v2572_v4 = vrot.slane %v2570_v60, 4  ;;  %v4012_v7 = vrot.slane %v2083_v55, 9  ;;  %v1926_v8 = vsel %vm5200_vm14, %v1921_v62, %v1925_v40  ;;  %v1931_v9 = vrot.slane %v1930_v63, 4  ;;  %v4744_v40 = vld [vmem:[%s5818_s4 + $0x20] sm:$0xff]   ;;  %v4746_v63 = vld [vmem:[%s5818_s4 + $0x28] sm:$0xff]  }
  0xaf   : > { %v1897_v23 = vrot.slane %v1896_v11, 4  ;;  %v2549_v28 = vor.u32 %v2548_v21, %v2544_v20  ;;  %v1953_v41 = vrot.slane %v1951_v32, 4  ;;  %v4750_v32 = vld [vmem:[%s5818_s4 + $0x38] sm:$0xff]  }
  0xb1   : > { %1364 = vmatmul.mubr.bf16.gmra.mrb[28].mxu0 %v3913_v2  ;;  %v1902_v31 = vsel %vm5200_vm14, %v1897_v23, %v1901_v45  ;;  %v2124_v2 = vrot.slane %v2122_v25, 4  ;;  %v2550_v37 = vrot.slane %v2549_v28, 4  ;;  %v1933_v45 = vshll.u32 %v1870_v10, 16 }
  0xb2   : > { %1809 = vmatmul.mubr.bf16.gmra.mrb[28].mxu1 %v3953_v35  ;;  %2394 = vmatprep.mubr.bf16.mxu0 %v4026_v1  ;;  %v4018_v34 = vcombine.low %v1902_v31, %v1912_v12  ;;  %v2545_v35 = vsel %vm5200_vm14, %v2540_v27, %v2544_v20  ;;  %v2576_v1 = vshll.u32 %v2525_v46, 16  ;;  %v2563_v10 = vor.u32 %v2562_v0, %v2559_v57  ;;  %v5471_v27 = vld [vmem:[#allocation2 + $0x30] sm:$0xf] }
  0xb3   : > { %v2126_v36 = vsel %vm5191_vm13, %v2124_v2, %v2125_v26  ;;  %v2555_v43 = vsel %vm5200_vm14, %v2550_v37, %v2554_v24  ;;  %v1935_v56 = vrot.slane %v1933_v45, 5  ;;  %v2573_v12 = vor.u32 %v2572_v4, %v2568_v3  ;;  %v1875_v45 = vld [vmem:[#allocation2 + $0x34] sm:$0xf]  ;;  %v2084_v46 = vld [vmem:[#allocation2 + $0x30] sm:$0xe] }
  0xb4   : > { %v4027_v44 = vcombine.low %v2123_v54, %v2126_v36  ;;  %v4090_v50 = vcombine.low %v2545_v35, %v2555_v43  ;;  %v2578_v11 = vrot.slane %v2576_v1, 5  ;;  %v2564_v20 = vrot.slane %v2563_v10, 4  ;;  %v5475_v54 = vld [vmem:[#allocation2 + $0x34] sm:$0xf]  ;;  %v2526_v35 = vld [vmem:[#allocation2 + $0x38] sm:$0x1] }
  0xb5   : > { %v1936_v18 = vsel %vm5200_vm14, %v1931_v9, %v1935_v56  ;;  %v2574_v24 = vrot.slane %v2573_v12, 4  ;;  %v2130_v25 = vsel %vm5191_vm13, %v4012_v7, %v2129_v14  ;;  %v2131_v26 = vrot.slane %v2129_v14, 4  ;;  %v1874_v57 = vld [vmem:[#allocation2 + $0x30] sm:$0xf]  ;;  %v5502_v12 = vld [vmem:[#allocation2 + $0x3c] sm:$0xf] }
  0xb6   : > { %2965 = vmatprep.mubr.bf16.mxu1 %v4090_v50  ;;  %v4019_v23 = vcombine.low %v1926_v8, %v1936_v18  ;;  %v2569_v28 = vsel %vm5200_vm14, %v2564_v20, %v2568_v3  ;;  %v1949_v31 = vrot.slane %v1947_v22, 5  ;;  %v2581_v36 = vshrl.u32 %v5471_v27, 16  ;;  %v5504_v18 = vld [vmem:[#allocation2 + $0x40] sm:$0xf]  ;;  %v4748_v20 = vld [vmem:[%s5818_s4 + $0x30] sm:$0xff]  }
  0xb7   : > { %v2579_v2 = vsel %vm5200_vm14, %v2574_v24, %v2578_v11  ;;  %v2133_v59 = vsel %vm5191_vm13, %v2131_v26, %v2132_v16  ;;  %v2584_v43 = vshll.u32 %v5471_v27, 16  ;;  %v2594_v50 = vshrl.u32 %v5475_v54, 16 }
  0xb8   : > { %v4091_v37 = vcombine.low %v2569_v28, %v2579_v2  ;;  %v4028_v38 = vcombine.low %v2130_v25, %v2133_v59  ;;  %v2600_v51 = vshll.u32 %v2526_v35, 16  ;;  %v1954_v52 = vor.u32 %v1953_v41, %v1949_v31  ;;  %v1879_v59 = vld [vmem:[#allocation2 + $0x44] sm:$0x1] }
  0xb9   : > { %2395 = vmatmul.mubr.bf16.vlgmr.msra.gmra.mrb[32].mxu0 %v4018_v34  ;;  %v1957_v34 = vshll.u32 %v1873_v61, 16  ;;  %v2586_v53 = vrot.slane %v2584_v43, 5  ;;  %v4084_v56 = vcombine.low %v5471_v27, %v5475_v54  ;;  %v2596_v60 = vrot.slane %v2594_v50, 4 }
  0xba   : > { %4552 = vmatpush3.bf16.msra.mxu0 %v5416_v48  ;;  %2402 = vmatprep.mubr.bf16.mxu0 %v4027_v44  ;;  %v1871_v48 = vld [vmem:[#allocation2 + $0x24] sm:$0xf]  ;;  %v2590_v44 = vshll.u32 %v5475_v54, 16  ;;  %v2602_v61 = vrot.slane %v2600_v51, 5  ;;  %v4013_v62 = vrot.slane %v2084_v46, 9  ;;  %v1955_v0 = vrot.slane %v1954_v52, 4 }
  0xbb   : > { %4553 = vmatprep.subr.bf16.mxu0 %v4738_v33  ;;  %2966 = vmatmul.mubr.bf16.vlgmr.msra.gmra.mrb[32].mxu1 %v4082_v15  ;;  %v1938_v17 = vshrl.u32 %v1871_v48, 16  ;;  %v4742_v15 = vld [vmem:[%s5818_s4 + $0x18] sm:$0xff]   ;;  %v1941_v21 = vshll.u32 %v1871_v48, 16  ;;  %v1959_v42 = vrot.slane %v1957_v34, 5  ;;  %v2136_v48 = vrot.slane %v1875_v45, 5 }
  0xbc   : > { %2973 = vmatprep.mubr.bf16.mxu1 %v4091_v37  ;;  %v2592_v55 = vrot.slane %v2590_v44, 5  ;;  %v2139_v3 = vrot.slane %v5482_v39, 5  ;;  %v1965_v6 = vshll.u32 %v1874_v57, 16  ;;  %v1971_v7 = vshll.u32 %v1875_v45, 16 }
  0xbd   : > { %v1940_v29 = vrot.slane %v1938_v17, 4  ;;  %v1943_v30 = vrot.slane %v1941_v21, 5  ;;  %v1960_v8 = vsel %vm5200_vm14, %v1955_v0, %v1959_v42  ;;  %v2137_v10 = vsel %vm5191_vm13, %v4013_v62, %v2136_v48  ;;  %v1877_v42 = vld [vmem:[#allocation2 + $0x3c] sm:$0xf] }
  0xbe   : > { %4554 = vmatpush3.bf16.msra.mxu0 %v4738_v33  ;;  %v2597_v4 = vor.u32 %v2596_v60, %v2592_v55  ;;  %v2138_v11 = vrot.slane %v2136_v48, 4  ;;  %v1975_v24 = vshrl.u32 %v1875_v45, 16  ;;  %v1981_v28 = vshll.u32 %v5482_v39, 16 }
  0xbf   : > { %4555 = vmatprep.subr.bf16.mxu0 %v4740_v49  ;;  %v1944_v33 = vor.u32 %v1943_v30, %v1940_v29  ;;  %v2527_v29 = vld [vmem:[#allocation2 + $0x44] sm:$0x1]  ;;  %v2605_v54 = vshrl.u32 %v5502_v12, 16  ;;  %v2608_v2 = vshll.u32 %v5502_v12, 16  ;;  %v2614_v37 = vshll.u32 %v5504_v18, 16 }
  0xc0   : > { %v2598_v16 = vrot.slane %v2597_v4, 4  ;;  %v2140_v22 = vsel %vm5191_vm13, %v2138_v11, %v2139_v3  ;;  %v1983_v35 = vrot.slane %v1981_v28, 5  ;;  %v2624_v41 = vshll.u32 %v2527_v29, 16  ;;  %v5531_v3 = vld [vmem:[#allocation2 + $0x48] sm:$0xf] }
  0xc1   : > { %2403 = vmatmul.mubr.bf16.gmra.mrb[36].mxu0 %v4019_v23  ;;  %v1945_v47 = vrot.slane %v1944_v33, 4  ;;  %v1973_v23 = vrot.slane %v1971_v7, 5  ;;  %v4029_v26 = vcombine.low %v2137_v10, %v2140_v22  ;;  %v2085_v33 = vld [vmem:[#allocation2 + $0x3c] sm:$0xe]  ;;  %v2607_v39 = vrot.slane %v2605_v54, 4 }
  0xc2   : > { %4556 = vmatpush3.bf16.msra.mxu0 %v4740_v49  ;;  %2410 = vmatprep.mubr.bf16.mxu0 %v4028_v38  ;;  %v2583_v49 = vrot.slane %v2581_v36, 4  ;;  %v2603_v25 = vsel %vm5200_vm14, %v2598_v16, %v2602_v61  ;;  %v2618_v38 = vshrl.u32 %v5504_v18, 16  ;;  %v2616_v44 = vrot.slane %v2614_v37, 5  ;;  %v1882_v29 = vld [vmem:[#allocation2 + $0x50] sm:$0x1] }
  0xc3   : > { %4557 = vmatprep.subr.bf16.mxu0 %v4742_v15  ;;  %2974 = vmatmul.mubr.bf16.gmra.mrb[36].mxu1 %v4083_v5  ;;  %v1950_v58 = vsel %vm5200_vm14, %v1945_v47, %v1949_v31  ;;  %v1962_v5 = vshrl.u32 %v1874_v57, 16  ;;  %v1977_v31 = vrot.slane %v1975_v24, 4  ;;  %v4085_v46 = vcombine.low %v5502_v12, %v5504_v18  ;;  %v1878_v47 = vld [vmem:[#allocation2 + $0x40] sm:$0xf] }
  0xc4   : > { %v2587_v1 = vor.u32 %v2586_v53, %v2583_v49  ;;  %v4020_v14 = vcombine.low %v1950_v58, %v1960_v8  ;;  %v2620_v45 = vrot.slane %v2618_v38, 4  ;;  %v2626_v51 = vrot.slane %v2624_v41, 5  ;;  %v5535_v8 = vld [vmem:[#allocation2 + $0x4c] sm:$0xf] }
  0xc5   : > { %v1964_v17 = vrot.slane %v1962_v5, 4  ;;  %v1978_v36 = vor.u32 %v1977_v31, %v1973_v23  ;;  %v4014_v52 = vrot.slane %v2085_v33, 9  ;;  %v2146_v57 = vrot.slane %v1879_v59, 5 }
  0xc6   : > { %4558 = vmatpush3.bf16.msra.mxu0 %v4742_v15  ;;  %v2588_v9 = vrot.slane %v2587_v1, 4  ;;  %v1967_v15 = vrot.slane %v1965_v6, 5  ;;  %v2621_v53 = vor.u32 %v2620_v45, %v2616_v44  ;;  %v1986_v58 = vshrl.u32 %v1877_v42, 16 }
  0xc7   : > { %4559 = vmatprep.subr.bf16.mxu0 %v4744_v40  ;;  %v1979_v49 = vrot.slane %v1978_v36, 4  ;;  %v1989_v61 = vshll.u32 %v1877_v42, 16  ;;  %v1995_v62 = vshll.u32 %v1878_v47, 16  ;;  %v1999_v11 = vshrl.u32 %v1878_v47, 16 }
  0xc8   : > { %v2593_v21 = vsel %vm5200_vm14, %v2588_v9, %v2592_v55  ;;  %v1968_v27 = vor.u32 %v1967_v15, %v1964_v17  ;;  %v2143_v55 = vrot.slane %v1878_v47, 5  ;;  %v2622_v0 = vrot.slane %v2621_v53, 4 }
  0xc9   : > { %2411 = vmatmul.mubr.bf16.gmra.mrb[40].mxu0 %v4020_v14  ;;  %v4092_v30 = vcombine.low %v2593_v21, %v2603_v25  ;;  %v1988_v5 = vrot.slane %v1986_v58, 4  ;;  %v1991_v6 = vrot.slane %v1989_v61, 5  ;;  %v1997_v7 = vrot.slane %v1995_v62, 5  ;;  %v2528_v14 = vld [vmem:[#allocation2 + $0x50] sm:$0x1] }
  0xca   : > { %4560 = vmatpush3.bf16.msra.mxu0 %v4744_v40  ;;  %2418 = vmatprep.mubr.bf16.mxu0 %v4029_v26  ;;  %v1969_v34 = vrot.slane %v1968_v27, 4  ;;  %v2610_v40 = vrot.slane %v2608_v2, 5  ;;  %v2144_v1 = vsel %vm5191_vm13, %v4014_v52, %v2143_v55  ;;  %v2145_v48 = vrot.slane %v2143_v55, 4  ;;  %v5553_v55 = vld [vmem:[#allocation2 + $0x54] sm:$0xf] }
  0xcb   : > { %4561 = vmatprep.subr.bf16.mxu0 %v4746_v63  ;;  %2981 = vmatprep.mubr.bf16.mxu1 %v4092_v30  ;;  %v2627_v9 = vsel %vm5200_vm14, %v2622_v0, %v2626_v51  ;;  %v2005_v12 = vshll.u32 %v1879_v59, 16  ;;  %v1992_v15 = vor.u32 %v1991_v6, %v1988_v5  ;;  %v2629_v18 = vshrl.u32 %v5531_v3, 16  ;;  %v1881_v59 = vld [vmem:[#allocation2 + $0x4c] sm:$0xf]  ;;  %v5559_v61 = vld [vmem:[#allocation2 + $0x58] sm:$0xf] }
  0xcc   : > { %2982 = vmatmul.mubr.bf16.gmra.mrb[40].mxu1 %v4084_v56  ;;  %v1974_v43 = vsel %vm5200_vm14, %v1969_v34, %v1973_v23  ;;  %v2611_v50 = vor.u32 %v2610_v40, %v2607_v39  ;;  %v1984_v56 = vsel %vm5200_vm14, %v1979_v49, %v1983_v35  ;;  %v2147_v10 = vsel %vm5191_vm13, %v2145_v48, %v2146_v57  ;;  %v2529_v48 = vld [vmem:[#allocation2 + $0x5c] sm:$0x1] }
  0xcd   : > { %v4030_v17 = vcombine.low %v2144_v1, %v2147_v10  ;;  %v2001_v21 = vrot.slane %v1999_v11, 4  ;;  %v2007_v22 = vrot.slane %v2005_v12, 5  ;;  %v2632_v23 = vshll.u32 %v5531_v3, 16  ;;  %v2087_v12 = vld [vmem:[#allocation2 + $0x54] sm:$0xe] }
  0xce   : > { %4562 = vmatpush3.bf16.msra.mxu0 %v4746_v63  ;;  %v2612_v60 = vrot.slane %v2611_v50, 4  ;;  %v4021_v63 = vcombine.low %v1974_v43, %v1984_v56  ;;  %v2638_v24 = vshll.u32 %v5535_v8, 16  ;;  %v1993_v25 = vrot.slane %v1992_v15, 4 }
  0xcf   : > { %4563 = vmatprep.subr.bf16.mxu0 %v4748_v20  ;;  %v2631_v26 = vrot.slane %v2629_v18, 4  ;;  %v2642_v27 = vshrl.u32 %v5535_v8, 16  ;;  %v2648_v28 = vshll.u32 %v2528_v14, 16  ;;  %v2002_v30 = vor.u32 %v2001_v21, %v1997_v7  ;;  %v1883_v18 = vld [vmem:[#allocation2 + $0x54] sm:$0xf] }
  0xd0   : > { %v2617_v4 = vsel %vm5200_vm14, %v2612_v60, %v2616_v44  ;;  %v2634_v31 = vrot.slane %v2632_v23, 5  ;;  %v2640_v54 = vrot.slane %v2638_v24, 5  ;;  %v4086_v2 = vcombine.low %v5531_v3, %v5535_v8  ;;  %v1884_v24 = vld [vmem:[#allocation2 + $0x58] sm:$0xf] }
  0xd1   : > { %2419 = vmatmul.mubr.bf16.gmra.mrb[44].mxu0 %v4021_v63  ;;  %v4093_v16 = vcombine.low %v2617_v4, %v2627_v9  ;;  %v1998_v34 = vsel %vm5200_vm14, %v1993_v25, %v1997_v7  ;;  %v2644_v35 = vrot.slane %v2642_v27, 4  ;;  %v2650_v37 = vrot.slane %v2648_v28, 5  ;;  %v1885_v7 = vld [vmem:[#allocation2 + $0x5c] sm:$0x1] }
  0xd2   : > { %4564 = vmatpush3.bf16.msra.mxu0 %v4748_v20  ;;  %v2086_v20 = vld [vmem:[#allocation2 + $0x48] sm:$0xe]  ;;  %2426 = vmatprep.mubr.bf16.mxu0 %v4030_v17  ;;  %v2003_v33 = vrot.slane %v2002_v30, 4  ;;  %v2635_v36 = vor.u32 %v2634_v31, %v2631_v26  ;;  %v2150_v39 = vrot.slane %v1881_v59, 5  ;;  %v2153_v40 = vrot.slane %v1882_v29, 5 }
  0xd3   : > { %4565 = vmatprep.subr.bf16.mxu0 %v4750_v32  ;;  %2989 = vmatprep.mubr.bf16.mxu1 %v4093_v16  ;;  %v4015_v38 = vrot.slane %v2086_v20, 9  ;;  %v2645_v41 = vor.u32 %v2644_v35, %v2640_v54  ;;  %v2019_v44 = vshll.u32 %v1881_v59, 16  ;;  %v2023_v60 = vshrl.u32 %v1881_v59, 16 }
  0xd4   : > { %2990 = vmatmul.mubr.bf16.gmra.mrb[44].mxu1 %v4085_v46  ;;  %v2008_v45 = vsel %vm5200_vm14, %v2003_v33, %v2007_v22  ;;  %v2636_v46 = vrot.slane %v2635_v36, 4  ;;  %v2152_v49 = vrot.slane %v2150_v39, 4  ;;  %v2029_v1 = vshll.u32 %v1882_v29, 16  ;;  %v5575_v36 = vld [vmem:[#allocation2 + $0x60] sm:$0xf] }
  0xd5   : > { %v2151_v47 = vsel %vm5191_vm13, %v4015_v38, %v2150_v39  ;;  %v4022_v50 = vcombine.low %v1998_v34, %v2008_v45  ;;  %v2646_v51 = vrot.slane %v2645_v41, 4  ;;  %v2021_v56 = vrot.slane %v2019_v44, 5 }
  0xd6   : > { %4566 = vmatpush3.bf16.msra.mxu0 %v4750_v32  ;;  %v1880_v32 = vld [vmem:[#allocation2 + $0x48] sm:$0xf]  ;;  %v2641_v57 = vsel %vm5200_vm14, %v2636_v46, %v2640_v54  ;;  %v2154_v58 = vsel %vm5191_vm13, %v2152_v49, %v2153_v40  ;;  %v2025_v4 = vrot.slane %v2023_v60, 4  ;;  %v2653_v5 = vshrl.u32 %v5553_v55, 16 }
  0xd7   : > { %v2010_v42 = vshrl.u32 %v1880_v32, 16  ;;  %v2013_v43 = vshll.u32 %v1880_v32, 16  ;;  %v2651_v62 = vsel %vm5200_vm14, %v2646_v51, %v2650_v37  ;;  %v4031_v63 = vcombine.low %v2151_v47, %v2154_v58  ;;  %v2530_v49 = vld [vmem:[#allocation2 + $0x68] sm:$0x1] }
  0xd8   : > { %v4094_v3 = vcombine.low %v2641_v57, %v2651_v62  ;;  %v2656_v6 = vshll.u32 %v5553_v55, 16  ;;  %v2031_v9 = vrot.slane %v2029_v1, 5  ;;  %v2662_v10 = vshll.u32 %v5559_v61, 16  ;;  %v2088_v57 = vld [vmem:[#allocation2 + $0x60] sm:$0xe] }
  0xd9   : > { %v2012_v52 = vrot.slane %v2010_v42, 4  ;;  %v2015_v53 = vrot.slane %v2013_v43, 5  ;;  %2427 = vmatmul.mubr.bf16.gmra.mrb[48].mxu0 %v4022_v50  ;;  %v2666_v11 = vshrl.u32 %v5559_v61, 16  ;;  %v2026_v14 = vor.u32 %v2025_v4, %v2021_v56  ;;  %v5579_v43 = vld [vmem:[#allocation2 + $0x64] sm:$0xf] }
  0xda   : > { %2434 = vmatprep.mubr.bf16.mxu0 %v4031_v63  ;;  %2997 = vmatprep.mubr.bf16.mxu1 %v4094_v3  ;;  %v2655_v16 = vrot.slane %v2653_v5, 4  ;;  %v2658_v17 = vrot.slane %v2656_v6, 5  ;;  %v2672_v15 = vshll.u32 %v2529_v48, 16  ;;  %v2664_v21 = vrot.slane %v2662_v10, 5  ;;  %v1887_v62 = vld [vmem:[#allocation2 + $0x64] sm:$0xf] }
  0xdb   : > { %v2016_v0 = vor.u32 %v2015_v53, %v2012_v52  ;;  %v2668_v22 = vrot.slane %v2666_v11, 4  ;;  %v4087_v23 = vcombine.low %v5553_v55, %v5559_v61  ;;  %v2027_v25 = vrot.slane %v2026_v14, 4  ;;  %v1888_v55 = vld [vmem:[#allocation2 + $0x68] sm:$0x1]  ;;  %v1886_v63 = vld [vmem:[#allocation2 + $0x60] sm:$0xf] }
  0xdc   : > { %2998 = vmatmul.mubr.bf16.gmra.mrb[48].mxu1 %v4086_v2  ;;  %v2659_v26 = vor.u32 %v2658_v17, %v2655_v16  ;;  %v2674_v27 = vrot.slane %v2672_v15, 5  ;;  %v4016_v28 = vrot.slane %v2087_v12, 9  ;;  %v2157_v30 = vrot.slane %v1884_v24, 5 }
  0xdd   : > { %v2017_v8 = vrot.slane %v2016_v0, 4  ;;  %v2669_v29 = vor.u32 %v2668_v22, %v2664_v21  ;;  %v2160_v31 = vrot.slane %v1885_v7, 5  ;;  %v2034_v54 = vshrl.u32 %v1883_v18, 16  ;;  %v5593_v22 = vld [vmem:[#allocation2 + $0x6c] sm:$0xf] }
  0xde   : > { %v2032_v2 = vsel %vm5200_vm14, %v2027_v25, %v2031_v9  ;;  %v2660_v59 = vrot.slane %v2659_v26, 4  ;;  %v2037_v32 = vshll.u32 %v1883_v18, 16  ;;  %v2043_v34 = vshll.u32 %v1884_v24, 16 }
  0xdf   : > { %v2022_v20 = vsel %vm5200_vm14, %v2017_v8, %v2021_v56  ;;  %v2670_v37 = vrot.slane %v2669_v29, 4  ;;  %v2158_v38 = vsel %vm5191_vm13, %v4016_v28, %v2157_v30  ;;  %v2159_v33 = vrot.slane %v2157_v30, 4 }
  0xe0   : > { %v4023_v35 = vcombine.low %v2022_v20, %v2032_v2  ;;  %v2665_v39 = vsel %vm5200_vm14, %v2660_v59, %v2664_v21  ;;  %v2036_v40 = vrot.slane %v2034_v54, 4  ;;  %v2039_v41 = vrot.slane %v2037_v32, 5  ;;  %v2531_v54 = vld [vmem:[#allocation2 + $0x74] sm:$0x1] }
  0xe1   : > { %v2045_v42 = vrot.slane %v2043_v34, 5  ;;  %v2675_v44 = vsel %vm5200_vm14, %v2670_v37, %v2674_v27  ;;  %v2161_v45 = vsel %vm5191_vm13, %v2159_v33, %v2160_v31  ;;  %v2047_v46 = vshrl.u32 %v1884_v24, 16  ;;  %v5599_v27 = vld [vmem:[#allocation2 + $0x70] sm:$0xf] }
  0xe2   : > { %2435 = vmatmul.mubr.bf16.gmra.mrb[52].mxu0 %v4023_v35  ;;  %v2053_v47 = vshll.u32 %v1885_v7, 16  ;;  %v4095_v50 = vcombine.low %v2665_v39, %v2675_v44  ;;  %v4032_v51 = vcombine.low %v2158_v38, %v2161_v45  ;;  %v2040_v52 = vor.u32 %v2039_v41, %v2036_v40 }
  0xe3   : > { %v2677_v53 = vshrl.u32 %v5575_v36, 16  ;;  %v2049_v58 = vrot.slane %v2047_v46, 4  ;;  %v2680_v60 = vshll.u32 %v5575_v36, 16  ;;  %v2686_v61 = vshll.u32 %v5579_v43, 16 }
  0xe4   : > { %v2055_v56 = vrot.slane %v2053_v47, 5  ;;  %3005 = vmatprep.mubr.bf16.mxu1 %v4095_v50  ;;  %2442 = vmatprep.mubr.bf16.mxu0 %v4032_v51  ;;  %v2041_v0 = vrot.slane %v2040_v52, 4  ;;  %v2690_v48 = vshrl.u32 %v5579_v43, 16  ;;  %v2696_v3 = vshll.u32 %v2530_v49, 16  ;;  %v3096_v49 = vld [vmem:[#allocation2 + $0x20] sm:$0x1] }
  0xe5   : > { %v2679_v1 = vrot.slane %v2677_v53, 4  ;;  %3006 = vmatmul.mubr.bf16.gmra.mrb[52].mxu1 %v4087_v23  ;;  %v2050_v4 = vor.u32 %v2049_v58, %v2045_v42  ;;  %v2682_v5 = vrot.slane %v2680_v60, 5  ;;  %v2688_v6 = vrot.slane %v2686_v61, 5  ;;  %v3098_v60 = vld [vmem:[#allocation2 + $0x28] sm:$0xf] }
  0xe6   : > { %v4088_v7 = vcombine.low %v5575_v36, %v5579_v43  ;;  %v2046_v8 = vsel %vm5200_vm14, %v2041_v0, %v2045_v42  ;;  %v2692_v9 = vrot.slane %v2690_v48, 4  ;;  %v2698_v10 = vrot.slane %v2696_v3, 5  ;;  %v3094_v36 = vld [vmem:[#allocation2 + $0x18] sm:$0xe]  ;;  %v3095_v43 = vld [vmem:[#allocation2 + $0x1c] sm:$0xf] }
  0xe7   : > { %v4017_v11 = vrot.slane %v2088_v57, 9  ;;  %v2051_v12 = vrot.slane %v2050_v4, 4  ;;  %v2683_v14 = vor.u32 %v2682_v5, %v2679_v1  ;;  %v2164_v16 = vrot.slane %v1887_v62, 5  ;;  %v3099_v61 = vld [vmem:[#allocation2 + $0x2c] sm:$0x1] }
  0xe8   : > { %v2167_v17 = vrot.slane %v1888_v55, 5  ;;  %v2693_v15 = vor.u32 %v2692_v9, %v2688_v6  ;;  %v2058_v18 = vshrl.u32 %v1886_v63, 16  ;;  %v2061_v20 = vshll.u32 %v1886_v63, 16  ;;  %v3100_v48 = vld [vmem:[#allocation2 + $0x30] sm:$0xe] }
  0xe9   : > { %v2067_v21 = vshll.u32 %v1887_v62, 16  ;;  %v2056_v23 = vsel %vm5200_vm14, %v2051_v12, %v2055_v56  ;;  %v2684_v24 = vrot.slane %v2683_v14, 4  ;;  %v2165_v25 = vsel %vm5191_vm13, %v4017_v11, %v2164_v16  ;;  %v3102_v12 = vld [vmem:[#allocation2 + $0x38] sm:$0x1] }
  0xea   : > { %v2166_v26 = vrot.slane %v2164_v16, 4  ;;  %v4024_v28 = vcombine.low %v2046_v8, %v2056_v23  ;;  %v2694_v29 = vrot.slane %v2693_v15, 4  ;;  %v2060_v30 = vrot.slane %v2058_v18, 4  ;;  %v3101_v8 = vld [vmem:[#allocation2 + $0x34] sm:$0xf] }
  0xeb   : > { %v2063_v31 = vrot.slane %v2061_v20, 5  ;;  %v2689_v2 = vsel %vm5200_vm14, %v2684_v24, %v2688_v6  ;;  %v2069_v32 = vrot.slane %v2067_v21, 5  ;;  %v2071_v34 = vshrl.u32 %v1887_v62, 16  ;;  %v3104_v24 = vld [vmem:[#allocation2 + $0x40] sm:$0xf] }
  0xec   : > { %v2168_v59 = vsel %vm5191_vm13, %v2166_v26, %v2167_v17  ;;  %2443 = vmatmul.mubr.bf16.gmra.mrb[56].mxu0 %v4024_v28  ;;  %v2699_v35 = vsel %vm5200_vm14, %v2694_v29, %v2698_v10  ;;  %v2077_v33 = vshll.u32 %v1888_v55, 16  ;;  %v2701_v41 = vshrl.u32 %v5593_v22, 16  ;;  %v3097_v55 = vld [vmem:[#allocation2 + $0x24] sm:$0xe] }
  0xed   : > { %v4033_v37 = vcombine.low %v2165_v25, %v2168_v59  ;;  %v2064_v38 = vor.u32 %v2063_v31, %v2060_v30  ;;  %v4096_v39 = vcombine.low %v2689_v2, %v2699_v35  ;;  %v2073_v40 = vrot.slane %v2071_v34, 4  ;;  %v3107_v30 = vld [vmem:[#allocation2 + $0x4c] sm:$0xf]  ;;  %v3106_v35 = vld [vmem:[#allocation2 + $0x48] sm:$0xe] }
  0xee   : > { %v2704_v42 = vshll.u32 %v5593_v22, 16  ;;  %v2079_v45 = vrot.slane %v2077_v33, 5  ;;  %v2710_v46 = vshll.u32 %v5599_v27, 16  ;;  %v2714_v47 = vshrl.u32 %v5599_v27, 16 }
  0xef   : > { %2450 = vmatprep.mubr.bf16.mxu0 %v4033_v37  ;;  %v2065_v44 = vrot.slane %v2064_v38, 4  ;;  %3013 = vmatprep.mubr.bf16.mxu1 %v4096_v39  ;;  %v2074_v50 = vor.u32 %v2073_v40, %v2069_v32  ;;  %v2703_v51 = vrot.slane %v2701_v41, 4  ;;  %v2720_v53 = vshll.u32 %v2531_v54, 16  ;;  %v3108_v37 = vld [vmem:[#allocation2 + $0x50] sm:$0x1] }
  0xf0   : > { %v2706_v52 = vrot.slane %v2704_v42, 5  ;;  %3014 = vmatmul.mubr.bf16.gmra.mrb[56].mxu1 %v4088_v7  ;;  %v2712_v58 = vrot.slane %v2710_v46, 5  ;;  %v2716_v56 = vrot.slane %v2714_v47, 4  ;;  %v4146_v1 = vrot.slane %v3094_v36, 9  ;;  %v3110_v46 = vld [vmem:[#allocation2 + $0x58] sm:$0xf] }
  0xf1   : > { %v2070_v57 = vsel %vm5200_vm14, %v2065_v44, %v2069_v32  ;;  %v2075_v62 = vrot.slane %v2074_v50, 4  ;;  %v2722_v0 = vrot.slane %v2720_v53, 5  ;;  %v3144_v4 = vrot.slane %v3095_v43, 5  ;;  %v3105_v32 = vld [vmem:[#allocation2 + $0x44] sm:$0x1] }
  0xf2   : > { %v2707_v63 = vor.u32 %v2706_v52, %v2703_v51  ;;  %v2717_v3 = vor.u32 %v2716_v56, %v2712_v58  ;;  %v3147_v5 = vrot.slane %v3096_v49, 5  ;;  %v4147_v6 = vrot.slane %v3097_v55, 9  ;;  %v3113_v47 = vld [vmem:[#allocation2 + $0x64] sm:$0xf]  ;;  %v3109_v55 = vld [vmem:[#allocation2 + $0x54] sm:$0xe] }
  0xf3   : > { %v2080_v7 = vsel %vm5200_vm14, %v2075_v62, %v2079_v45  ;;  %v3151_v10 = vrot.slane %v3098_v60, 5  ;;  %v3154_v11 = vrot.slane %v3099_v61, 5  ;;  %v3145_v17 = vsel %vm5191_vm13, %v4146_v1, %v3144_v4  ;;  %v3112_v56 = vld [vmem:[#allocation2 + $0x60] sm:$0xe]  ;;  %v3114_v60 = vld [vmem:[#allocation2 + $0x68] sm:$0x1] }
  0xf4   : > { %v2708_v9 = vrot.slane %v2707_v63, 4  ;;  %v4025_v14 = vcombine.low %v2070_v57, %v2080_v7  ;;  %v2718_v16 = vrot.slane %v2717_v3, 4  ;;  %v3146_v15 = vrot.slane %v3144_v4, 4  ;;  %v3111_v57 = vld [vmem:[#allocation2 + $0x5c] sm:$0x1] }
  0xf5   : > { %v4089_v20 = vcombine.low %v5593_v22, %v5599_v27  ;;  %v3153_v21 = vrot.slane %v3151_v10, 4  ;;  %v4148_v23 = vrot.slane %v3100_v48, 9  ;;  %v3158_v28 = vrot.slane %v3101_v8, 5 }
  0xf6   : > { %v2713_v18 = vsel %vm5200_vm14, %v2708_v9, %v2712_v58  ;;  %2451 = vmatmul.mubr.bf16.gmra.mrb[60].mxu0 %v4025_v14  ;;  %v2723_v25 = vsel %vm5200_vm14, %v2718_v16, %v2722_v0  ;;  %v3148_v26 = vsel %vm5191_vm13, %v3146_v15, %v3147_v5  ;;  %v3161_v29 = vrot.slane %v3102_v12, 5  ;;  %v3116_v5 = vld [vmem:[#allocation2 + $0x70] sm:$0xf]  ;;  %v3117_v12 = vld [vmem:[#allocation2 + $0x74] sm:$0x1] }
  0xf7   : > { %v4097_v31 = vcombine.low %v2713_v18, %v2723_v25  ;;  %v4154_v54 = vcombine.low %v3145_v17, %v3148_v26  ;;  %v3152_v2 = vsel %vm5191_vm13, %v4147_v6, %v3151_v10  ;;  %v3155_v22 = vsel %vm5191_vm13, %v3153_v21, %v3154_v11  ;;  %v3115_v11 = vld [vmem:[#allocation2 + $0x6c] sm:$0xe]  ;;  %v4754_v26 = vld [vmem:[%s5820_s6 + $0x10] sm:$0xff]  }
  0xf8   : > { %v3159_v27 = vsel %vm5191_vm13, %v4148_v23, %v3158_v28  ;;  %v3160_v59 = vrot.slane %v3158_v28, 4  ;;  %v3165_v34 = vrot.slane %v3104_v24, 5  ;;  %v3172_v38 = vrot.slane %v3107_v30, 5  ;;  %v4752_v24 = vld [vmem:[%s5820_s6] sm:$0xff]   ;;  %v4753_v25 = vld [vmem:[%s5820_s6 + $0x8] sm:$0xff]  }
  0xf9   : > { %3021 = vmatprep.mubr.bf16.mxu1 %v4097_v31  ;;  %4567 = vmatprep.mubr.bf16.mxu0 %v4154_v54  ;;  %v4155_v33 = vcombine.low %v3152_v2, %v3155_v22  ;;  %v4149_v40 = vrot.slane %v3103_v19, 9  ;;  %v3168_v42 = vrot.slane %v3105_v32, 5  ;;  %v4150_v43 = vrot.slane %v3106_v35, 9 }
  0xfa   : > { %3022 = vmatmul.mubr.bf16.gmra.mrb[60].mxu1 %v4089_v20  ;;  %v3162_v36 = vsel %vm5191_vm13, %v3160_v59, %v3161_v29  ;;  %v3167_v41 = vrot.slane %v3165_v34, 4  ;;  %v3174_v44 = vrot.slane %v3172_v38, 4  ;;  %v3175_v45 = vrot.slane %v3108_v37, 5  ;;  %4583 = vmatprep.subr.bf16.mxu1 %v4752_v24  ;;  %v4756_v37 = vld [vmem:[%s5820_s6 + $0x20] sm:$0xff]  }
  0xfb   : > { %v4156_v39 = vcombine.low %v3159_v27, %v3162_v36  ;;  %v3166_v49 = vsel %vm5191_vm13, %v4149_v40, %v3165_v34  ;;  %v3179_v51 = vrot.slane %v3110_v46, 5  ;;  %v3173_v52 = vsel %vm5191_vm13, %v4150_v43, %v3172_v38  ;;  %4584 = vmatpush3.bf16.msra.mxu1 %v4752_v24 }
  0xfc   : > { %v3169_v50 = vsel %vm5191_vm13, %v3167_v41, %v3168_v42  ;;  %v3176_v53 = vsel %vm5191_vm13, %v3174_v44, %v3175_v45  ;;  %v3186_v58 = vrot.slane %v3113_v47, 5  ;;  %v4151_v63 = vrot.slane %v3109_v55, 9  ;;  %4585 = vmatprep.subr.bf16.mxu1 %v4753_v25 }
  0xfd   : > { %v4157_v61 = vcombine.low %v3166_v49, %v3169_v50  ;;  %v4158_v62 = vcombine.low %v3173_v52, %v3176_v53  ;;  %v3181_v0 = vrot.slane %v3179_v51, 4  ;;  %v3182_v1 = vrot.slane %v3111_v57, 5 }
  0xfe   : > { %4568 = vmatmul.mubr.bf16.vlgmr.msra.gmra.mrb[64].mxu0 %v4155_v33  ;;  %v4152_v48 = vrot.slane %v3112_v56, 9  ;;  %v3188_v3 = vrot.slane %v3186_v58, 4  ;;  %v3189_v4 = vrot.slane %v3114_v60, 5  ;;  %v3180_v6 = vsel %vm5191_vm13, %v4151_v63, %v3179_v51  ;;  %v4757_v56 = vld [vmem:[%s5820_s6 + $0x28] sm:$0xff]  }
  0xff   : > { %4571 = vmatprep.mubr.bf16.mxu0 %v4156_v39  ;;  %v3183_v8 = vsel %vm5191_vm13, %v3181_v0, %v3182_v1  ;;  %v3193_v7 = vrot.slane %v3116_v5, 5  ;;  %v4153_v17 = vrot.slane %v3115_v11, 9  ;;  %v3196_v18 = vrot.slane %v3117_v12, 5  ;;  %4586 = vmatpush3.bf16.msra.mxu1 %v4753_v25 }
 0x100   : > { %v3187_v9 = vsel %vm5191_vm13, %v4152_v48, %v3186_v58  ;;  %v3190_v10 = vsel %vm5191_vm13, %v3188_v3, %v3189_v4  ;;  %v4159_v14 = vcombine.low %v3180_v6, %v3183_v8  ;;  %4587 = vmatprep.subr.bf16.mxu1 %v4754_v26 }
 0x101   : > { %v4160_v16 = vcombine.low %v3187_v9, %v3190_v10  ;;  %v3195_v15 = vrot.slane %v3193_v7, 4  ;;  %v3194_v20 = vsel %vm5191_vm13, %v4153_v17, %v3193_v7  ;;  %v4758_v17 = vld [vmem:[%s5820_s6 + $0x30] sm:$0xff]  }
 0x103   : > { %v3197_v21 = vsel %vm5191_vm13, %v3195_v15, %v3196_v18  ;;  %4588 = vmatpush3.bf16.msra.mxu1 %v4754_v26 }
 0x104   : > { %v4161_v23 = vcombine.low %v3194_v20, %v3197_v21  ;;  %4589 = vmatprep.subr.bf16.mxu1 %v4755_v13 }
 0x106   : > { %4572 = vmatmul.mubr.bf16.gmra.mrb[68].mxu0 %v4157_v61 }
 0x107   : > { %4575 = vmatprep.mubr.bf16.mxu0 %v4158_v62  ;;  %4590 = vmatpush3.bf16.msra.mxu1 %v4755_v13 }
 0x108   : > { %4591 = vmatprep.subr.bf16.mxu1 %v4756_v37 }
 0x10b   : > { %4592 = vmatpush3.bf16.msra.mxu1 %v4756_v37 }
 0x10c   : > { %4593 = vmatprep.subr.bf16.mxu1 %v4757_v56 }
 0x10e   : > { %4576 = vmatmul.mubr.bf16.gmra.mrb[72].mxu0 %v4159_v14 }
 0x10f   : > { %4579 = vmatprep.mubr.bf16.mxu0 %v4160_v16  ;;  %4594 = vmatpush3.bf16.msra.mxu1 %v4757_v56 }
 0x110   : > { %4595 = vmatprep.subr.bf16.mxu1 %v4758_v17 }
 0x113   : > { %4596 = vmatpush3.bf16.msra.mxu1 %v4758_v17 }
 0x116   : > { %4580 = vmatmul.mubr.bf16.gmra.mrb[76].mxu0 %v4161_v23 }
 0x14c   : > { %v4279_v30 = vpop.f32.mrb[0].mxu0 }
 0x14d   : > { %v4343_v28 = vpop.f32.mrb[0].mxu1  ;;  %v4280_v2 = vpop.f32.mrb[1].mxu0 }
 0x14e   : > { %v4344_v29 = vpop.f32.mrb[1].mxu1  ;;  %v4281_v27 = vadd.f32 %v4280_v2, %v4279_v30  ;;  %v4282_v59 = vpop.f32.mrb[2].mxu0 }
 0x14f   : > { %v4345_v31 = vadd.f32 %v4344_v29, %v4343_v28  ;;  %v4346_v54 = vpop.f32.mrb[2].mxu1  ;;  %v4283_v32 = vpop.f32.mrb[3].mxu0 }
 0x150   : > { %v4347_v22 = vpop.f32.mrb[3].mxu1  ;;  %v4284_v35 = vadd.f32 %v4283_v32, %v4282_v59 }
 0x151   : > { %v4348_v19 = vadd.f32 %v4347_v22, %v4346_v54  ;;  %v5665_v34 = vadd.f32 %v4345_v31, %v4281_v27  ;;  %v4759_v22 = vld [vmem:[%s5820_s6 + $0x38] sm:$0xff]  }
 0x152   : > { %4597 = vmatprep.subr.bf16.mxu1 %v4759_v22 }
 0x153   : > { %v5670_v38 = vadd.f32 %v4348_v19, %v4284_v35  ;;  %4598 = vmatpush3.bf16.msra.mxu1 %v4759_v22 }
 0x154   : > { %v4285_v39 = vpop.f32.mrb[4].mxu0 }
 0x155   : > { %v4349_v33 = vpop.f32.mrb[4].mxu1  ;;  %v4286_v42 = vpop.f32.mrb[5].mxu0 }
 0x156   : > { %v4350_v36 = vpop.f32.mrb[5].mxu1  ;;  %v4287_v44 = vadd.f32 %v4286_v42, %v4285_v39  ;;  %v4288_v45 = vpop.f32.mrb[6].mxu0 }
 0x157   : > { %v4351_v40 = vadd.f32 %v4350_v36, %v4349_v33  ;;  %v4352_v41 = vpop.f32.mrb[6].mxu1  ;;  %v4289_v47 = vpop.f32.mrb[7].mxu0 }
 0x158   : > { %v4353_v43 = vpop.f32.mrb[7].mxu1  ;;  %v4290_v50 = vadd.f32 %v4289_v47, %v4288_v45 }
 0x159   : > { %v4354_v46 = vadd.f32 %v4353_v43, %v4352_v41  ;;  %v5672_v49 = vadd.f32 %v4351_v40, %v4287_v44 }
 0x15b   : > { %v5674_v51 = vadd.f32 %v4354_v46, %v4290_v50 }
 0x15c   : > { %v4291_v55 = vpop.f32.mrb[8].mxu0 }
 0x15d   : > { %v4355_v52 = vpop.f32.mrb[8].mxu1  ;;  %v4292_v60 = vpop.f32.mrb[9].mxu0 }
 0x15e   : > { %v4356_v53 = vpop.f32.mrb[9].mxu1  ;;  %v4293_v62 = vadd.f32 %v4292_v60, %v4291_v55  ;;  %v4294_v63 = vpop.f32.mrb[10].mxu0 }
 0x15f   : > { %v4357_v57 = vadd.f32 %v4356_v53, %v4355_v52  ;;  %v4358_v58 = vpop.f32.mrb[10].mxu1  ;;  %v4295_v1 = vpop.f32.mrb[11].mxu0 }
 0x160   : > { %v4359_v61 = vpop.f32.mrb[11].mxu1  ;;  %v4296_v3 = vadd.f32 %v4295_v1, %v4294_v63 }
 0x161   : > { %v4360_v0 = vadd.f32 %v4359_v61, %v4358_v58  ;;  %v5679_v48 = vadd.f32 %v4357_v57, %v4293_v62 }
 0x163   : > { %v5681_v4 = vadd.f32 %v4360_v0, %v4296_v3 }
 0x164   : > { %v4297_v8 = vpop.f32.mrb[12].mxu0 }
 0x165   : > { %v4361_v5 = vpop.f32.mrb[12].mxu1  ;;  %v4298_v10 = vpop.f32.mrb[13].mxu0 }
 0x166   : > { %v4362_v6 = vpop.f32.mrb[13].mxu1  ;;  %v4299_v12 = vadd.f32 %v4298_v10, %v4297_v8  ;;  %v4300_v14 = vpop.f32.mrb[14].mxu0 }
 0x167   : > { %v4363_v7 = vadd.f32 %v4362_v6, %v4361_v5  ;;  %v4364_v9 = vpop.f32.mrb[14].mxu1  ;;  %v4301_v15 = vpop.f32.mrb[15].mxu0 }
 0x168   : > { %v4365_v11 = vpop.f32.mrb[15].mxu1  ;;  %v4302_v20 = vadd.f32 %v4301_v15, %v4300_v14 }
 0x169   : > { %v4366_v16 = vadd.f32 %v4365_v11, %v4364_v9  ;;  %v5686_v18 = vadd.f32 %v4363_v7, %v4299_v12 }
 0x16b   : > { %v5688_v21 = vadd.f32 %v4366_v16, %v4302_v20 }
 0x16c   : > { %v4303_v25 = vpop.f32.mrb[16].mxu0 }
 0x16d   : > { %v4367_v23 = vpop.f32.mrb[16].mxu1  ;;  %v4304_v28 = vpop.f32.mrb[17].mxu0 }
 0x16e   : > { %v4368_v24 = vpop.f32.mrb[17].mxu1  ;;  %v4305_v30 = vadd.f32 %v4304_v28, %v4303_v25  ;;  %v4306_v31 = vpop.f32.mrb[18].mxu0 }
 0x16f   : > { %v4369_v26 = vadd.f32 %v4368_v24, %v4367_v23  ;;  %v4370_v13 = vpop.f32.mrb[18].mxu1  ;;  %v4307_v2 = vpop.f32.mrb[19].mxu0 }
 0x170   : > { %v4371_v29 = vpop.f32.mrb[19].mxu1  ;;  %v4308_v59 = vadd.f32 %v4307_v2, %v4306_v31 }
 0x171   : > { %v4372_v54 = vadd.f32 %v4371_v29, %v4370_v13  ;;  %v5693_v27 = vadd.f32 %v4369_v26, %v4305_v30 }
 0x173   : > { %v5695_v19 = vadd.f32 %v4372_v54, %v4308_v59 }
 0x174   : > { %v4309_v37 = vpop.f32.mrb[20].mxu0 }
 0x175   : > { %v4373_v32 = vpop.f32.mrb[20].mxu1  ;;  %v4310_v39 = vpop.f32.mrb[21].mxu0 }
 0x176   : > { %v4374_v35 = vpop.f32.mrb[21].mxu1  ;;  %v4311_v41 = vadd.f32 %v4310_v39, %v4309_v37  ;;  %v4312_v42 = vpop.f32.mrb[22].mxu0 }
 0x177   : > { %v4375_v33 = vadd.f32 %v4374_v35, %v4373_v32  ;;  %v4376_v36 = vpop.f32.mrb[22].mxu1  ;;  %v4313_v44 = vpop.f32.mrb[23].mxu0 }
 0x178   : > { %v4377_v40 = vpop.f32.mrb[23].mxu1  ;;  %v4314_v46 = vadd.f32 %v4313_v44, %v4312_v42 }
 0x179   : > { %v4378_v43 = vadd.f32 %v4377_v40, %v4376_v36  ;;  %v5697_v45 = vadd.f32 %v4375_v33, %v4311_v41 }
 0x17b   : > { %v5699_v47 = vadd.f32 %v4378_v43, %v4314_v46 }
 0x17c   : > { %v4315_v52 = vpop.f32.mrb[24].mxu0 }
 0x17d   : > { %v4379_v50 = vpop.f32.mrb[24].mxu1  ;;  %v4316_v55 = vpop.f32.mrb[25].mxu0 }
 0x17e   : > { %v4380_v53 = vpop.f32.mrb[25].mxu1  ;;  %v4317_v56 = vadd.f32 %v4316_v55, %v4315_v52  ;;  %v4318_v60 = vpop.f32.mrb[26].mxu0 }
 0x17f   : > { %v4381_v57 = vadd.f32 %v4380_v53, %v4379_v50  ;;  %v4382_v58 = vpop.f32.mrb[26].mxu1  ;;  %v4319_v62 = vpop.f32.mrb[27].mxu0 }
 0x180   : > { %v4383_v61 = vpop.f32.mrb[27].mxu1  ;;  %v4320_v1 = vadd.f32 %v4319_v62, %v4318_v60 }
 0x181   : > { %v4384_v63 = vadd.f32 %v4383_v61, %v4382_v58  ;;  %v5701_v0 = vadd.f32 %v4381_v57, %v4317_v56 }
 0x183   : > { %v5703_v3 = vadd.f32 %v4384_v63, %v4320_v1 }
 0x184   : > { %v4321_v6 = vpop.f32.mrb[28].mxu0 }
 0x185   : > { %v4385_v5 = vpop.f32.mrb[28].mxu1  ;;  %v4322_v7 = vpop.f32.mrb[29].mxu0 }
 0x186   : > { %v4386_v8 = vpop.f32.mrb[29].mxu1  ;;  %v4323_v11 = vadd.f32 %v4322_v7, %v4321_v6  ;;  %v4324_v12 = vpop.f32.mrb[30].mxu0 }
 0x187   : > { %v4387_v9 = vadd.f32 %v4386_v8, %v4385_v5  ;;  %v4388_v10 = vpop.f32.mrb[30].mxu1  ;;  %v4325_v16 = vpop.f32.mrb[31].mxu0 }
 0x188   : > { %v4389_v14 = vpop.f32.mrb[31].mxu1  ;;  %v4326_v20 = vadd.f32 %v4325_v16, %v4324_v12 }
 0x189   : > { %v4390_v17 = vadd.f32 %v4389_v14, %v4388_v10  ;;  %v5705_v15 = vadd.f32 %v4387_v9, %v4323_v11 }
 0x18b   : > { %v5707_v23 = vadd.f32 %v4390_v17, %v4326_v20 }
 0x18c   : > { %v4407_v24 = vpop.f32.mrb[32].mxu0 }
 0x18d   : > { %v4408_v25 = vpop.f32.mrb[33].mxu0 }
 0x18e   : > { %v4409_v26 = vadd.f32 %v4408_v25, %v4407_v24  ;;  %v4410_v13 = vpop.f32.mrb[34].mxu0  ;;  %v4471_v30 = vpop.f32.mrb[32].mxu1 }
 0x18f   : > { %v4411_v28 = vpop.f32.mrb[35].mxu0  ;;  %v4472_v54 = vpop.f32.mrb[33].mxu1 }
 0x190   : > { %v2475_v29 = vadd.f32 %v4409_v26, %v5665_v34  ;;  %v4412_v31 = vadd.f32 %v4411_v28, %v4410_v13  ;;  %v4473_v22 = vadd.f32 %v4472_v54, %v4471_v30  ;;  %v4474_v59 = vpop.f32.mrb[34].mxu1 }
 0x191   : > { %v4475_v32 = vpop.f32.mrb[35].mxu1 }
 0x192   : > { %v2476_v2 = vadd.f32 %v4412_v31, %v5670_v38  ;;  %v4476_v35 = vadd.f32 %v4475_v32, %v4474_v59  ;;  %v5711_v37 = vadd.f32 %v4473_v22, %v2475_v29 }
 0x194   : > { %v4413_v33 = vpop.f32.mrb[36].mxu0  ;;  %v5713_v36 = vadd.f32 %v4476_v35, %v2476_v2 }
 0x195   : > { %v4414_v39 = vpop.f32.mrb[37].mxu0 }
 0x196   : > { %v4415_v40 = vadd.f32 %v4414_v39, %v4413_v33  ;;  %v4416_v41 = vpop.f32.mrb[38].mxu0  ;;  %v4477_v43 = vpop.f32.mrb[36].mxu1 }
 0x197   : > { %v4417_v42 = vpop.f32.mrb[39].mxu0  ;;  %v4478_v46 = vpop.f32.mrb[37].mxu1 }
 0x198   : > { %v2477_v34 = vadd.f32 %v4415_v40, %v5672_v49  ;;  %v4418_v44 = vadd.f32 %v4417_v42, %v4416_v41  ;;  %v4479_v50 = vadd.f32 %v4478_v46, %v4477_v43  ;;  %v4480_v52 = vpop.f32.mrb[38].mxu1 }
 0x199   : > { %v4481_v53 = vpop.f32.mrb[39].mxu1 }
 0x19a   : > { %v2478_v38 = vadd.f32 %v4418_v44, %v5674_v51  ;;  %v4482_v55 = vadd.f32 %v4481_v53, %v4480_v52  ;;  %v5717_v57 = vadd.f32 %v4479_v50, %v2477_v34 }
 0x19c   : > { %v5719_v58 = vadd.f32 %v4482_v55, %v2478_v38  ;;  %v4419_v56 = vpop.f32.mrb[40].mxu0 }
 0x19d   : > { %v4420_v60 = vpop.f32.mrb[41].mxu0 }
 0x19e   : > { %v4421_v61 = vadd.f32 %v4420_v60, %v4419_v56  ;;  %v4422_v62 = vpop.f32.mrb[42].mxu0 }
 0x19f   : > { %v4423_v63 = vpop.f32.mrb[43].mxu0  ;;  %v4483_v1 = vpop.f32.mrb[40].mxu1 }
 0x1a0   : > { %v2479_v49 = vadd.f32 %v4421_v61, %v5679_v48  ;;  %v4424_v5 = vadd.f32 %v4423_v63, %v4422_v62  ;;  %v4484_v6 = vpop.f32.mrb[41].mxu1 }
 0x1a1   : > { %v4485_v8 = vadd.f32 %v4484_v6, %v4483_v1  ;;  %v4486_v7 = vpop.f32.mrb[42].mxu1 }
 0x1a2   : > { %v2480_v51 = vadd.f32 %v4424_v5, %v5681_v4  ;;  %v4487_v9 = vpop.f32.mrb[43].mxu1 }
 0x1a3   : > { %v4488_v10 = vadd.f32 %v4487_v9, %v4486_v7  ;;  %v5723_v11 = vadd.f32 %v4485_v8, %v2479_v49 }
 0x1a4   : > { %v4425_v12 = vpop.f32.mrb[44].mxu0 }
 0x1a5   : > { %v5725_v14 = vadd.f32 %v4488_v10, %v2480_v51  ;;  %v4426_v16 = vpop.f32.mrb[45].mxu0 }
 0x1a6   : > { %v4427_v17 = vadd.f32 %v4426_v16, %v4425_v12  ;;  %v4428_v20 = vpop.f32.mrb[46].mxu0 }
 0x1a7   : > { %v4429_v24 = vpop.f32.mrb[47].mxu0  ;;  %v4489_v25 = vpop.f32.mrb[44].mxu1 }
 0x1a8   : > { %v2481_v48 = vadd.f32 %v4427_v17, %v5686_v18  ;;  %v4430_v26 = vadd.f32 %v4429_v24, %v4428_v20  ;;  %v4490_v13 = vpop.f32.mrb[45].mxu1 }
 0x1a9   : > { %v4491_v28 = vadd.f32 %v4490_v13, %v4489_v25  ;;  %v4492_v29 = vpop.f32.mrb[46].mxu1 }
 0x1aa   : > { %v2482_v4 = vadd.f32 %v4430_v26, %v5688_v21  ;;  %v4493_v30 = vpop.f32.mrb[47].mxu1 }
 0x1ab   : > { %v4494_v31 = vadd.f32 %v4493_v30, %v4492_v29  ;;  %v5729_v54 = vadd.f32 %v4491_v28, %v2481_v48 }
 0x1ac   : > { %v4431_v22 = vpop.f32.mrb[48].mxu0 }
 0x1ad   : > { %v5731_v2 = vadd.f32 %v4494_v31, %v2482_v4  ;;  %v4432_v59 = vpop.f32.mrb[49].mxu0 }
 0x1ae   : > { %v4433_v32 = vadd.f32 %v4432_v59, %v4431_v22  ;;  %v4434_v35 = vpop.f32.mrb[50].mxu0 }
 0x1af   : > { %v4435_v33 = vpop.f32.mrb[51].mxu0  ;;  %v4495_v39 = vpop.f32.mrb[48].mxu1 }
 0x1b0   : > { %v2483_v18 = vadd.f32 %v4433_v32, %v5693_v27  ;;  %v4436_v40 = vadd.f32 %v4435_v33, %v4434_v35  ;;  %v4496_v41 = vpop.f32.mrb[49].mxu1 }
 0x1b1   : > { %v4497_v42 = vadd.f32 %v4496_v41, %v4495_v39  ;;  %v4498_v34 = vpop.f32.mrb[50].mxu1 }
 0x1b2   : > { %v2484_v21 = vadd.f32 %v4436_v40, %v5695_v19  ;;  %v4499_v43 = vpop.f32.mrb[51].mxu1 }
 0x1b3   : > { %v4500_v44 = vadd.f32 %v4499_v43, %v4498_v34  ;;  %v5735_v46 = vadd.f32 %v4497_v42, %v2483_v18 }
 0x1b5   : > { %v4437_v38 = vpop.f32.mrb[52].mxu0  ;;  %v5737_v50 = vadd.f32 %v4500_v44, %v2484_v21  ;;  %v5756_v21 = vld [vmem:[%s5819_s5] ss:$0 sm:$0xff] }
 0x1b6   : > { %v4438_v52 = vpop.f32.mrb[53].mxu0 }
 0x1b7   : > { %v4439_v53 = vadd.f32 %v4438_v52, %v4437_v38  ;;  %v4440_v55 = vpop.f32.mrb[54].mxu0 }
 0x1b8   : > { %v4441_v56 = vpop.f32.mrb[55].mxu0  ;;  %v4501_v60 = vpop.f32.mrb[52].mxu1 }
 0x1b9   : > { %v2485_v27 = vadd.f32 %v4439_v53, %v5697_v45  ;;  %v4442_v61 = vadd.f32 %v4441_v56, %v4440_v55  ;;  %v4502_v62 = vpop.f32.mrb[53].mxu1 }
 0x1ba   : > { %v4503_v63 = vadd.f32 %v4502_v62, %v4501_v60  ;;  %v4504_v49 = vpop.f32.mrb[54].mxu1 }
 0x1bb   : > { %v2486_v19 = vadd.f32 %v4442_v61, %v5699_v47  ;;  %v4505_v1 = vpop.f32.mrb[55].mxu1 }
 0x1bc   : > { %v4506_v5 = vadd.f32 %v4505_v1, %v4504_v49  ;;  %v5741_v6 = vadd.f32 %v4503_v63, %v2485_v27 }
 0x1be   : > { %v5743_v51 = vadd.f32 %v4506_v5, %v2486_v19 }
 0x1bf   : > { %v4443_v8 = vpop.f32.mrb[56].mxu0 }
 0x1c0   : > { %v4444_v7 = vpop.f32.mrb[57].mxu0 }
 0x1c1   : > { %v4445_v9 = vadd.f32 %v4444_v7, %v4443_v8  ;;  %v4446_v10 = vpop.f32.mrb[58].mxu0 }
 0x1c2   : > { %v4447_v12 = vpop.f32.mrb[59].mxu0 }
 0x1c3   : > { %v2487_v45 = vadd.f32 %v4445_v9, %v5701_v0  ;;  %v4507_v16 = vpop.f32.mrb[56].mxu1  ;;  %v4448_v17 = vadd.f32 %v4447_v12, %v4446_v10 }
 0x1c4   : > { %v4508_v20 = vpop.f32.mrb[57].mxu1 }
 0x1c5   : > { %v2488_v47 = vadd.f32 %v4448_v17, %v5703_v3  ;;  %v4509_v24 = vadd.f32 %v4508_v20, %v4507_v16  ;;  %v4510_v48 = vpop.f32.mrb[58].mxu1 }
 0x1c6   : > { %v4511_v25 = vpop.f32.mrb[59].mxu1 }
 0x1c7   : > { %v4512_v26 = vadd.f32 %v4511_v25, %v4510_v48  ;;  %v5747_v13 = vadd.f32 %v4509_v24, %v2487_v45 }
 0x1c9   : > { %v4449_v4 = vpop.f32.mrb[60].mxu0  ;;  %v5749_v28 = vadd.f32 %v4512_v26, %v2488_v47 }
 0x1ca   : > { %v4450_v29 = vpop.f32.mrb[61].mxu0 }
 0x1cb   : > { %v4451_v30 = vadd.f32 %v4450_v29, %v4449_v4  ;;  %v4452_v31 = vpop.f32.mrb[62].mxu0 }
 0x1cc   : > { %v4453_v22 = vpop.f32.mrb[63].mxu0 }
 0x1cd   : > { %v2489_v0 = vadd.f32 %v4451_v30, %v5705_v15  ;;  %v4513_v59 = vpop.f32.mrb[60].mxu1  ;;  %v4454_v32 = vadd.f32 %v4453_v22, %v4452_v31 }
 0x1ce   : > { %v4514_v35 = vpop.f32.mrb[61].mxu1 }
 0x1cf   : > { %v2490_v3 = vadd.f32 %v4454_v32, %v5707_v23  ;;  %v4515_v33 = vadd.f32 %v4514_v35, %v4513_v59  ;;  %v4516_v18 = vpop.f32.mrb[62].mxu1 }
 0x1d0   : > { %v4517_v39 = vpop.f32.mrb[63].mxu1 }
 0x1d1   : > { %v4518_v40 = vadd.f32 %v4517_v39, %v4516_v18  ;;  %v4569_v41 = vpop.f32.mrb[64].mxu0  ;;  %v3060_v42 = vadd.f32 %v4515_v33, %v2489_v0 }
 0x1d2   : > { %v3393_v34 = vadd.f32 %v4569_v41, %v5717_v57  ;;  %v3328_v43 = vpop.f32.mrb[65].mxu0 }
 0x1d3   : > { %v3391_v15 = vadd.f32 %v3328_v43, %v5711_v37  ;;  %v4570_v44 = vpop.f32.mrb[66].mxu0  ;;  %v3061_v38 = vadd.f32 %v4518_v40, %v2490_v3 }
 0x1d4   : > { %v3448_v23 = vadd.f32 %v5756_v21, %v3393_v34  ;;  %v3394_v52 = vadd.f32 %v4570_v44, %v5719_v58  ;;  %v3331_v53 = vpop.f32.mrb[67].mxu0 }
 0x1d5   : > { %v3446_v55 = vadd.f32 %v5756_v21, %v3391_v15  ;;  %v3392_v56 = vadd.f32 %v3331_v53, %v5713_v36 }
 0x1d6   : > { %v3449_v27 = vadd.f32 %v5756_v21, %v3394_v52  ;;  %v3464_v61 = vmax.f32 %v3448_v23, 0.0 }
 0x1d7   : > { %v3447_v60 = vadd.f32 %v5756_v21, %v3392_v56  ;;  %v3462_v62 = vmax.f32 %v3446_v55, 0.0 }
 0x1d8   : > { %v3465_v57 = vmax.f32 %v3449_v27, 0.0 }
 0x1d9   : > { %v3463_v19 = vmax.f32 %v3447_v60, 0.0  ;;  %v4573_v37 = vpop.f32.mrb[68].mxu0 }
 0x1da   : > { %v3479_v63 = vpack.c.bf16 %v3465_v57, %v3464_v61  ;;  %v3397_v49 = vadd.f32 %v4573_v37, %v5729_v54  ;;  %v3344_v1 = vpop.f32.mrb[69].mxu0 }
 0x1db   : > { %v3395_v58 = vadd.f32 %v3344_v1, %v5723_v11  ;;  %v4574_v5 = vpop.f32.mrb[70].mxu0  ;;  %v3478_v8 = vpack.c.bf16 %v3463_v19, %v3462_v62 }
 0x1dc   : > { %v3452_v7 = vadd.f32 %v5756_v21, %v3397_v49  ;;  %v3398_v36 = vadd.f32 %v4574_v5, %v5731_v2  ;;  %v3347_v9 = vpop.f32.mrb[71].mxu0 }
 0x1dd   : > { %v3450_v10 = vadd.f32 %v5756_v21, %v3395_v58  ;;  %v3396_v12 = vadd.f32 %v3347_v9, %v5725_v14  ;;  %4599 = vmatprep.mubr.bf16.mxu1 %v3478_v8 }
 0x1de   : > { %v3453_v45 = vadd.f32 %v5756_v21, %v3398_v36  ;;  %4600 = vmatmul.mubr.bf16.vlgmr.msra.gmra.mrb[64].mxu1 %v3479_v63  ;;  %v3468_v16 = vmax.f32 %v3452_v7, 0.0 }
 0x1df   : > { %v3451_v54 = vadd.f32 %v5756_v21, %v3396_v12  ;;  %v3466_v11 = vmax.f32 %v3450_v10, 0.0 }
 0x1e0   : > { %v3469_v17 = vmax.f32 %v3453_v45, 0.0 }
 0x1e1   : > { %v3467_v20 = vmax.f32 %v3451_v54, 0.0  ;;  %v4577_v47 = vpop.f32.mrb[72].mxu0 }
 0x1e2   : > { %v3401_v24 = vadd.f32 %v4577_v47, %v5741_v6  ;;  %v3360_v48 = vpop.f32.mrb[73].mxu0  ;;  %v3481_v2 = vpack.c.bf16 %v3469_v17, %v3468_v16 }
 0x1e3   : > { %v3399_v25 = vadd.f32 %v3360_v48, %v5735_v46  ;;  %v4578_v26 = vpop.f32.mrb[74].mxu0  ;;  %v3480_v4 = vpack.c.bf16 %v3467_v20, %v3466_v11 }
 0x1e4   : > { %v3456_v14 = vadd.f32 %v5756_v21, %v3401_v24  ;;  %v3402_v29 = vadd.f32 %v4578_v26, %v5743_v51  ;;  %v3363_v30 = vpop.f32.mrb[75].mxu0 }
 0x1e5   : > { %v3454_v31 = vadd.f32 %v5756_v21, %v3399_v25  ;;  %v3400_v22 = vadd.f32 %v3363_v30, %v5737_v50  ;;  %4603 = vmatprep.mubr.bf16.mxu1 %v3480_v4 }
 0x1e6   : > { %v3457_v0 = vadd.f32 %v5756_v21, %v3402_v29  ;;  %4604 = vmatmul.mubr.bf16.gmra.mrb[68].mxu1 %v3481_v2  ;;  %v3472_v59 = vmax.f32 %v3456_v14, 0.0 }
 0x1e7   : > { %v3455_v6 = vadd.f32 %v5756_v21, %v3400_v22  ;;  %v3470_v46 = vmax.f32 %v3454_v31, 0.0 }
 0x1e8   : > { %v3473_v32 = vmax.f32 %v3457_v0, 0.0 }
 0x1e9   : > { %v3471_v35 = vmax.f32 %v3455_v6, 0.0  ;;  %v4581_v3 = vpop.f32.mrb[76].mxu0 }
 0x1ea   : > { %v3405_v33 = vadd.f32 %v4581_v3, %v3060_v42  ;;  %v3376_v18 = vpop.f32.mrb[77].mxu0  ;;  %v3483_v39 = vpack.c.bf16 %v3473_v32, %v3472_v59 }
 0x1eb   : > { %v3403_v51 = vadd.f32 %v3376_v18, %v5747_v13  ;;  %v4582_v40 = vpop.f32.mrb[78].mxu0  ;;  %v3482_v41 = vpack.c.bf16 %v3471_v35, %v3470_v46 }
 0x1ec   : > { %v3460_v50 = vadd.f32 %v5756_v21, %v3405_v33  ;;  %v3406_v34 = vadd.f32 %v4582_v40, %v3061_v38  ;;  %v3379_v43 = vpop.f32.mrb[79].mxu0 }
 0x1ed   : > { %v3458_v15 = vadd.f32 %v5756_v21, %v3403_v51  ;;  %v3404_v44 = vadd.f32 %v3379_v43, %v5749_v28  ;;  %4607 = vmatprep.mubr.bf16.mxu1 %v3482_v41  ;;  %v4171_v28 = vld [vmem:[%s5821_s7] ss:$0 sm:$0xff] }
 0x1ee   : > { %v3461_v23 = vadd.f32 %v5756_v21, %v3406_v34  ;;  %4608 = vmatmul.mubr.bf16.gmra.mrb[72].mxu1 %v3483_v39  ;;  %v3476_v52 = vmax.f32 %v3460_v50, 0.0 }
 0x1ef   : > { %v3459_v42 = vadd.f32 %v5756_v21, %v3404_v44  ;;  %v3474_v55 = vmax.f32 %v3458_v15, 0.0 }
 0x1f0   : > { %v3477_v53 = vmax.f32 %v3461_v23, 0.0 }
 0x1f1   : > { %v3475_v13 = vmax.f32 %v3459_v42, 0.0 }
 0x1f2   : > { %v3485_v56 = vpack.c.bf16 %v3477_v53, %v3476_v52 }
 0x1f3   : > { %v3484_v27 = vpack.c.bf16 %v3475_v13, %v3474_v55 }
 0x1f5   : > { %4611 = vmatprep.mubr.bf16.mxu1 %v3484_v27 }
 0x1f6   : > { %4612 = vmatmul.mubr.bf16.gmra.mrb[76].mxu1 %v3485_v56 }
 0x2b1   : > { %v4601_v38 = vpop.f32.mrb[64].mxu1 }
 0x2b2   : > { %v3591_v60 = vpop.f32.mrb[65].mxu1  ;;  %v3600_v57 = vadd.f32 %v4601_v38, %v4171_v28 }
 0x2b3   : > { %v4602_v61 = vpop.f32.mrb[66].mxu1  ;;  %v3592_v19 = vadd.f32 %v4171_v28, %v3591_v60 }
 0x2b4   : > { %v3603_v62 = vadd.f32 %v4602_v61, %v4171_v28  ;;  %v3594_v21 = vpop.f32.mrb[67].mxu1 }
 0x2b5   : > { %v3595_v37 = vadd.f32 %v4171_v28, %v3594_v21 }
 0x2b6   : > { %v4224_v63 = vpack.c.bf16 %v3603_v62, %v3600_v57 }
 0x2b7   : > { %v4219_v49 = vpack.c.bf16 %v3595_v37, %v3592_v19 }
 0x2b8   : > { %4256 = vst [vmem:[%s5022_s12 + $0x8] sm:$0xff] %v4224_v63  }
 0x2b9   : > { %4220 = vst [vmem:[%s5022_s12] sm:$0xff] %v4219_v49   ;;  %v4605_v1 = vpop.f32.mrb[68].mxu1 }
 0x2ba   : > { %v3607_v58 = vpop.f32.mrb[69].mxu1  ;;  %v3616_v8 = vadd.f32 %v4605_v1, %v4171_v28 }
 0x2bb   : > { %v4606_v5 = vpop.f32.mrb[70].mxu1  ;;  %v3608_v9 = vadd.f32 %v4171_v28, %v3607_v58 }
 0x2bc   : > { %v3619_v7 = vadd.f32 %v4606_v5, %v4171_v28  ;;  %v3610_v36 = vpop.f32.mrb[71].mxu1 }
 0x2bd   : > { %v3611_v10 = vadd.f32 %v4171_v28, %v3610_v36 }
 0x2be   : > { %v4234_v12 = vpack.c.bf16 %v3619_v7, %v3616_v8 }
 0x2bf   : > { %v4229_v45 = vpack.c.bf16 %v3611_v10, %v3608_v9 }
 0x2c0   : > { %4258 = vst [vmem:[%s5022_s12 + $0x18] sm:$0xff] %v4234_v12  }
 0x2c1   : > { %4257 = vst [vmem:[%s5022_s12 + $0x10] sm:$0xff] %v4229_v45   ;;  %v4609_v54 = vpop.f32.mrb[72].mxu1 }
 0x2c2   : > { %v3623_v16 = vpop.f32.mrb[73].mxu1  ;;  %v3632_v11 = vadd.f32 %v4609_v54, %v4171_v28 }
 0x2c3   : > { %v4610_v17 = vpop.f32.mrb[74].mxu1  ;;  %v3624_v24 = vadd.f32 %v4171_v28, %v3623_v16 }
 0x2c4   : > { %v3635_v20 = vadd.f32 %v4610_v17, %v4171_v28  ;;  %v3626_v47 = vpop.f32.mrb[75].mxu1 }
 0x2c5   : > { %v3627_v48 = vadd.f32 %v4171_v28, %v3626_v47 }
 0x2c6   : > { %v4244_v2 = vpack.c.bf16 %v3635_v20, %v3632_v11 }
 0x2c7   : > { %v4239_v25 = vpack.c.bf16 %v3627_v48, %v3624_v24 }
 0x2c8   : > { %4260 = vst [vmem:[%s5022_s12 + $0x28] sm:$0xff] %v4244_v2  }
 0x2c9   : > { %4259 = vst [vmem:[%s5022_s12 + $0x20] sm:$0xff] %v4239_v25   ;;  %v4613_v26 = vpop.f32.mrb[76].mxu1 }
 0x2ca   : > { %v3639_v4 = vpop.f32.mrb[77].mxu1  ;;  %v3648_v29 = vadd.f32 %v4613_v26, %v4171_v28 }
 0x2cb   : > { %v4614_v14 = vpop.f32.mrb[78].mxu1  ;;  %v3640_v22 = vadd.f32 %v4171_v28, %v3639_v4 }
 0x2cc   : > { %v3651_v30 = vadd.f32 %v4614_v14, %v4171_v28  ;;  %v3642_v31 = vpop.f32.mrb[79].mxu1 }
 0x2cd   : > { %v3643_v0 = vadd.f32 %v4171_v28, %v3642_v31 }
 0x2ce   : > { %v4254_v6 = vpack.c.bf16 %v3651_v30, %v3648_v29 }
 0x2cf   : > { %v4249_v59 = vpack.c.bf16 %v3643_v0, %v3640_v22 }
 0x2d0   : > { %4262 = vst [vmem:[%s5022_s12 + $0x38] sm:$0xff] %v4254_v6  }
 0x2d1   : > { %4261 = vst [vmem:[%s5022_s12 + $0x30] sm:$0xff] %v4249_v59  }
 0x2d2 PF: > { %s18_s9 = sadd.s32 1, %s4798_s9   ;;  %s5837_s27 = smov %s4790_s29 }
 0x2d3   : > { %p15_p13 = scmp.ge.s32.totalorder %s18_s9, 6   ;;  %s5838_s28 = smov %s4794_s30 }
 0x2d4   : > { %s5839_s29 = smov %s5842_s10  ;;  %s5840_s30 = smov %s5846_s11 }
 0x2d5   :  { %17 = sbr.rel (!%p15_p13) target bundleno = 3 (0x3), region = 102 }

</bundles_post_ra>
